<compile_context>
chip_gen: v7x
topology: tpu7x:2x2x1
jax: 0.10.0
libtpu: 0.0.40
codegen_flags: <defaults>
</compile_context>

<pallas_src>
import functools
import re

import jax
import jax.numpy as jnp
from jax.experimental import pallas as pl
from jax.experimental.pallas import tpu as pltpu


INPUT_DIM = 1
HIDDEN = 256
HIDDEN_DIMS = [HIDDEN] * 5
OUTPUT_DIM = 1

_TILE_TARGET = 2048   # upper bound on rows per grid step (VMEM is never the constraint)


def _round_up(n, m):
    return ((n + m - 1) // m) * m


def _tpu_generation():
    """Best-effort TPU generation (4/5/6/7...) from device_kind; 0 if unknown."""
    try:
        kind = str(jax.devices()[0].device_kind)
    except Exception:
        return 0
    m = re.search(r"(\d+)", kind)
    return int(m.group(1)) if m else 0


def _choose_tile_b(batch, gen):
    """Generation-aware batch tile.

    * v5e/older: 128-wide MXU, single TensorCore -> one tile rounded up to 128.
    * v6e: single TensorCore, 256-wide MXU -> one tile rounded up to 256 (splitting a
      serial grid only adds ~0.35 us/step overhead).
    * v7x: two TensorCores -> keep >= 2 balanced grid steps so the "parallel" batch
      axis can shard across both cores.
    """
    align = 128 if 0 < gen <= 5 else 256
    if gen >= 7 and batch > align:
        tile = _round_up(-(-batch // 2), align)   # two (or more) balanced tiles
    else:
        tile = _round_up(batch, align)            # single tile when it fits
    return max(align, min(_TILE_TARGET, tile))


def _mlp_kernel(x_ref, vec_ref, w2_ref, w3_ref, w4_ref, w5_ref, o_ref, *, act_dtype):
    """Forward pass for one batch tile. Activations are transposed: (HIDDEN, TILE_B)."""
    vec = vec_ref[...]                       # (H, 8) packed vector params, one VMEM tile
    x_row = x_ref[0]                         # (1, T) lane-dense input row, f32

    # Layer 1 (K == 1): outer product on the VPU (no MXU push for a depth-1 matmul).
    # Computed in f32 for accuracy, then carried in act_dtype.
    h = jnp.maximum(vec[:, 0:1] * x_row + vec[:, 1:2], 0.0)          # (H, T) f32
    h = h.astype(act_dtype)

    # Four HxH layers: MXU matmul with f32 accumulation; bias+ReLU epilogue carried in
    # act_dtype (bf16 on v6e/v7x halves epilogue vreg count and ld/st traffic).
    for li, w_ref in enumerate((w2_ref, w3_ref, w4_ref, w5_ref)):
        w = w_ref[...]                                               # (H, H), PyTorch (out, in)
        b = vec[:, 2 + li:3 + li].astype(act_dtype)                  # (H, 1)
        acc = jnp.dot(w, h.astype(w.dtype), preferred_element_type=jnp.float32)
        h = jnp.maximum(acc.astype(act_dtype) + b, 0.0)              # (H, T) act_dtype

    # Final layer (N == 1): VPU multiply + sublane reduction -> lane-dense (1, T) row.
    w6c = vec[:, 6:7]                                                # (H, 1) f32
    b6 = vec[0:1, 7:8]                                               # (1, 1) f32
    out = jnp.sum(h.astype(jnp.float32) * w6c, axis=0, keepdims=True) + b6
    o_ref[0] = out.astype(o_ref.dtype)


def init_params(key):
    """PyTorch nn.Linear layout/init: W (out, in), b (out,), U(-1/sqrt(fan_in), +)."""
    dims = [INPUT_DIM] + HIDDEN_DIMS + [OUTPUT_DIM]
    params = []
    for i in range(len(dims) - 1):
        fan_in, fan_out = dims[i], dims[i + 1]
        key, wk, bk = jax.random.split(key, 3)
        bound = 1.0 / (fan_in ** 0.5)
        w = jax.random.uniform(wk, (fan_out, fan_in), jnp.float32, -bound, bound)
        b = jax.random.uniform(bk, (fan_out,), jnp.float32, -bound, bound)
        params.append((w, b))
    return params


def _kernel_operands(params, mm_dtype):
    """Pack the degenerate vectors into one lane-dense (H, 8) f32 array and keep the
    four (H, H) matmul weights in PyTorch (out, in) layout at mm_dtype."""
    (w1, b1), (w2, b2), (w3, b3), (w4, b4), (w5, b5), (w6, b6) = params
    cols = [w1.reshape(HIDDEN).astype(jnp.float32),          # col 0: layer-1 weight column
            b1, b2, b3, b4, b5,                               # cols 1..5: hidden biases
            w6.reshape(HIDDEN).astype(jnp.float32),           # col 6: final weight column
            jnp.broadcast_to(b6.astype(jnp.float32), (HIDDEN,))]  # col 7: final bias
    packed_vec = jnp.stack([c.astype(jnp.float32) for c in cols], axis=1)   # (H, 8)
    mats = [w.astype(mm_dtype) for w in (w2, w3, w4, w5)]
    return packed_vec, mats


@functools.partial(jax.jit, static_argnames=("use_bf16_matmul", "bf16_activations", "tile_b"))
def _forward(x, params, *, use_bf16_matmul, bf16_activations, tile_b):
    B, in_dim = x.shape
    assert in_dim == INPUT_DIM
    num_tiles = -(-B // tile_b)
    b_pad = num_tiles * tile_b

    # Lane-dense input: a (1, tile_b) row per grid step instead of a (tile_b, 1) column.
    x_flat = x[:, 0].astype(jnp.float32)
    if b_pad != B:
        x_flat = jnp.concatenate([x_flat, jnp.zeros((b_pad - B,), jnp.float32)])
    x_rows = x_flat.reshape(num_tiles, 1, tile_b)

    mm_dtype = jnp.bfloat16 if use_bf16_matmul else jnp.float32
    act_dtype = jnp.bfloat16 if bf16_activations else jnp.float32
    packed_vec, mats = _kernel_operands(params, mm_dtype)

    # Parameters use constant index maps -> DMA'd into VMEM once, reused every step.
    in_specs = [pl.BlockSpec((1, 1, tile_b), lambda i: (i, 0, 0)),
                pl.BlockSpec(packed_vec.shape, lambda i: (0, 0))]
    in_specs += [pl.BlockSpec((HIDDEN, HIDDEN), lambda i: (0, 0)) for _ in mats]
    out_spec = pl.BlockSpec((1, 1, tile_b), lambda i: (i, 0, 0))

    mm_bytes = len(mats) * HIDDEN * HIDDEN * (2 if use_bf16_matmul else 4)
    cost = pl.CostEstimate(
        flops=b_pad * (2 * len(mats) * HIDDEN * HIDDEN + 6 * HIDDEN),
        transcendentals=0,
        bytes_accessed=8 * b_pad + mm_bytes + HIDDEN * 8 * 4,
    )

    out_rows = pl.pallas_call(
        functools.partial(_mlp_kernel, act_dtype=act_dtype),
        out_shape=jax.ShapeDtypeStruct((num_tiles, 1, tile_b), jnp.float32),
        grid_spec=pltpu.PrefetchScalarGridSpec(
            num_scalar_prefetch=0,
            grid=(num_tiles,),
            in_specs=in_specs,
            out_specs=out_spec,
        ),
        compiler_params=pltpu.CompilerParams(
            # Batch tiles are independent; on v7x this lets the two TCs share the grid.
            # TODO(synk): if xprof ever shows one v7x TC idle, switch to CORE_PARALLEL
            # on a leading axis of size 2.
            dimension_semantics=("parallel",),
        ),
        cost_estimate=cost,
    )(x_rows, packed_vec, *mats)

    return out_rows.reshape(b_pad, OUTPUT_DIM)[:B]


def option_price_network(x, params, *, use_bf16_matmul=None, bf16_activations=None,
                         tile_b=None):
    """x: (B, 1) float32 -> (B, 1) float32. Matches OptionPriceNetwork.forward."""
    gen = _tpu_generation()
    if use_bf16_matmul is None:
        use_bf16_matmul = True                          # MXU is bf16-native on v5e/v6e/v7x
    if bf16_activations is None:
        # bf16 epilogue carry only where the VPU has native bf16 (v6e / v7x).
        bf16_activations = bool(use_bf16_matmul) and gen >= 6
    if tile_b is None:
        tile_b = _choose_tile_b(x.shape[0], gen)
    return _forward(x, params,
                    use_bf16_matmul=bool(use_bf16_matmul),
                    bf16_activations=bool(bf16_activations),
                    tile_b=int(tile_b))


def reference_forward(x, params):
    """Pure-JAX reference matching PyTorch nn.Linear semantics: h = x @ W^T + b."""
    h = x
    n = len(params)
    for i, (w, b) in enumerate(params):
        h = h @ w.T + b
        if i < n - 1:
            h = jnp.maximum(h, 0.0)
    return h


if __name__ == "__main__":
    key = jax.random.PRNGKey(0)
    pkey, xkey = jax.random.split(key)

    params = init_params(pkey)

    # Small batch of "stock prices" S, shape (B, 1). B deliberately not a multiple of
    # the tile alignment to exercise the padding/slicing path.
    B = 500
    x = jax.random.uniform(xkey, (B, INPUT_DIM), jnp.float32, 0.5, 1.5)

    ref = reference_forward(x, params)

    # Default path: bf16 MXU inputs (f32 accumulation), bf16 epilogues on v6e/v7x.
    out = jax.block_until_ready(option_price_network(x, params))
    assert out.shape == (B, OUTPUT_DIM)
    assert jnp.allclose(out, ref, atol=5e-2, rtol=5e-2), "default (bf16) kernel mismatch"

    # Full-f32 path: must match the reference tightly.
    out_f32 = jax.block_until_ready(
        option_price_network(x, params, use_bf16_matmul=False, bf16_activations=False))
    assert jnp.allclose(out_f32, ref, atol=1e-4, rtol=1e-4), "f32 kernel mismatch"

    print("KERNEL_OK")
</pallas_src>

<mosaic_0001>
module attributes {stable_mosaic.version = 11 : i64} {
  func.func @_mlp_kernel(%arg0: i32, %arg1: memref<1x1x512xf32, #tpu.memory_space<vmem>>, %arg2: memref<256x8xf32, #tpu.memory_space<vmem>>, %arg3: memref<256x256xbf16, #tpu.memory_space<vmem>>, %arg4: memref<256x256xbf16, #tpu.memory_space<vmem>>, %arg5: memref<256x256xbf16, #tpu.memory_space<vmem>>, %arg6: memref<256x256xbf16, #tpu.memory_space<vmem>>, %arg7: memref<1x1x512xf32, #tpu.memory_space<vmem>>) attributes {dimension_semantics = [#tpu.dimension_semantics<parallel>], iteration_bounds = array<i64: 1>, scalar_prefetch = 0 : i64, scratch_operands = 0 : i64, tpu.core_type = #tpu.core_type<tc>, window_params = [{transform_indices = @transform_0, window_bounds = array<i64: 1, 1, 512>}, {pipeline_mode = #tpu.pipeline_mode<synchronous>, transform_indices = @transform_1, window_bounds = array<i64: 256, 8>}, {pipeline_mode = #tpu.pipeline_mode<synchronous>, transform_indices = @transform_2, window_bounds = array<i64: 256, 256>}, {pipeline_mode = #tpu.pipeline_mode<synchronous>, transform_indices = @transform_3, window_bounds = array<i64: 256, 256>}, {pipeline_mode = #tpu.pipeline_mode<synchronous>, transform_indices = @transform_4, window_bounds = array<i64: 256, 256>}, {pipeline_mode = #tpu.pipeline_mode<synchronous>, transform_indices = @transform_5, window_bounds = array<i64: 256, 256>}, {transform_indices = @transform_6, window_bounds = array<i64: 1, 1, 512>}]} {
    %c0 = arith.constant 0 : index
    %c0_0 = arith.constant 0 : index
    %0 = vector.load %arg2[%c0, %c0_0] : memref<256x8xf32, #tpu.memory_space<vmem>>, vector<256x8xf32>
    %c0_1 = arith.constant 0 : index
    %c0_2 = arith.constant 0 : index
    %c0_3 = arith.constant 0 : index
    %1 = vector.load %arg1[%c0_1, %c0_2, %c0_3] : memref<1x1x512xf32, #tpu.memory_space<vmem>>, vector<1x1x512xf32>
    %2 = vector.shape_cast %1 : vector<1x1x512xf32> to vector<1x512xf32>
    %3 = vector.extract_strided_slice %0 {offsets = [0, 0], sizes = [256, 1], strides = [1, 1]} : vector<256x8xf32> to vector<256x1xf32>
    %4 = vector.broadcast %3 : vector<256x1xf32> to vector<256x512xf32>
    %5 = vector.broadcast %2 : vector<1x512xf32> to vector<256x512xf32>
    %6 = arith.mulf %4, %5 : vector<256x512xf32>
    %7 = vector.extract_strided_slice %0 {offsets = [0, 1], sizes = [256, 1], strides = [1, 1]} : vector<256x8xf32> to vector<256x1xf32>
    %8 = vector.broadcast %7 : vector<256x1xf32> to vector<256x512xf32>
    %9 = arith.addf %6, %8 : vector<256x512xf32>
    %cst = arith.constant 0.000000e+00 : f32
    %10 = vector.broadcast %cst : f32 to vector<256x512xf32>
    %11 = arith.maximumf %9, %10 : vector<256x512xf32>
    %c0_4 = arith.constant 0 : index
    %c0_5 = arith.constant 0 : index
    %12 = vector.load %arg3[%c0_4, %c0_5] : memref<256x256xbf16, #tpu.memory_space<vmem>>, vector<256x256xbf16>
    %13 = vector.extract_strided_slice %0 {offsets = [0, 2], sizes = [256, 1], strides = [1, 1]} : vector<256x8xf32> to vector<256x1xf32>
    %14 = arith.truncf %11 : vector<256x512xf32> to vector<256x512xbf16>
    %cst_6 = arith.constant dense<0.000000e+00> : vector<256x512xf32>
    %15 = tpu.matmul %12, %14, %cst_6 {dimension_numbers = #tpu.dot_dimension_numbers<[1], [0], [0], [1], [0, 0, 1, 1], [], []>} : vector<256x256xbf16>, vector<256x512xbf16>, vector<256x512xf32> -> vector<256x512xf32>
    %16 = vector.broadcast %13 : vector<256x1xf32> to vector<256x512xf32>
    %17 = arith.addf %15, %16 : vector<256x512xf32>
    %cst_7 = arith.constant 0.000000e+00 : f32
    %18 = vector.broadcast %cst_7 : f32 to vector<256x512xf32>
    %19 = arith.maximumf %17, %18 : vector<256x512xf32>
    %c0_8 = arith.constant 0 : index
    %c0_9 = arith.constant 0 : index
    %20 = vector.load %arg4[%c0_8, %c0_9] : memref<256x256xbf16, #tpu.memory_space<vmem>>, vector<256x256xbf16>
    %21 = vector.extract_strided_slice %0 {offsets = [0, 3], sizes = [256, 1], strides = [1, 1]} : vector<256x8xf32> to vector<256x1xf32>
    %22 = arith.truncf %19 : vector<256x512xf32> to vector<256x512xbf16>
    %cst_10 = arith.constant dense<0.000000e+00> : vector<256x512xf32>
    %23 = tpu.matmul %20, %22, %cst_10 {dimension_numbers = #tpu.dot_dimension_numbers<[1], [0], [0], [1], [0, 0, 1, 1], [], []>} : vector<256x256xbf16>, vector<256x512xbf16>, vector<256x512xf32> -> vector<256x512xf32>
    %24 = vector.broadcast %21 : vector<256x1xf32> to vector<256x512xf32>
    %25 = arith.addf %23, %24 : vector<256x512xf32>
    %cst_11 = arith.constant 0.000000e+00 : f32
    %26 = vector.broadcast %cst_11 : f32 to vector<256x512xf32>
    %27 = arith.maximumf %25, %26 : vector<256x512xf32>
    %c0_12 = arith.constant 0 : index
    %c0_13 = arith.constant 0 : index
    %28 = vector.load %arg5[%c0_12, %c0_13] : memref<256x256xbf16, #tpu.memory_space<vmem>>, vector<256x256xbf16>
    %29 = vector.extract_strided_slice %0 {offsets = [0, 4], sizes = [256, 1], strides = [1, 1]} : vector<256x8xf32> to vector<256x1xf32>
    %30 = arith.truncf %27 : vector<256x512xf32> to vector<256x512xbf16>
    %cst_14 = arith.constant dense<0.000000e+00> : vector<256x512xf32>
    %31 = tpu.matmul %28, %30, %cst_14 {dimension_numbers = #tpu.dot_dimension_numbers<[1], [0], [0], [1], [0, 0, 1, 1], [], []>} : vector<256x256xbf16>, vector<256x512xbf16>, vector<256x512xf32> -> vector<256x512xf32>
    %32 = vector.broadcast %29 : vector<256x1xf32> to vector<256x512xf32>
    %33 = arith.addf %31, %32 : vector<256x512xf32>
    %cst_15 = arith.constant 0.000000e+00 : f32
    %34 = vector.broadcast %cst_15 : f32 to vector<256x512xf32>
    %35 = arith.maximumf %33, %34 : vector<256x512xf32>
    %c0_16 = arith.constant 0 : index
    %c0_17 = arith.constant 0 : index
    %36 = vector.load %arg6[%c0_16, %c0_17] : memref<256x256xbf16, #tpu.memory_space<vmem>>, vector<256x256xbf16>
    %37 = vector.extract_strided_slice %0 {offsets = [0, 5], sizes = [256, 1], strides = [1, 1]} : vector<256x8xf32> to vector<256x1xf32>
    %38 = arith.truncf %35 : vector<256x512xf32> to vector<256x512xbf16>
    %cst_18 = arith.constant dense<0.000000e+00> : vector<256x512xf32>
    %39 = tpu.matmul %36, %38, %cst_18 {dimension_numbers = #tpu.dot_dimension_numbers<[1], [0], [0], [1], [0, 0, 1, 1], [], []>} : vector<256x256xbf16>, vector<256x512xbf16>, vector<256x512xf32> -> vector<256x512xf32>
    %40 = vector.broadcast %37 : vector<256x1xf32> to vector<256x512xf32>
    %41 = arith.addf %39, %40 : vector<256x512xf32>
    %cst_19 = arith.constant 0.000000e+00 : f32
    %42 = vector.broadcast %cst_19 : f32 to vector<256x512xf32>
    %43 = arith.maximumf %41, %42 : vector<256x512xf32>
    %44 = vector.extract_strided_slice %0 {offsets = [0, 6], sizes = [256, 1], strides = [1, 1]} : vector<256x8xf32> to vector<256x1xf32>
    %45 = vector.extract_strided_slice %0 {offsets = [0, 7], sizes = [1, 1], strides = [1, 1]} : vector<256x8xf32> to vector<1x1xf32>
    %46 = vector.broadcast %44 : vector<256x1xf32> to vector<256x512xf32>
    %47 = arith.mulf %43, %46 : vector<256x512xf32>
    %cst_20 = arith.constant dense<0.000000e+00> : vector<512xf32>
    %48 = vector.multi_reduction <add>, %47, %cst_20 [0] : vector<256x512xf32> to vector<512xf32>
    %49 = vector.shape_cast %48 : vector<512xf32> to vector<1x512xf32>
    %50 = vector.broadcast %45 : vector<1x1xf32> to vector<1x512xf32>
    %51 = arith.addf %49, %50 : vector<1x512xf32>
    %c0_21 = arith.constant 0 : index
    %c0_22 = arith.constant 0 : index
    %c0_23 = arith.constant 0 : index
    %52 = vector.load %arg7[%c0_21, %c0_22, %c0_23] : memref<1x1x512xf32, #tpu.memory_space<vmem>>, vector<1x1x512xf32>
    %53 = vector.shape_cast %52 : vector<1x1x512xf32> to vector<1x512xf32>
    %54 = vector.shape_cast %51 : vector<1x512xf32> to vector<1x1x512xf32>
    tpu.vector_store %arg7[%c0_21, %c0_22, %c0_23], %54 {strides = array<i32>} : memref<1x1x512xf32, #tpu.memory_space<vmem>>, vector<1x1x512xf32>,
    return
  }
  func.func @transform_0(%arg0: i32) -> (i32, i32, i32) {
    %c0_i32 = arith.constant 0 : i32
    %c0_i32_0 = arith.constant 0 : i32
    %c0_i32_1 = arith.constant 0 : i32
    return %arg0, %c0_i32, %c0_i32_0 : i32, i32, i32
  }
  func.func @transform_1(%arg0: i32) -> (i32, i32) {
    %c0_i32 = arith.constant 0 : i32
    %c0_i32_0 = arith.constant 0 : i32
    %c0_i32_1 = arith.constant 0 : i32
    return %c0_i32, %c0_i32_0 : i32, i32
  }
  func.func @transform_2(%arg0: i32) -> (i32, i32) {
    %c0_i32 = arith.constant 0 : i32
    %c0_i32_0 = arith.constant 0 : i32
    %c0_i32_1 = arith.constant 0 : i32
    return %c0_i32, %c0_i32_0 : i32, i32
  }
  func.func @transform_3(%arg0: i32) -> (i32, i32) {
    %c0_i32 = arith.constant 0 : i32
    %c0_i32_0 = arith.constant 0 : i32
    %c0_i32_1 = arith.constant 0 : i32
    return %c0_i32, %c0_i32_0 : i32, i32
  }
  func.func @transform_4(%arg0: i32) -> (i32, i32) {
    %c0_i32 = arith.constant 0 : i32
    %c0_i32_0 = arith.constant 0 : i32
    %c0_i32_1 = arith.constant 0 : i32
    return %c0_i32, %c0_i32_0 : i32, i32
  }
  func.func @transform_5(%arg0: i32) -> (i32, i32) {
    %c0_i32 = arith.constant 0 : i32
    %c0_i32_0 = arith.constant 0 : i32
    %c0_i32_1 = arith.constant 0 : i32
    return %c0_i32, %c0_i32_0 : i32, i32
  }
  func.func @transform_6(%arg0: i32) -> (i32, i32, i32) {
    %c0_i32 = arith.constant 0 : i32
    %c0_i32_0 = arith.constant 0 : i32
    %c0_i32_1 = arith.constant 0 : i32
    return %arg0, %c0_i32, %c0_i32_0 : i32, i32, i32
  }
}

</mosaic_0001>

<bundles_post_ra>
// kernel: _forward.1
= control target key start
LH: loop header
LB: loop body
LE: loop exit
PB: predicated region body
PF: predicated region fallthrough
CT: control target
= control target key end

     0   :  { %v6820_v0 = vmov 1   ;;  %v6819_v7 = vmov 0   ;;  %v6818_v35 = vlaneseq  ;;  %s6811_s1 = inlined_call_operand.vmem [shape: f32[256,8], index: 1, kind: input, shape index: {}]   ;;  %s6812_s0 = inlined_call_operand.vmem [shape: f32[1,1,512], index: 0, kind: input, shape index: {}]   ;;  %s6813_s2 = inlined_call_operand.vmem [shape: bf16[256,256], index: 2, kind: input, shape index: {}]   ;;  %s6814_s3 = inlined_call_operand.vmem [shape: bf16[256,256], index: 3, kind: input, shape index: {}]   ;;  %s6815_s4 = inlined_call_operand.vmem [shape: bf16[256,256], index: 4, kind: input, shape index: {}]   ;;  %s6816_s5 = inlined_call_operand.vmem [shape: bf16[256,256], index: 5, kind: input, shape index: {}]   ;;  %s6817_s6 = inlined_call_operand.vmem [shape: f32[1,1,512], index: 6, kind: output, shape index: {}]  }
   0x1   :  { %4930 = vset.pattern.permute.xlu0 %v6820_v0  ;;  %4928 = vset.pattern.permute.xlu1 %v6820_v0  ;;  %v5327_v1 = vld [vmem:[%s6811_s1 + $0x10] sm:$0xff]  ;;  %v5332_v2 = vld [vmem:[%s6811_s1] sm:$0xff]  ;;  %v5344_v4 = vld [vmem:[%s6811_s1 + $0x8] sm:$0xff] }
   0x2   :  { %374 = vperm.xlu0 %4930, %v5327_v1   ;;  %366 = vperm.xlu1 %4928, %v5332_v2   ;;  %v5339_v3 = vld [vmem:[%s6811_s1 + $0x30] sm:$0xff]  ;;  %v5356_v6 = vld [vmem:[%s6811_s1 + $0x18] sm:$0xff]  ;;  %v5372_v10 = vld [vmem:[%s6811_s1 + $0x20] sm:$0xff]  ;;  %v5523_v39 = vshrl.u32 %v6818_v35, 7 }
   0x3   :  { %v5351_v5 = vld [vmem:[%s6811_s1 + $0x50] sm:$0xff]  ;;  %v5387_v13 = vld [vmem:[%s6811_s1 + $0x28] sm:$0xff]  ;;  %v5395_v14 = vld [vmem:[%s6811_s1 + $0x38] sm:$0xff] }
   0x4   :  { %v37_v8 = vld [vmem:[%s6811_s1 + $0x70] sm:$0xff]  ;;  %v5406_v15 = vld [vmem:[%s6811_s1 + $0x40] sm:$0xff]  ;;  %v5415_v16 = vld [vmem:[%s6811_s1 + $0x48] sm:$0xff]  ;;  %6829 = vst [vmem:[#allocation4_spill] sm:$0xff] %v5523_v39  ;;  %v223_v42 = vsub.s32 1, %v5523_v39  ;;  %v231_v43 = vsub.s32 3, %v5523_v39 }
   0x5   :  { %v41_v9 = vld [vmem:[%s6811_s1 + $0x90] sm:$0xff]  ;;  %v5425_v17 = vld [vmem:[%s6811_s1 + $0x68] sm:$0xff]  ;;  %v5430_v18 = vld [vmem:[%s6811_s1 + $0x58] sm:$0xff]  ;;  %v219_v44 = vsub.s32 0, %v5523_v39  ;;  %v227_v45 = vsub.s32 2, %v5523_v39 }
   0x6   :  { %390 = vperm.xlu0 %4930, %v5339_v3   ;;  %370 = vperm.xlu1 %4928, %v5344_v4   ;;  %v45_v11 = vld [vmem:[%s6811_s1 + $0xb0] sm:$0xff]  ;;  %v40_v19 = vld [vmem:[%s6811_s1 + $0x88] sm:$0xff]  ;;  %v5443_v20 = vld [vmem:[%s6811_s1 + $0x60] sm:$0xff] }
   0x7   :  { %v49_v12 = vld [vmem:[%s6811_s1 + $0xd0] sm:$0xff]  ;;  %v44_v21 = vld [vmem:[%s6811_s1 + $0xa8] sm:$0xff]  ;;  %v5461_v23 = vld [vmem:[%s6811_s1 + $0x78] sm:$0xff] }
   0x8   :  { %v5456_v22 = vld [vmem:[%s6811_s1 + $0xc8] sm:$0xff]  ;;  %6827 = vst [vmem:[#allocation2_spill] sm:$0xff] %v5461_v23  ;;  %v5476_v25 = vld [vmem:[%s6811_s1 + $0x80] sm:$0xff]  ;;  %v53_v26 = vld [vmem:[%s6811_s1 + $0xf0] sm:$0xff] }
   0x9   :  { %v5471_v24 = vld [vmem:[%s6811_s1 + $0xe8] sm:$0xff]  ;;  %v42_v27 = vld [vmem:[%s6811_s1 + $0x98] sm:$0xff]  ;;  %v5495_v28 = vld [vmem:[%s6811_s1 + $0xa0] sm:$0xff] }
   0xa   :  { %406 = vperm.xlu0 %4930, %v5351_v5   ;;  %4929 = vset.pattern.permute.xlu1 %v6819_v7  ;;  %6828 = vst [vmem:[#allocation3_spill] sm:$0xff] %v5495_v28  ;;  %v46_v29 = vld [vmem:[%s6811_s1 + $0xb8] sm:$0xff]  ;;  %v47_v37 = vld [vmem:[%s6811_s1 + $0xc0] sm:$0xff] }
   0xb   :  { %73 = vperm.xlu1 %4929, %v5356_v6   ;;  %v55_v46 = vld [vmem:[%s6812_s0] sm:$0xf]  ;;  %v50_v53 = vld [vmem:[%s6811_s1 + $0xd8] sm:$0xff] }
   0xc   :  { %v5537_v49 = vrot.slane %v55_v46, %v223_v42  ;;  %v5539_v50 = vrot.slane %v55_v46, %v231_v43  ;;  %v5541_v51 = vrot.slane %v55_v46, %v219_v44  ;;  %v5543_v52 = vrot.slane %v55_v46, %v227_v45 }
   0xe   :  { %422 = vperm.xlu0 %4930, %v37_v8  }
   0xf   :  { %4931 = vset.pattern.permute.xlu1 %v6820_v0 }
  0x10   :  { %378 = vperm.xlu1 %4931, %v5356_v6  }
  0x12   :  { %438 = vperm.xlu0 %4930, %v41_v9  }
  0x14   :  { %4932 = vset.pattern.permute.xlu1 %v6819_v7 }
  0x15   :  { %78 = vperm.xlu1 %4932, %v5372_v10  }
  0x16   :  { %454 = vperm.xlu0 %4930, %v45_v11  }
  0x19   :  { %4933 = vset.pattern.permute.xlu1 %v6820_v0 }
  0x1a   :  { %470 = vperm.xlu0 %4930, %v49_v12   ;;  %382 = vperm.xlu1 %4933, %v5372_v10  }
  0x1e   :  { %4955 = vset.pattern.permute.xlu0 %v6819_v7  ;;  %386 = vperm.xlu1 %4933, %v5387_v13  }
  0x1f   :  { %58 = vperm.xlu0 %4955, %v5332_v2  }
  0x22   :  { %4934 = vset.pattern.permute.xlu1 %v6819_v7 }
  0x23   :  { %63 = vperm.xlu0 %4955, %v5344_v4   ;;  %93 = vperm.xlu1 %4934, %v5395_v14  }
  0x27   :  { %68 = vperm.xlu0 %4955, %v5327_v1   ;;  %4935 = vset.pattern.permute.xlu1 %v6820_v0 }
  0x28   :  { %394 = vperm.xlu1 %4935, %v5395_v14  }
  0x2b   :  { %83 = vperm.xlu0 %4955, %v5387_v13  }
  0x2c   :  { %4936 = vset.pattern.permute.xlu1 %v6819_v7 }
  0x2d   :  { %98 = vperm.xlu1 %4936, %v5406_v15  }
  0x2f   :  { %88 = vperm.xlu0 %4955, %v5339_v3  }
  0x31   :  { %4937 = vset.pattern.permute.xlu1 %v6820_v0 }
  0x32   :  { %398 = vperm.xlu1 %4937, %v5406_v15  }
  0x33   :  { %103 = vperm.xlu0 %4955, %v5415_v16  }
  0x36   :  { %402 = vperm.xlu1 %4937, %v5415_v16  }
  0x37   :  { %108 = vperm.xlu0 %4955, %v5351_v5  }
  0x3a   :  { %4938 = vset.pattern.permute.xlu1 %v6819_v7 }
  0x3b   :  { %123 = vperm.xlu0 %4955, %v5425_v17   ;;  %113 = vperm.xlu1 %4938, %v5430_v18  }
  0x3f   :  { %128 = vperm.xlu0 %4955, %v37_v8   ;;  %4939 = vset.pattern.permute.xlu1 %v6820_v0 }
  0x40   :  { %410 = vperm.xlu1 %4939, %v5430_v18  }
  0x43   :  { %143 = vperm.xlu0 %4955, %v40_v19  }
  0x44   :  { %4940 = vset.pattern.permute.xlu1 %v6819_v7 }
  0x45   :  { %118 = vperm.xlu1 %4940, %v5443_v20  }
  0x47   :  { %148 = vperm.xlu0 %4955, %v41_v9  }
  0x49   :  { %4941 = vset.pattern.permute.xlu1 %v6820_v0 }
  0x4a   :  { %414 = vperm.xlu1 %4941, %v5443_v20  }
  0x4b   :  { %163 = vperm.xlu0 %4955, %v44_v21  }
  0x4e   :  { %418 = vperm.xlu1 %4941, %v5425_v17  }
  0x4f   :  { %168 = vperm.xlu0 %4955, %v45_v11  }
  0x52   :  { %4942 = vset.pattern.permute.xlu1 %v6819_v7 }
  0x53   :  { %183 = vperm.xlu0 %4955, %v5456_v22   ;;  %133 = vperm.xlu1 %4942, %v5461_v23  }
  0x57   :  { %188 = vperm.xlu0 %4955, %v49_v12   ;;  %4943 = vset.pattern.permute.xlu1 %v6820_v0 }
  0x58   :  { %426 = vperm.xlu1 %4943, %v5461_v23  }
  0x5b   :  { %203 = vperm.xlu0 %4955, %v5471_v24  }
  0x5c   :  { %4944 = vset.pattern.permute.xlu1 %v6819_v7 }
  0x5d   :  { %138 = vperm.xlu1 %4944, %v5476_v25  }
  0x5f   :  { %208 = vperm.xlu0 %4955, %v53_v26  }
  0x61   :  { %4945 = vset.pattern.permute.xlu1 %v6820_v0 }
  0x62   :  { %430 = vperm.xlu1 %4945, %v5476_v25  }
  0x63   :  { %4960 = vset.pattern.permute.xlu0 %v6820_v0 }
  0x64   :  { %486 = vperm.xlu0 %4960, %v53_v26  }
  0x66   :  { %434 = vperm.xlu1 %4945, %v40_v19  }
  0x6a   :  { %4946 = vset.pattern.permute.xlu1 %v6819_v7 }
  0x6b   :  { %153 = vperm.xlu1 %4946, %v42_v27  }
  0x6f   :  { %4947 = vset.pattern.permute.xlu1 %v6820_v0 }
  0x70   :  { %442 = vperm.xlu1 %4947, %v42_v27  }
  0x74   :  { %4948 = vset.pattern.permute.xlu1 %v6819_v7 }
  0x75   :  { %158 = vperm.xlu1 %4948, %v5495_v28  }
  0x79   :  { %4949 = vset.pattern.permute.xlu1 %v6820_v0 }
  0x7a   :  { %446 = vperm.xlu1 %4949, %v5495_v28  }
  0x7e   :  { %450 = vperm.xlu1 %4949, %v44_v21  }
  0x81   :  { %v5504_v30 = vpop.permute.xlu1 %366  ;;  %v5506_v31 = vpop.permute.xlu0 %374 }
  0x82   :  { %4950 = vset.pattern.permute.xlu1 %v6819_v7 }
  0x83   :  { %173 = vperm.xlu1 %4950, %v46_v29  }
  0x85   :  { %v5509_v32 = vpop.permute.xlu1 %370  ;;  %v5511_v33 = vpop.permute.xlu0 %390 }
  0x87   :  { %4951 = vset.pattern.permute.xlu1 %v6820_v0 }
  0x88   :  { %458 = vperm.xlu1 %4951, %v46_v29  }
  0x89   :  { %v5514_v34 = vpop.permute.xlu0 %406 }
  0x8a   :  { %v74_v36 = vpop.permute.xlu1 %73 }
  0x8b   :  { %v250_v56 = vmul.f32 %v5537_v49, %v74_v36  ;;  %v252_v57 = vmul.f32 %v5539_v50, %v74_v36  ;;  %v249_v58 = vmul.f32 %v5541_v51, %v74_v36  ;;  %v251_v59 = vmul.f32 %v5543_v52, %v74_v36 }
  0x8c   :  { %4952 = vset.pattern.permute.xlu1 %v6819_v7 }
  0x8d   :  { %178 = vperm.xlu1 %4952, %v47_v37   ;;  %v5520_v38 = vpop.permute.xlu0 %422 }
  0x8f   :  { %v379_v40 = vpop.permute.xlu1 %378 }
  0x90   :  { %v5556_v60 = vadd.f32 %v379_v40, %v250_v56  ;;  %v5558_v61 = vadd.f32 %v379_v40, %v252_v57  ;;  %v5560_v62 = vadd.f32 %v379_v40, %v249_v58  ;;  %v5562_v63 = vadd.f32 %v379_v40, %v251_v59 }
  0x91   :  { %4953 = vset.pattern.permute.xlu1 %v6820_v0  ;;  %v5526_v41 = vpop.permute.xlu0 %438 }
  0x92   :  { %462 = vperm.xlu1 %4953, %v47_v37  }
  0x94   :  { %v79_v47 = vpop.permute.xlu1 %78 }
  0x95   :  { %v5535_v48 = vpop.permute.xlu0 %454  ;;  %v254_v8 = vmul.f32 %v5537_v49, %v79_v47  ;;  %v256_v9 = vmul.f32 %v5539_v50, %v79_v47  ;;  %v253_v11 = vmul.f32 %v5541_v51, %v79_v47  ;;  %v255_v12 = vmul.f32 %v5543_v52, %v79_v47 }
  0x96   :  { %6830 = vst [vmem:[#allocation5_spill] sm:$0xff] %v5535_v48  ;;  %466 = vperm.xlu1 %4953, %v5456_v22  }
  0x99   :  { %v383_v54 = vpop.permute.xlu1 %382  ;;  %v5549_v55 = vpop.permute.xlu0 %470 }
  0x9a   :  { %6831 = vst [vmem:[#allocation6_spill] sm:$0xff] %v5549_v55  ;;  %4954 = vset.pattern.permute.xlu1 %v6819_v7  ;;  %v5570_v22 = vadd.f32 %v383_v54, %v254_v8  ;;  %v5572_v26 = vadd.f32 %v383_v54, %v256_v9  ;;  %v5574_v27 = vadd.f32 %v383_v54, %v253_v11 }
  0x9b   :  { %193 = vperm.xlu1 %4954, %v50_v53   ;;  %v5576_v29 = vadd.f32 %v383_v54, %v255_v12 }
  0x9d   :  { %v5568_v19 = vpop.permute.xlu1 %386 }
  0x9e   :  { %v59_v21 = vpop.permute.xlu0 %58 }
  0x9f   :  { %4956 = vset.pattern.permute.xlu1 %v6820_v0  ;;  %v238_v36 = vmul.f32 %v5537_v49, %v59_v21  ;;  %v240_v37 = vmul.f32 %v5539_v50, %v59_v21  ;;  %v237_v40 = vmul.f32 %v5541_v51, %v59_v21  ;;  %v239_v42 = vmul.f32 %v5543_v52, %v59_v21 }
  0xa0   :  { %474 = vperm.xlu1 %4956, %v50_v53   ;;  %v5594_v53 = vld [vmem:[%s6811_s1 + $0xe0] sm:$0xff] }
  0xa1   :  { %v494_v47 = vadd.f32 %v5504_v30, %v238_v36  ;;  %v496_v54 = vadd.f32 %v5504_v30, %v240_v37  ;;  %v493_v56 = vadd.f32 %v5504_v30, %v237_v40  ;;  %v495_v57 = vadd.f32 %v5504_v30, %v239_v42 }
  0xa2   :  { %v64_v58 = vpop.permute.xlu0 %63  ;;  %v94_v59 = vpop.permute.xlu1 %93 }
  0xa3   :  { %v242_v21 = vmul.f32 %v5537_v49, %v64_v58  ;;  %v622_v36 = vmax.f32 %v494_v47, 0.0  ;;  %v244_v30 = vmul.f32 %v5539_v50, %v64_v58  ;;  %v624_v37 = vmax.f32 %v496_v54, 0.0 }
  0xa4   :  { %4957 = vset.pattern.permute.xlu1 %v6819_v7  ;;  %v241_v40 = vmul.f32 %v5541_v51, %v64_v58  ;;  %v621_v42 = vmax.f32 %v493_v56, 0.0  ;;  %v243_v35 = vmul.f32 %v5543_v52, %v64_v58  ;;  %v623_v8 = vmax.f32 %v495_v57, 0.0 }
  0xa5   :  { %198 = vperm.xlu1 %4957, %v5594_v53   ;;  %v498_v11 = vadd.f32 %v5509_v32, %v242_v21  ;;  %v500_v12 = vadd.f32 %v5509_v32, %v244_v30  ;;  %v266_v9 = vmul.f32 %v5537_v49, %v94_v59  ;;  %v268_v47 = vmul.f32 %v5539_v50, %v94_v59 }
  0xa6   :  { %v69_v46 = vpop.permute.xlu0 %68  ;;  %v497_v54 = vadd.f32 %v5509_v32, %v241_v40  ;;  %v499_v7 = vadd.f32 %v5509_v32, %v243_v35  ;;  %v5613_v56 = vmul.f32 %v5541_v51, %v94_v59  ;;  %v5616_v57 = vmul.f32 %v5543_v52, %v94_v59 }
  0xa7   :  { %v5618_v58 = vpop.permute.xlu1 %394  ;;  %v626_v21 = vmax.f32 %v498_v11, 0.0  ;;  %v628_v45 = vmax.f32 %v500_v12, 0.0  ;;  %v246_v30 = vmul.f32 %v5537_v49, %v69_v46  ;;  %v248_v44 = vmul.f32 %v5539_v50, %v69_v46 }
  0xa8   :  { %v625_v43 = vmax.f32 %v497_v54, 0.0  ;;  %v627_v0 = vmax.f32 %v499_v7, 0.0  ;;  %v245_v40 = vmul.f32 %v5541_v51, %v69_v46  ;;  %v247_v32 = vmul.f32 %v5543_v52, %v69_v46 }
  0xa9   :  { %v6832_v35 = vmov 1   ;;  %v782_v39 = vpack.c.bf16 %v626_v21, %v622_v36  ;;  %v784_v55 = vpack.c.bf16 %v628_v45, %v624_v37  ;;  %v502_v59 = vadd.f32 %v5506_v31, %v246_v30 }
  0xaa   :  { %4958 = vset.pattern.permute.xlu1 %v6832_v35  ;;  %v504_v48 = vadd.f32 %v5506_v31, %v248_v44  ;;  %v84_v11 = vpop.permute.xlu0 %83  ;;  %v781_v12 = vpack.c.bf16 %v625_v43, %v621_v42  ;;  %v783_v28 = vpack.c.bf16 %v627_v0, %v623_v8  ;;  %v501_v54 = vadd.f32 %v5506_v31, %v245_v40 }
  0xab   :  { %478 = vperm.xlu1 %4958, %v5594_v53   ;;  %v503_v7 = vadd.f32 %v5506_v31, %v247_v32  ;;  %1133 = vmatprep.subr.bf16.mxu0 %v782_v39  ;;  %v630_v46 = vmax.f32 %v502_v59, 0.0  ;;  %v258_v36 = vmul.f32 %v5537_v49, %v84_v11  ;;  %v260_v45 = vmul.f32 %v5539_v50, %v84_v11 }
  0xac   :  { %1326 = vmatprep.subr.bf16.mxu1 %v784_v55  ;;  %v632_v23 = vmax.f32 %v504_v48, 0.0  ;;  %v5632_v37 = vpop.permute.xlu1 %98  ;;  %1134 = vmatpush1.bf16.msra.mxu0 %v781_v12  ;;  %v629_v44 = vmax.f32 %v501_v54, 0.0  ;;  %v257_v0 = vmul.f32 %v5541_v51, %v84_v11  ;;  %v259_v43 = vmul.f32 %v5543_v52, %v84_v11 }
  0xad   :  { %1327 = vmatpush1.bf16.msra.mxu1 %v783_v28  ;;  %v631_v21 = vmax.f32 %v503_v7, 0.0  ;;  %v6833_v31 = vmax.f32 %v5556_v60, 0.0  ;;  %v6834_v55 = vmax.f32 %v5558_v61, 0.0  ;;  %v514_v8 = vadd.f32 %v5568_v19, %v258_v36 }
  0xae   :  { %v516_v42 = vadd.f32 %v5568_v19, %v260_v45  ;;  %v89_v30 = vpop.permute.xlu0 %88  ;;  %v6835_v28 = vmax.f32 %v5560_v62, 0.0  ;;  %v6836_v32 = vmax.f32 %v5562_v63, 0.0  ;;  %v513_v11 = vadd.f32 %v5568_v19, %v257_v0 }
  0xaf   :  { %v786_v39 = vpack.c.bf16 %v6833_v31, %v630_v46  ;;  %v788_v48 = vpack.c.bf16 %v6834_v55, %v632_v23  ;;  %482 = vperm.xlu1 %4958, %v5471_v24   ;;  %v515_v60 = vadd.f32 %v5568_v19, %v259_v43  ;;  %v642_v23 = vmax.f32 %v514_v8, 0.0  ;;  %v5654_v24 = vld [vmem:[%s6811_s1 + $0xf8] sm:$0xff] }
  0xb0   :  { %v785_v40 = vpack.c.bf16 %v6835_v28, %v629_v44  ;;  %v787_v59 = vpack.c.bf16 %v6836_v32, %v631_v21  ;;  %v644_v61 = vmax.f32 %v516_v42, 0.0  ;;  %v262_v12 = vmul.f32 %v5537_v49, %v89_v30 }
  0xb1   :  { %1135 = vmatprep.subr.bf16.mxu0 %v786_v39  ;;  %1328 = vmatprep.subr.bf16.mxu1 %v788_v48  ;;  %v522_v54 = vadd.f32 %v5618_v58, %v266_v9  ;;  %v641_v62 = vmax.f32 %v513_v11, 0.0  ;;  %v643_v63 = vmax.f32 %v515_v60, 0.0  ;;  %v264_v7 = vmul.f32 %v5539_v50, %v89_v30  ;;  %v5658_v46 = vpop.permute.xlu1 %398 }
  0xb2   :  { %1136 = vmatpush1.bf16.msra.mxu0 %v785_v40  ;;  %1329 = vmatpush1.bf16.msra.mxu1 %v787_v59  ;;  %v524_v19 = vadd.f32 %v5618_v58, %v268_v47  ;;  %v6837_v36 = vmax.f32 %v5570_v22, 0.0  ;;  %v6838_v9 = vmax.f32 %v5572_v26, 0.0  ;;  %v518_v21 = vadd.f32 %v5511_v33, %v262_v12  ;;  %v104_v43 = vpop.permute.xlu0 %103 }
  0xb3   :  { %v650_v0 = vmax.f32 %v522_v54, 0.0  ;;  %v6839_v31 = vmov 0   ;;  %v6840_v39 = vmax.f32 %v5574_v27, 0.0  ;;  %v6841_v48 = vmax.f32 %v5576_v29, 0.0 }
  0xb4   :  { %v790_v45 = vpack.c.bf16 %v642_v23, %v6837_v36  ;;  %v792_v44 = vpack.c.bf16 %v644_v61, %v6838_v9  ;;  %4959 = vset.pattern.permute.xlu1 %v6839_v31  ;;  %v520_v8 = vadd.f32 %v5511_v33, %v264_v7  ;;  %v652_v42 = vmax.f32 %v524_v19, 0.0 }
  0xb5   :  { %v789_v55 = vpack.c.bf16 %v641_v62, %v6840_v39  ;;  %v791_v47 = vpack.c.bf16 %v643_v63, %v6841_v48  ;;  %213 = vperm.xlu1 %4959, %v5654_v24   ;;  %v646_v22 = vmax.f32 %v518_v21, 0.0  ;;  %v261_v26 = vmul.f32 %v5541_v51, %v89_v30  ;;  %v403_v11 = vpop.permute.xlu1 %402 }
  0xb6   :  { %1137 = vmatprep.subr.bf16.mxu0 %v790_v45  ;;  %v521_v28 = vadd.f32 %v5618_v58, %v5613_v56  ;;  %v263_v40 = vmul.f32 %v5543_v52, %v89_v30  ;;  %1330 = vmatprep.subr.bf16.mxu1 %v792_v44  ;;  %v648_v27 = vmax.f32 %v520_v8, 0.0  ;;  %v523_v29 = vadd.f32 %v5618_v58, %v5616_v57 }
  0xb7   :  { %1138 = vmatpush1.bf16.msra.mxu0 %v789_v55  ;;  %v270_v32 = vmul.f32 %v5537_v49, %v5632_v37  ;;  %v274_v59 = vmul.f32 %v5537_v49, %v104_v43  ;;  %1331 = vmatpush1.bf16.msra.mxu1 %v791_v47  ;;  %v794_v60 = vpack.c.bf16 %v650_v0, %v646_v22  ;;  %v109_v0 = vpop.permute.xlu0 %108 }
  0xb8   :  { %v517_v23 = vadd.f32 %v5511_v33, %v261_v26  ;;  %v649_v61 = vmax.f32 %v521_v28, 0.0  ;;  %v519_v56 = vadd.f32 %v5511_v33, %v263_v40  ;;  %v796_v30 = vpack.c.bf16 %v652_v42, %v648_v27 }
  0xb9   :  { %v651_v12 = vmax.f32 %v523_v29, 0.0  ;;  %v526_v54 = vadd.f32 %v5658_v46, %v270_v32  ;;  %v530_v62 = vadd.f32 %v403_v11, %v274_v59  ;;  %4961 = vset.pattern.permute.xlu1 %v6832_v35  ;;  %1139 = vmatprep.subr.bf16.mxu0 %v794_v60  ;;  %v272_v63 = vmul.f32 %v5539_v50, %v5632_v37 }
  0xba   :  { %v645_v57 = vmax.f32 %v517_v23, 0.0  ;;  %v647_v58 = vmax.f32 %v519_v56, 0.0  ;;  %v276_v7 = vmul.f32 %v5539_v50, %v104_v43  ;;  %1332 = vmatprep.subr.bf16.mxu1 %v796_v30  ;;  %490 = vperm.xlu1 %4961, %v5654_v24   ;;  %v269_v36 = vmul.f32 %v5541_v51, %v5632_v37  ;;  %v114_v31 = vpop.permute.xlu1 %113 }
  0xbb   :  { %v654_v19 = vmax.f32 %v526_v54, 0.0  ;;  %v658_v33 = vmax.f32 %v530_v62, 0.0  ;;  %v273_v45 = vmul.f32 %v5541_v51, %v104_v43  ;;  %v528_v44 = vadd.f32 %v5658_v46, %v272_v63 }
  0xbc   :  { %v793_v9 = vpack.c.bf16 %v649_v61, %v645_v57  ;;  %v795_v35 = vpack.c.bf16 %v651_v12, %v647_v58  ;;  %v532_v21 = vadd.f32 %v403_v11, %v276_v7  ;;  %v525_v55 = vadd.f32 %v5658_v46, %v269_v36 }
  0xbd   :  { %v798_v39 = vpack.c.bf16 %v658_v33, %v654_v19  ;;  %v529_v48 = vadd.f32 %v403_v11, %v273_v45  ;;  %v271_v47 = vmul.f32 %v5543_v52, %v5632_v37  ;;  %v656_v8 = vmax.f32 %v528_v44, 0.0  ;;  %v4979_v45 = vld [vmem:[%s6813_s2 + $0x4] ss:$8 sps:$4 sm:$0xff]  }
  0xbe   :  { %1140 = vmatpush1.bf16.msra.mxu0 %v793_v9  ;;  %1333 = vmatpush1.bf16.msra.mxu1 %v795_v35  ;;  %v660_v42 = vmax.f32 %v532_v21, 0.0  ;;  %v275_v22 = vmul.f32 %v5543_v52, %v104_v43  ;;  %v278_v26 = vmul.f32 %v5537_v49, %v109_v0  ;;  %v653_v28 = vmax.f32 %v525_v55, 0.0 }
  0xbf   :  { %1141 = vmatprep.subr.bf16.mxu0 %v798_v39  ;;  %v657_v40 = vmax.f32 %v529_v48, 0.0  ;;  %v527_v27 = vadd.f32 %v5658_v46, %v271_v47  ;;  %v282_v29 = vmul.f32 %v5537_v49, %v114_v31  ;;  %v280_v37 = vmul.f32 %v5539_v50, %v109_v0  ;;  %v411_v12 = vpop.permute.xlu1 %410  ;;  %1165 = vmatprep.mubr.bf16.mxu0 %v4979_v45 }
  0xc0   :  { %v800_v32 = vpack.c.bf16 %v660_v42, %v656_v8  ;;  %v531_v59 = vadd.f32 %v403_v11, %v275_v22  ;;  %v534_v60 = vadd.f32 %v5514_v34, %v278_v26  ;;  %v284_v56 = vmul.f32 %v5539_v50, %v114_v31  ;;  %1358 = vmatprep.mubr.bf16.mxu1 %v4979_v45  ;;  %v124_v22 = vpop.permute.xlu0 %123 }
  0xc1   :  { %v797_v23 = vpack.c.bf16 %v657_v40, %v653_v28  ;;  %v655_v61 = vmax.f32 %v527_v27, 0.0  ;;  %v277_v43 = vmul.f32 %v5541_v51, %v109_v0  ;;  %v536_v46 = vadd.f32 %v5514_v34, %v280_v37 }
  0xc2   :  { %1334 = vmatprep.subr.bf16.mxu1 %v800_v32  ;;  %v659_v30 = vmax.f32 %v531_v59, 0.0  ;;  %v662_v54 = vmax.f32 %v534_v60, 0.0  ;;  %v281_v62 = vmul.f32 %v5541_v51, %v114_v31  ;;  %v538_v11 = vadd.f32 %v411_v12, %v282_v29 }
  0xc3   :  { %1142 = vmatpush1.bf16.msra.mxu0 %v797_v23  ;;  %v540_v57 = vadd.f32 %v411_v12, %v284_v56  ;;  %v533_v58 = vadd.f32 %v5514_v34, %v277_v43  ;;  %v279_v63 = vmul.f32 %v5543_v52, %v109_v0  ;;  %v664_v19 = vmax.f32 %v536_v46, 0.0 }
  0xc4   :  { %v799_v7 = vpack.c.bf16 %v659_v30, %v655_v61  ;;  %v537_v33 = vadd.f32 %v411_v12, %v281_v62  ;;  %v283_v36 = vmul.f32 %v5543_v52, %v114_v31  ;;  %v666_v9 = vmax.f32 %v538_v11, 0.0  ;;  %v119_v48 = vpop.permute.xlu1 %118  ;;  %v129_v30 = vpop.permute.xlu0 %128 }
  0xc5   :  { %v668_v35 = vmax.f32 %v540_v57, 0.0  ;;  %v661_v44 = vmax.f32 %v533_v58, 0.0  ;;  %v535_v21 = vadd.f32 %v5514_v34, %v279_v63  ;;  %v286_v34 = vmul.f32 %v5537_v49, %v119_v48 }
  0xc6   :  { %1335 = vmatpush1.bf16.msra.mxu1 %v799_v7  ;;  %v665_v39 = vmax.f32 %v537_v33, 0.0  ;;  %v539_v55 = vadd.f32 %v411_v12, %v283_v36  ;;  %v802_v0 = vpack.c.bf16 %v666_v9, %v662_v54  ;;  %v288_v40 = vmul.f32 %v5539_v50, %v119_v48 }
  0xc7   :  { %v804_v47 = vpack.c.bf16 %v668_v35, %v664_v19  ;;  %v663_v8 = vmax.f32 %v535_v21, 0.0  ;;  %v285_v27 = vmul.f32 %v5541_v51, %v119_v48  ;;  %v287_v29 = vmul.f32 %v5543_v52, %v119_v48 }
  0xc8   :  { %v801_v42 = vpack.c.bf16 %v665_v39, %v661_v44  ;;  %v667_v31 = vmax.f32 %v539_v55, 0.0  ;;  %1143 = vmatprep.subr.bf16.mxu0 %v802_v0  ;;  %v290_v32 = vmul.f32 %v5537_v49, %v124_v22  ;;  %v292_v59 = vmul.f32 %v5539_v50, %v124_v22 }
  0xc9   :  { %1336 = vmatprep.subr.bf16.mxu1 %v804_v47  ;;  %v415_v28 = vpop.permute.xlu1 %414  ;;  %v289_v60 = vmul.f32 %v5541_v51, %v124_v22  ;;  %v291_v37 = vmul.f32 %v5543_v52, %v124_v22  ;;  %v294_v54 = vmul.f32 %v5537_v49, %v129_v30  ;;  %v296_v35 = vmul.f32 %v5539_v50, %v129_v30 }
  0xca   :  { %1144 = vmatpush1.bf16.msra.mxu0 %v801_v42  ;;  %v803_v26 = vpack.c.bf16 %v667_v31, %v663_v8  ;;  %v542_v23 = vadd.f32 %v415_v28, %v286_v34  ;;  %v544_v61 = vadd.f32 %v415_v28, %v288_v40  ;;  %v541_v56 = vadd.f32 %v415_v28, %v285_v27 }
  0xcb   :  { %v543_v43 = vadd.f32 %v415_v28, %v287_v29  ;;  %v293_v44 = vmul.f32 %v5541_v51, %v129_v30  ;;  %v295_v21 = vmul.f32 %v5543_v52, %v129_v30  ;;  %v550_v8 = vadd.f32 %v5520_v38, %v294_v54 }
  0xcc   :  { %1337 = vmatpush1.bf16.msra.mxu1 %v803_v26  ;;  %v670_v58 = vmax.f32 %v542_v23, 0.0  ;;  %v672_v63 = vmax.f32 %v544_v61, 0.0  ;;  %v669_v7 = vmax.f32 %v541_v56, 0.0  ;;  %v552_v42 = vadd.f32 %v5520_v38, %v296_v35 }
  0xcd   :  { %v419_v12 = vpop.permute.xlu1 %418  ;;  %v671_v19 = vmax.f32 %v543_v43, 0.0  ;;  %v549_v31 = vadd.f32 %v5520_v38, %v293_v44  ;;  %v551_v22 = vadd.f32 %v5520_v38, %v295_v21  ;;  %v5280_v27 = vmov 2  }
  0xce   :  { %v546_v46 = vadd.f32 %v419_v12, %v290_v32  ;;  %v548_v62 = vadd.f32 %v419_v12, %v292_v59  ;;  %v545_v11 = vadd.f32 %v419_v12, %v289_v60  ;;  %v547_v57 = vadd.f32 %v419_v12, %v291_v37  ;;  %4962 = vset.pattern.permute.xlu1 %v5280_v27 }
  0xcf   :  { %846 = vperm.xlu1 %4962, %v5332_v2   ;;  %4963 = vset.pattern.permute.xlu0 %v5280_v27  ;;  %v678_v23 = vmax.f32 %v550_v8, 0.0  ;;  %v680_v38 = vmax.f32 %v552_v42, 0.0  ;;  %v677_v61 = vmax.f32 %v549_v31, 0.0  ;;  %v679_v56 = vmax.f32 %v551_v22, 0.0 }
  0xd0   :  { %v674_v33 = vmax.f32 %v546_v46, 0.0  ;;  %v676_v36 = vmax.f32 %v548_v62, 0.0  ;;  %v673_v45 = vmax.f32 %v545_v11, 0.0  ;;  %v675_v9 = vmax.f32 %v547_v57, 0.0  ;;  %850 = vperm.xlu0 %4963, %v5344_v4  }
  0xd2   :  { %v134_v39 = vpop.permute.xlu1 %133  ;;  %v806_v55 = vpack.c.bf16 %v674_v33, %v670_v58  ;;  %v808_v48 = vpack.c.bf16 %v676_v36, %v672_v63  ;;  %v805_v0 = vpack.c.bf16 %v673_v45, %v669_v7  ;;  %v807_v47 = vpack.c.bf16 %v675_v9, %v671_v19  ;;  %v144_v58 = vpop.permute.xlu0 %143 }
  0xd3   :  { %v298_v26 = vmul.f32 %v5537_v49, %v134_v39  ;;  %v300_v28 = vmul.f32 %v5539_v50, %v134_v39  ;;  %v297_v34 = vmul.f32 %v5541_v51, %v134_v39  ;;  %v299_v40 = vmul.f32 %v5543_v52, %v134_v39  ;;  %854 = vperm.xlu1 %4962, %v5327_v1  }
  0xd4   :  { %1145 = vmatprep.subr.bf16.mxu0 %v806_v55  ;;  %1338 = vmatprep.subr.bf16.mxu1 %v808_v48  ;;  %v308_v33 = vmul.f32 %v5539_v50, %v144_v58  ;;  %v305_v36 = vmul.f32 %v5541_v51, %v144_v58  ;;  %v307_v45 = vmul.f32 %v5543_v52, %v144_v58 }
  0xd5   :  { %1146 = vmatpush1.bf16.msra.mxu0 %v805_v0  ;;  %1339 = vmatpush1.bf16.msra.mxu1 %v807_v47 }
  0xd6   :  { %862 = vperm.xlu0 %4963, %v5372_v10   ;;  %v306_v10 = vmul.f32 %v5537_v49, %v144_v58  ;;  %v149_v21 = vpop.permute.xlu0 %148 }
  0xd7   :  { %v427_v29 = vpop.permute.xlu1 %426  ;;  %858 = vperm.xlu1 %4962, %v5356_v6   ;;  %v310_v55 = vmul.f32 %v5537_v49, %v149_v21 }
  0xd8   :  { %v554_v32 = vadd.f32 %v427_v29, %v298_v26  ;;  %v556_v59 = vadd.f32 %v427_v29, %v300_v28  ;;  %v553_v60 = vadd.f32 %v427_v29, %v297_v34  ;;  %v555_v37 = vadd.f32 %v427_v29, %v299_v40 }
  0xd9   :  { %v311_v29 = vmul.f32 %v5543_v52, %v149_v21 }
  0xda   :  { %v682_v43 = vmax.f32 %v554_v32, 0.0  ;;  %v684_v30 = vmax.f32 %v556_v59, 0.0  ;;  %v681_v12 = vmax.f32 %v553_v60, 0.0  ;;  %v683_v54 = vmax.f32 %v555_v37, 0.0  ;;  %870 = vperm.xlu0 %4963, %v5339_v3  }
  0xdb   :  { %866 = vperm.xlu1 %4962, %v5387_v13   ;;  %v312_v3 = vmul.f32 %v5539_v50, %v149_v21  ;;  %v309_v13 = vmul.f32 %v5541_v51, %v149_v21 }
  0xdc   :  { %v139_v46 = vpop.permute.xlu1 %138  ;;  %v810_v62 = vpack.c.bf16 %v682_v43, %v678_v23  ;;  %v812_v2 = vpack.c.bf16 %v684_v30, %v680_v38  ;;  %v809_v11 = vpack.c.bf16 %v681_v12, %v677_v61  ;;  %v811_v57 = vpack.c.bf16 %v683_v54, %v679_v56 }
  0xdd   :  { %v302_v63 = vmul.f32 %v5537_v49, %v139_v46  ;;  %v304_v7 = vmul.f32 %v5539_v50, %v139_v46  ;;  %v301_v1 = vmul.f32 %v5541_v51, %v139_v46  ;;  %v303_v19 = vmul.f32 %v5543_v52, %v139_v46 }
  0xde   :  { %1147 = vmatprep.subr.bf16.mxu0 %v810_v62  ;;  %1340 = vmatprep.subr.bf16.mxu1 %v812_v2  ;;  %v566_v23 = vadd.f32 %v5526_v41, %v310_v55  ;;  %v568_v38 = vadd.f32 %v5526_v41, %v312_v3  ;;  %v565_v61 = vadd.f32 %v5526_v41, %v309_v13 }
  0xdf   :  { %1148 = vmatpush1.bf16.msra.mxu0 %v809_v11  ;;  %1341 = vmatpush1.bf16.msra.mxu1 %v811_v57  ;;  %v567_v56 = vadd.f32 %v5526_v41, %v311_v29 }
  0xe0   :  { %878 = vperm.xlu0 %4963, %v5406_v15   ;;  %874 = vperm.xlu1 %4962, %v5395_v14   ;;  %v694_v11 = vmax.f32 %v566_v23, 0.0  ;;  %v696_v57 = vmax.f32 %v568_v38, 0.0  ;;  %v693_v58 = vmax.f32 %v565_v61, 0.0  ;;  %v5171_v38 = vld [vmem:[%s6811_s1 + $0x88] sm:$0xff] }
  0xe1   :  { %v431_v4 = vpop.permute.xlu1 %430 }
  0xe2   :  { %v558_v6 = vadd.f32 %v431_v4, %v302_v63  ;;  %v560_v9 = vadd.f32 %v431_v4, %v304_v7  ;;  %v557_v35 = vadd.f32 %v431_v4, %v301_v1  ;;  %v559_v44 = vadd.f32 %v431_v4, %v303_v19 }
  0xe3   :  { %v695_v4 = vmax.f32 %v567_v56, 0.0 }
  0xe4   :  { %v686_v42 = vmax.f32 %v558_v6, 0.0  ;;  %v688_v31 = vmax.f32 %v560_v9, 0.0  ;;  %v685_v22 = vmax.f32 %v557_v35, 0.0  ;;  %v687_v26 = vmax.f32 %v559_v44, 0.0  ;;  %886 = vperm.xlu0 %4963, %v5351_v5   ;;  %882 = vperm.xlu1 %4962, %v5415_v16   ;;  %v5169_v16 = vld [vmem:[%s6811_s1 + $0x70] sm:$0xff] }
  0xe5   :  { %v435_v39 = vpop.permute.xlu1 %434 }
  0xe6   :  { %v562_v48 = vadd.f32 %v435_v39, %v306_v10  ;;  %v564_v0 = vadd.f32 %v435_v39, %v308_v33  ;;  %v561_v47 = vadd.f32 %v435_v39, %v305_v36  ;;  %v563_v8 = vadd.f32 %v435_v39, %v307_v45  ;;  %v164_v45 = vpop.permute.xlu0 %163 }
  0xe7   :  { %v322_v21 = vmul.f32 %v5537_v49, %v164_v45 }
  0xe8   :  { %v690_v28 = vmax.f32 %v562_v48, 0.0  ;;  %v692_v34 = vmax.f32 %v564_v0, 0.0  ;;  %v689_v40 = vmax.f32 %v561_v47, 0.0  ;;  %v691_v27 = vmax.f32 %v563_v8, 0.0  ;;  %894 = vperm.xlu0 %4963, %v5443_v20   ;;  %890 = vperm.xlu1 %4962, %v5430_v18   ;;  %v6842_v8 = vld [vmem:[#allocation2_spill] sm:$0xff] }
  0xe9   :  { %v323_v47 = vmul.f32 %v5543_v52, %v164_v45 }
  0xea   :  { %v154_v15 = vpop.permute.xlu1 %153  ;;  %v814_v32 = vpack.c.bf16 %v690_v28, %v686_v42  ;;  %v816_v59 = vpack.c.bf16 %v692_v34, %v688_v31  ;;  %v813_v60 = vpack.c.bf16 %v689_v40, %v685_v22  ;;  %v815_v37 = vpack.c.bf16 %v691_v27, %v687_v26  ;;  %v169_v0 = vpop.permute.xlu0 %168  ;;  %v5170_v42 = vld [vmem:[%s6811_s1 + $0x90] sm:$0xff] }
  0xeb   :  { %v314_v14 = vmul.f32 %v5537_v49, %v154_v15  ;;  %v316_v5 = vmul.f32 %v5539_v50, %v154_v15  ;;  %v313_v43 = vmul.f32 %v5541_v51, %v154_v15  ;;  %v315_v30 = vmul.f32 %v5543_v52, %v154_v15 }
  0xec   :  { %1149 = vmatprep.subr.bf16.mxu0 %v814_v32  ;;  %1342 = vmatprep.subr.bf16.mxu1 %v816_v59  ;;  %v326_v22 = vmul.f32 %v5537_v49, %v169_v0  ;;  %v328_v26 = vmul.f32 %v5539_v50, %v169_v0  ;;  %v325_v61 = vmul.f32 %v5541_v51, %v169_v0 }
  0xed   :  { %1150 = vmatpush1.bf16.msra.mxu0 %v813_v60  ;;  %1343 = vmatpush1.bf16.msra.mxu1 %v815_v37  ;;  %v327_v56 = vmul.f32 %v5543_v52, %v169_v0 }
  0xee   :  { %902 = vperm.xlu0 %4963, %v5169_v16   ;;  %898 = vperm.xlu1 %4962, %v5425_v17   ;;  %v324_v17 = vmul.f32 %v5539_v50, %v164_v45 }
  0xef   :  { %v443_v12 = vpop.permute.xlu1 %442 }
  0xf0   :  { %v570_v54 = vadd.f32 %v443_v12, %v314_v14  ;;  %v572_v46 = vadd.f32 %v443_v12, %v316_v5  ;;  %v569_v62 = vadd.f32 %v443_v12, %v313_v43  ;;  %v571_v2 = vadd.f32 %v443_v12, %v315_v30  ;;  %v6843_v14 = vld [vmem:[#allocation3_spill] sm:$0xff] }
  0xf2   :  { %v698_v41 = vmax.f32 %v570_v54, 0.0  ;;  %v700_v63 = vmax.f32 %v572_v46, 0.0  ;;  %v697_v7 = vmax.f32 %v569_v62, 0.0  ;;  %v699_v1 = vmax.f32 %v571_v2, 0.0  ;;  %910 = vperm.xlu0 %4963, %v5476_v25   ;;  %906 = vperm.xlu1 %4962, %v6842_v8   ;;  %v6844_v46 = vld [vmem:[#allocation5_spill] sm:$0xff] }
  0xf3   :  { %v321_v25 = vmul.f32 %v5541_v51, %v164_v45  ;;  %v582_v62 = vadd.f32 %v6844_v46, %v326_v22  ;;  %v584_v2 = vadd.f32 %v6844_v46, %v328_v26  ;;  %v5176_v8 = vld [vmem:[%s6811_s1 + $0xb8] sm:$0xff] }
  0xf4   :  { %v159_v20 = vpop.permute.xlu1 %158  ;;  %v818_v19 = vpack.c.bf16 %v698_v41, %v694_v11  ;;  %v820_v10 = vpack.c.bf16 %v700_v63, %v696_v57  ;;  %v817_v33 = vpack.c.bf16 %v697_v7, %v693_v58  ;;  %v819_v36 = vpack.c.bf16 %v699_v1, %v695_v4  ;;  %v5172_v7 = vld [vmem:[%s6811_s1 + $0x98] sm:$0xff]  ;;  %v5173_v1 = vld [vmem:[%s6811_s1 + $0xb0] sm:$0xff] }
  0xf5   :  { %v318_v6 = vmul.f32 %v5537_v49, %v159_v20  ;;  %v320_v9 = vmul.f32 %v5539_v50, %v159_v20  ;;  %v317_v35 = vmul.f32 %v5541_v51, %v159_v20  ;;  %v319_v44 = vmul.f32 %v5543_v52, %v159_v20 }
  0xf6   :  { %1151 = vmatprep.subr.bf16.mxu0 %v818_v19  ;;  %1344 = vmatprep.subr.bf16.mxu1 %v820_v10  ;;  %v581_v57 = vadd.f32 %v6844_v46, %v325_v61  ;;  %v583_v58 = vadd.f32 %v6844_v46, %v327_v56  ;;  %v712_v45 = vmax.f32 %v584_v2, 0.0 }
  0xf7   :  { %1152 = vmatpush1.bf16.msra.mxu0 %v817_v33  ;;  %1345 = vmatpush1.bf16.msra.mxu1 %v819_v36  ;;  %v710_v36 = vmax.f32 %v582_v62, 0.0 }
  0xf8   :  { %918 = vperm.xlu0 %4963, %v5170_v42   ;;  %914 = vperm.xlu1 %4962, %v5171_v38   ;;  %v5177_v42 = vld [vmem:[%s6811_s1 + $0xd0] sm:$0xff] }
  0xf9   :  { %v447_v18 = vpop.permute.xlu1 %446 }
  0xfa   :  { %v574_v39 = vadd.f32 %v447_v18, %v318_v6  ;;  %v576_v55 = vadd.f32 %v447_v18, %v320_v9  ;;  %v573_v3 = vadd.f32 %v447_v18, %v317_v35  ;;  %v575_v48 = vadd.f32 %v447_v18, %v319_v44 }
  0xfb   :  { %v709_v18 = vmax.f32 %v581_v57, 0.0  ;;  %v711_v6 = vmax.f32 %v583_v58, 0.0  ;;  %v5179_v58 = vld [vmem:[%s6811_s1 + $0xd8] sm:$0xff] }
  0xfc   :  { %v702_v13 = vmax.f32 %v574_v39, 0.0  ;;  %v704_v29 = vmax.f32 %v576_v55, 0.0  ;;  %v701_v15 = vmax.f32 %v573_v3, 0.0  ;;  %v703_v32 = vmax.f32 %v575_v48, 0.0  ;;  %926 = vperm.xlu0 %4963, %v6843_v14   ;;  %922 = vperm.xlu1 %4962, %v5172_v7   ;;  %v5174_v39 = vld [vmem:[%s6811_s1 + $0xa8] sm:$0xff]  ;;  %v5175_v55 = vld [vmem:[%s6811_s1 + $0xc0] sm:$0xff]  ;;  %v184_v3 = vpop.permute.xlu0 %183 }
  0xfd   :  { %v451_v31 = vpop.permute.xlu1 %450 }
  0xfe   :  { %v578_v28 = vadd.f32 %v451_v31, %v322_v21  ;;  %v580_v34 = vadd.f32 %v451_v31, %v324_v17  ;;  %v577_v40 = vadd.f32 %v451_v31, %v321_v25  ;;  %v579_v27 = vadd.f32 %v451_v31, %v323_v47 }
 0x100   :  { %v706_v59 = vmax.f32 %v578_v28, 0.0  ;;  %v708_v60 = vmax.f32 %v580_v34, 0.0  ;;  %v705_v37 = vmax.f32 %v577_v40, 0.0  ;;  %v707_v23 = vmax.f32 %v579_v27, 0.0  ;;  %934 = vperm.xlu0 %4963, %v5173_v1   ;;  %930 = vperm.xlu1 %4962, %v5174_v39   ;;  %v189_v40 = vpop.permute.xlu0 %188 }
 0x101   :  { %v338_v27 = vmul.f32 %v5537_v49, %v184_v3  ;;  %v342_v14 = vmul.f32 %v5537_v49, %v189_v40 }
 0x102   :  { %v174_v5 = vpop.permute.xlu1 %173  ;;  %v822_v43 = vpack.c.bf16 %v706_v59, %v702_v13  ;;  %v824_v30 = vpack.c.bf16 %v708_v60, %v704_v29  ;;  %v821_v12 = vpack.c.bf16 %v705_v37, %v701_v15  ;;  %v823_v54 = vpack.c.bf16 %v707_v23, %v703_v32  ;;  %v5178_v23 = vld [vmem:[%s6811_s1 + $0xc8] sm:$0xff] }
 0x103   :  { %v330_v11 = vmul.f32 %v5537_v49, %v174_v5  ;;  %v332_v4 = vmul.f32 %v5539_v50, %v174_v5  ;;  %v329_v41 = vmul.f32 %v5541_v51, %v174_v5  ;;  %v331_v63 = vmul.f32 %v5543_v52, %v174_v5 }
 0x104   :  { %1153 = vmatprep.subr.bf16.mxu0 %v822_v43  ;;  %1346 = vmatprep.subr.bf16.mxu1 %v824_v30  ;;  %v340_v59 = vmul.f32 %v5539_v50, %v184_v3  ;;  %v337_v60 = vmul.f32 %v5541_v51, %v184_v3  ;;  %v339_v37 = vmul.f32 %v5543_v52, %v184_v3 }
 0x105   :  { %1154 = vmatpush1.bf16.msra.mxu0 %v821_v12  ;;  %1347 = vmatpush1.bf16.msra.mxu1 %v823_v54 }
 0x106   :  { %942 = vperm.xlu0 %4963, %v5175_v55   ;;  %938 = vperm.xlu1 %4962, %v5176_v8  }
 0x107   :  { %v459_v16 = vpop.permute.xlu1 %458 }
 0x108   :  { %v586_v20 = vadd.f32 %v459_v16, %v330_v11  ;;  %v588_v19 = vadd.f32 %v459_v16, %v332_v4  ;;  %v585_v10 = vadd.f32 %v459_v16, %v329_v41  ;;  %v587_v33 = vadd.f32 %v459_v16, %v331_v63 }
 0x109   :  { %v344_v4 = vmul.f32 %v5539_v50, %v189_v40  ;;  %v341_v41 = vmul.f32 %v5541_v51, %v189_v40  ;;  %v343_v63 = vmul.f32 %v5543_v52, %v189_v40 }
 0x10a   :  { %v714_v9 = vmax.f32 %v586_v20, 0.0  ;;  %v716_v35 = vmax.f32 %v588_v19, 0.0  ;;  %v713_v44 = vmax.f32 %v585_v10, 0.0  ;;  %v715_v21 = vmax.f32 %v587_v33, 0.0  ;;  %950 = vperm.xlu0 %4963, %v5177_v42   ;;  %946 = vperm.xlu1 %4962, %v5178_v23   ;;  %v6845_v10 = vld [vmem:[#allocation6_spill] sm:$0xff] }
 0x10b   :  { %v598_v33 = vadd.f32 %v6845_v10, %v342_v14 }
 0x10c   :  { %v179_v48 = vpop.permute.xlu1 %178  ;;  %v826_v0 = vpack.c.bf16 %v714_v9, %v710_v36  ;;  %v828_v17 = vpack.c.bf16 %v716_v35, %v712_v45  ;;  %v825_v25 = vpack.c.bf16 %v713_v44, %v709_v18  ;;  %v827_v47 = vpack.c.bf16 %v715_v21, %v711_v6  ;;  %v5181_v21 = vld [vmem:[%s6811_s1 + $0xe8] sm:$0xff] }
 0x10d   :  { %v334_v22 = vmul.f32 %v5537_v49, %v179_v48  ;;  %v336_v26 = vmul.f32 %v5539_v50, %v179_v48  ;;  %v333_v28 = vmul.f32 %v5541_v51, %v179_v48  ;;  %v335_v34 = vmul.f32 %v5543_v52, %v179_v48 }
 0x10e   :  { %1155 = vmatprep.subr.bf16.mxu0 %v826_v0  ;;  %1348 = vmatprep.subr.bf16.mxu1 %v828_v17  ;;  %v600_v36 = vadd.f32 %v6845_v10, %v344_v4  ;;  %v597_v45 = vadd.f32 %v6845_v10, %v341_v41  ;;  %v599_v18 = vadd.f32 %v6845_v10, %v343_v63  ;;  %v726_v17 = vmax.f32 %v598_v33, 0.0 }
 0x10f   :  { %1156 = vmatpush1.bf16.msra.mxu0 %v825_v25  ;;  %1349 = vmatpush1.bf16.msra.mxu1 %v827_v47 }
 0x110   :  { %958 = vperm.xlu0 %4963, %v5594_v53   ;;  %954 = vperm.xlu1 %4962, %v5179_v58   ;;  %v5180_v53 = vld [vmem:[%s6811_s1 + $0xf0] sm:$0xff]  ;;  %v728_v25 = vmax.f32 %v600_v36, 0.0  ;;  %v725_v47 = vmax.f32 %v597_v45, 0.0  ;;  %v727_v8 = vmax.f32 %v599_v18, 0.0 }
 0x111   :  { %v463_v31 = vpop.permute.xlu1 %462 }
 0x112   :  { %v590_v13 = vadd.f32 %v463_v31, %v334_v22  ;;  %v592_v29 = vadd.f32 %v463_v31, %v336_v26  ;;  %v589_v15 = vadd.f32 %v463_v31, %v333_v28  ;;  %v591_v32 = vadd.f32 %v463_v31, %v335_v34 }
 0x114   :  { %v718_v30 = vmax.f32 %v590_v13, 0.0  ;;  %v720_v12 = vmax.f32 %v592_v29, 0.0  ;;  %v717_v54 = vmax.f32 %v589_v15, 0.0  ;;  %v719_v46 = vmax.f32 %v591_v32, 0.0  ;;  %966 = vperm.xlu0 %4963, %v5180_v53   ;;  %962 = vperm.xlu1 %4962, %v5181_v21   ;;  %v204_v29 = vpop.permute.xlu0 %203 }
 0x115   :  { %v467_v38 = vpop.permute.xlu1 %466 }
 0x116   :  { %v594_v61 = vadd.f32 %v467_v38, %v338_v27  ;;  %v596_v56 = vadd.f32 %v467_v38, %v340_v59  ;;  %v593_v5 = vadd.f32 %v467_v38, %v337_v60  ;;  %v595_v43 = vadd.f32 %v467_v38, %v339_v37 }
 0x118   :  { %v722_v62 = vmax.f32 %v594_v61, 0.0  ;;  %v724_v2 = vmax.f32 %v596_v56, 0.0  ;;  %v721_v11 = vmax.f32 %v593_v5, 0.0  ;;  %v723_v57 = vmax.f32 %v595_v43, 0.0  ;;  %970 = vperm.xlu1 %4962, %v5654_v24   ;;  %v209_v24 = vpop.permute.xlu0 %208 }
 0x119   :  { %v354_v56 = vmul.f32 %v5537_v49, %v204_v29  ;;  %v356_v5 = vmul.f32 %v5539_v50, %v204_v29  ;;  %v353_v43 = vmul.f32 %v5541_v51, %v204_v29  ;;  %v359_v10 = vmul.f32 %v5543_v52, %v209_v24 }
 0x11a   :  { %v194_v7 = vpop.permute.xlu1 %193  ;;  %v830_v1 = vpack.c.bf16 %v722_v62, %v718_v30  ;;  %v832_v16 = vpack.c.bf16 %v724_v2, %v720_v12  ;;  %v829_v20 = vpack.c.bf16 %v721_v11, %v717_v54  ;;  %v831_v19 = vpack.c.bf16 %v723_v57, %v719_v46 }
 0x11b   :  { %v346_v6 = vmul.f32 %v5537_v49, %v194_v7  ;;  %v348_v9 = vmul.f32 %v5539_v50, %v194_v7  ;;  %v345_v35 = vmul.f32 %v5541_v51, %v194_v7  ;;  %v347_v44 = vmul.f32 %v5543_v52, %v194_v7 }
 0x11c   :  { %1157 = vmatprep.subr.bf16.mxu0 %v830_v1  ;;  %1350 = vmatprep.subr.bf16.mxu1 %v832_v16  ;;  %v355_v30 = vmul.f32 %v5543_v52, %v204_v29  ;;  %v358_v54 = vmul.f32 %v5537_v49, %v209_v24  ;;  %v487_v16 = vpop.permute.xlu0 %486 }
 0x11d   :  { %1158 = vmatpush1.bf16.msra.mxu0 %v829_v20  ;;  %1351 = vmatpush1.bf16.msra.mxu1 %v831_v19  ;;  %v360_v20 = vmul.f32 %v5539_v50, %v209_v24  ;;  %v357_v19 = vmul.f32 %v5541_v51, %v209_v24  ;;  %v615_v21 = vadd.f32 %v487_v16, %v359_v10  ;;  %v4989_v24 = vld [vmem:[%s6813_s2 + $0x44] ss:$8 sps:$4 sm:$0xff]  }
 0x11f   :  { %v475_v39 = vpop.permute.xlu1 %474 }
 0x120   :  { %v602_v55 = vadd.f32 %v475_v39, %v346_v6  ;;  %v604_v3 = vadd.f32 %v475_v39, %v348_v9  ;;  %v601_v48 = vadd.f32 %v475_v39, %v345_v35  ;;  %v603_v0 = vadd.f32 %v475_v39, %v347_v44 }
 0x121   :  { %v614_v9 = vadd.f32 %v487_v16, %v358_v54  ;;  %v616_v35 = vadd.f32 %v487_v16, %v360_v20  ;;  %v613_v44 = vadd.f32 %v487_v16, %v357_v19  ;;  %v5004_v54 = vld [vmem:[%s6813_s2 + $0x94] ss:$8 sps:$4 sm:$0xff]   ;;  %v5024_v16 = vld [vmem:[%s6813_s2 + $0xf0] ss:$8 sps:$4 sm:$0xff]  }
 0x122   :  { %v730_v42 = vmax.f32 %v602_v55, 0.0  ;;  %v732_v31 = vmax.f32 %v604_v3, 0.0  ;;  %v729_v22 = vmax.f32 %v601_v48, 0.0  ;;  %v731_v26 = vmax.f32 %v603_v0, 0.0 }
 0x124   :  { %v199_v28 = vpop.permute.xlu1 %198  ;;  %v834_v34 = vpack.c.bf16 %v730_v42, %v726_v17  ;;  %v836_v40 = vpack.c.bf16 %v732_v31, %v728_v25  ;;  %v833_v27 = vpack.c.bf16 %v729_v22, %v725_v47  ;;  %v835_v13 = vpack.c.bf16 %v731_v26, %v727_v8 }
 0x125   :  { %v350_v32 = vmul.f32 %v5537_v49, %v199_v28  ;;  %v352_v59 = vmul.f32 %v5539_v50, %v199_v28  ;;  %v349_v60 = vmul.f32 %v5541_v51, %v199_v28  ;;  %v351_v37 = vmul.f32 %v5543_v52, %v199_v28 }
 0x126   :  { %1159 = vmatprep.subr.bf16.mxu0 %v834_v34  ;;  %1352 = vmatprep.subr.bf16.mxu1 %v836_v40  ;;  %v742_v42 = vmax.f32 %v614_v9, 0.0  ;;  %v744_v31 = vmax.f32 %v616_v35, 0.0  ;;  %v741_v22 = vmax.f32 %v613_v44, 0.0  ;;  %v743_v26 = vmax.f32 %v615_v21, 0.0 }
 0x127   :  { %1160 = vmatpush1.bf16.msra.mxu0 %v833_v27  ;;  %1353 = vmatpush1.bf16.msra.mxu1 %v835_v13 }
 0x12a   :  { %v479_v15 = vpop.permute.xlu1 %478 }
 0x12b   :  { %v606_v23 = vadd.f32 %v479_v15, %v350_v32  ;;  %v608_v38 = vadd.f32 %v479_v15, %v352_v59  ;;  %v605_v14 = vadd.f32 %v479_v15, %v349_v60  ;;  %v607_v61 = vadd.f32 %v479_v15, %v351_v37  ;;  %v4982_v15 = vld [vmem:[%s6813_s2 + $0x10] ss:$8 sps:$4 sm:$0xff]   ;;  %v4983_v32 = vld [vmem:[%s6813_s2 + $0x24] ss:$8 sps:$4 sm:$0xff]   ;;  %v4985_v59 = vld [vmem:[%s6813_s2 + $0x20] ss:$8 sps:$4 sm:$0xff]  }
 0x12c   :  { %v4986_v60 = vld [vmem:[%s6813_s2 + $0x34] ss:$8 sps:$4 sm:$0xff]   ;;  %v4988_v37 = vld [vmem:[%s6813_s2 + $0x30] ss:$8 sps:$4 sm:$0xff]  }
 0x12d   :  { %v734_v57 = vmax.f32 %v606_v23, 0.0  ;;  %v736_v58 = vmax.f32 %v608_v38, 0.0  ;;  %v733_v53 = vmax.f32 %v605_v14, 0.0  ;;  %v735_v4 = vmax.f32 %v607_v61, 0.0  ;;  %v4991_v23 = vld [vmem:[%s6813_s2 + $0x40] ss:$8 sps:$4 sm:$0xff]  }
 0x12e   :  { %v483_v12 = vpop.permute.xlu1 %482  ;;  %v4992_v38 = vld [vmem:[%s6813_s2 + $0x54] ss:$8 sps:$4 sm:$0xff]   ;;  %v4994_v14 = vld [vmem:[%s6813_s2 + $0x50] ss:$8 sps:$4 sm:$0xff]   ;;  %v4995_v61 = vld [vmem:[%s6813_s2 + $0x64] ss:$8 sps:$4 sm:$0xff]  }
 0x12f   :  { %v610_v46 = vadd.f32 %v483_v12, %v354_v56  ;;  %v612_v62 = vadd.f32 %v483_v12, %v356_v5  ;;  %v609_v2 = vadd.f32 %v483_v12, %v353_v43  ;;  %v611_v11 = vadd.f32 %v483_v12, %v355_v30  ;;  %v4997_v56 = vld [vmem:[%s6813_s2 + $0x60] ss:$8 sps:$4 sm:$0xff]   ;;  %v4998_v5 = vld [vmem:[%s6813_s2 + $0x74] ss:$8 sps:$4 sm:$0xff]   ;;  %v5000_v43 = vld [vmem:[%s6813_s2 + $0x70] ss:$8 sps:$4 sm:$0xff]  }
 0x130   :  { %v5001_v30 = vld [vmem:[%s6813_s2 + $0x84] ss:$8 sps:$4 sm:$0xff]   ;;  %v5003_v12 = vld [vmem:[%s6813_s2 + $0x80] ss:$8 sps:$4 sm:$0xff]  }
 0x131   :  { %v738_v41 = vmax.f32 %v610_v46, 0.0  ;;  %v740_v63 = vmax.f32 %v612_v62, 0.0  ;;  %v737_v7 = vmax.f32 %v609_v2, 0.0  ;;  %v739_v1 = vmax.f32 %v611_v11, 0.0  ;;  %v5006_v46 = vld [vmem:[%s6813_s2 + $0x90] ss:$8 sps:$4 sm:$0xff]  }
 0x132   :  { %v5007_v62 = vld [vmem:[%s6813_s2 + $0xa4] ss:$8 sps:$4 sm:$0xff]   ;;  %v5009_v2 = vld [vmem:[%s6813_s2 + $0xa0] ss:$8 sps:$4 sm:$0xff]   ;;  %v5010_v11 = vld [vmem:[%s6813_s2 + $0xb4] ss:$8 sps:$4 sm:$0xff]  }
 0x133   :  { %v838_v36 = vpack.c.bf16 %v738_v41, %v734_v57  ;;  %v840_v45 = vpack.c.bf16 %v740_v63, %v736_v58  ;;  %v837_v18 = vpack.c.bf16 %v737_v7, %v733_v53  ;;  %v839_v6 = vpack.c.bf16 %v739_v1, %v735_v4  ;;  %v5012_v57 = vld [vmem:[%s6813_s2 + $0xb0] ss:$8 sps:$4 sm:$0xff]   ;;  %v5013_v58 = vld [vmem:[%s6813_s2 + $0xc4] ss:$8 sps:$4 sm:$0xff]   ;;  %v5015_v53 = vld [vmem:[%s6813_s2 + $0xc0] ss:$8 sps:$4 sm:$0xff]  }
 0x134   :  { %v214_v33 = vpop.permute.xlu1 %213  ;;  %v5016_v4 = vld [vmem:[%s6813_s2 + $0xd4] ss:$8 sps:$4 sm:$0xff]   ;;  %v5018_v41 = vld [vmem:[%s6813_s2 + $0xd0] ss:$8 sps:$4 sm:$0xff]   ;;  %v5019_v63 = vld [vmem:[%s6813_s2 + $0xe4] ss:$8 sps:$4 sm:$0xff]  }
 0x135   :  { %1161 = vmatprep.subr.bf16.mxu0 %v838_v36  ;;  %1354 = vmatprep.subr.bf16.mxu1 %v840_v45  ;;  %v362_v39 = vmul.f32 %v5537_v49, %v214_v33  ;;  %v364_v55 = vmul.f32 %v5539_v50, %v214_v33  ;;  %v361_v3 = vmul.f32 %v5541_v51, %v214_v33  ;;  %v4977_v51 = vld [vmem:[%s6813_s2] ss:$8 sps:$4 sm:$0xff]   ;;  %v5022_v1 = vld [vmem:[%s6813_s2 + $0xf4] ss:$8 sps:$4 sm:$0xff]  }
 0x136   :  { %1162 = vmatpush1.bf16.msra.mxu0 %v837_v18  ;;  %1355 = vmatpush1.bf16.msra.mxu1 %v839_v6  ;;  %v363_v48 = vmul.f32 %v5543_v52, %v214_v33  ;;  %v4980_v52 = vld [vmem:[%s6813_s2 + $0x14] ss:$8 sps:$4 sm:$0xff]   ;;  %v5021_v7 = vld [vmem:[%s6813_s2 + $0xe0] ss:$8 sps:$4 sm:$0xff]  }
 0x139   :  { %v491_v0 = vpop.permute.xlu1 %490 }
 0x13a   :  { %v618_v17 = vadd.f32 %v491_v0, %v362_v39  ;;  %v620_v25 = vadd.f32 %v491_v0, %v364_v55  ;;  %v617_v47 = vadd.f32 %v491_v0, %v361_v3  ;;  %v619_v8 = vadd.f32 %v491_v0, %v363_v48 }
 0x13c   :  { %v746_v28 = vmax.f32 %v618_v17, 0.0  ;;  %v748_v34 = vmax.f32 %v620_v25, 0.0  ;;  %v745_v40 = vmax.f32 %v617_v47, 0.0  ;;  %v747_v27 = vmax.f32 %v619_v8, 0.0 }
 0x13e   :  { %v842_v49 = vpack.c.bf16 %v746_v28, %v742_v42  ;;  %v844_v13 = vpack.c.bf16 %v748_v34, %v744_v31  ;;  %v841_v50 = vpack.c.bf16 %v745_v40, %v741_v22  ;;  %v843_v29 = vpack.c.bf16 %v747_v27, %v743_v26  ;;  %v5027_v22 = vld [vmem:[%s6814_s3 + $0x4] ss:$8 sps:$4 sm:$0xff]  }
 0x140   :  { %1163 = vmatprep.subr.bf16.mxu0 %v842_v49  ;;  %1356 = vmatprep.subr.bf16.mxu1 %v844_v13 }
 0x141   :  { %1164 = vmatpush1.bf16.msra.mxu0 %v841_v50  ;;  %1357 = vmatpush1.bf16.msra.mxu1 %v843_v29 }
 0x144   :  { %1166 = vmatmul.mubr.bf16.vlgmr.msra.gmra.mrb[0].mxu0 %v4977_v51  ;;  %1359 = vmatmul.mubr.bf16.vlgmr.msra.gmra.mrb[0].mxu1 %v4977_v51 }
 0x145   :  { %1175 = vmatprep.mubr.bf16.mxu0 %v4980_v52  ;;  %1368 = vmatprep.mubr.bf16.mxu1 %v4980_v52 }
 0x14c   :  { %1176 = vmatmul.mubr.bf16.gmra.mrb[4].mxu0 %v4982_v15  ;;  %1369 = vmatmul.mubr.bf16.gmra.mrb[4].mxu1 %v4982_v15 }
 0x14d   :  { %1185 = vmatprep.mubr.bf16.mxu0 %v4983_v32  ;;  %1378 = vmatprep.mubr.bf16.mxu1 %v4983_v32 }
 0x14e   :  { %v847_v20 = vpop.permute.xlu1 %846 }
 0x14f   :  { %v851_v10 = vpop.permute.xlu0 %850 }
 0x152   :  { %v855_v19 = vpop.permute.xlu1 %854 }
 0x154   :  { %1186 = vmatmul.mubr.bf16.gmra.mrb[8].mxu0 %v4985_v59  ;;  %1379 = vmatmul.mubr.bf16.gmra.mrb[8].mxu1 %v4985_v59 }
 0x155   :  { %1195 = vmatprep.mubr.bf16.mxu0 %v4986_v60  ;;  %1388 = vmatprep.mubr.bf16.mxu1 %v4986_v60 }
 0x156   :  { %v859_v27 = vpop.permute.xlu1 %858 }
 0x15c   :  { %1196 = vmatmul.mubr.bf16.gmra.mrb[12].mxu0 %v4988_v37  ;;  %1389 = vmatmul.mubr.bf16.gmra.mrb[12].mxu1 %v4988_v37 }
 0x15d   :  { %1205 = vmatprep.mubr.bf16.mxu0 %v4989_v24  ;;  %1398 = vmatprep.mubr.bf16.mxu1 %v4989_v24 }
 0x164   :  { %1206 = vmatmul.mubr.bf16.gmra.mrb[16].mxu0 %v4991_v23  ;;  %1399 = vmatmul.mubr.bf16.gmra.mrb[16].mxu1 %v4991_v23 }
 0x165   :  { %1215 = vmatprep.mubr.bf16.mxu0 %v4992_v38  ;;  %1408 = vmatprep.mubr.bf16.mxu1 %v4992_v38 }
 0x16c   :  { %1216 = vmatmul.mubr.bf16.gmra.mrb[20].mxu0 %v4994_v14  ;;  %1409 = vmatmul.mubr.bf16.gmra.mrb[20].mxu1 %v4994_v14 }
 0x16d   :  { %1225 = vmatprep.mubr.bf16.mxu0 %v4995_v61  ;;  %1418 = vmatprep.mubr.bf16.mxu1 %v4995_v61 }
 0x174   :  { %1226 = vmatmul.mubr.bf16.gmra.mrb[24].mxu0 %v4997_v56  ;;  %1419 = vmatmul.mubr.bf16.gmra.mrb[24].mxu1 %v4997_v56 }
 0x175   :  { %1235 = vmatprep.mubr.bf16.mxu0 %v4998_v5  ;;  %1428 = vmatprep.mubr.bf16.mxu1 %v4998_v5 }
 0x17c   :  { %1236 = vmatmul.mubr.bf16.gmra.mrb[28].mxu0 %v5000_v43  ;;  %1429 = vmatmul.mubr.bf16.gmra.mrb[28].mxu1 %v5000_v43 }
 0x17d   :  { %1245 = vmatprep.mubr.bf16.mxu0 %v5001_v30  ;;  %1438 = vmatprep.mubr.bf16.mxu1 %v5001_v30 }
 0x184   :  { %1246 = vmatmul.mubr.bf16.gmra.mrb[32].mxu0 %v5003_v12  ;;  %1439 = vmatmul.mubr.bf16.gmra.mrb[32].mxu1 %v5003_v12 }
 0x185   :  { %1255 = vmatprep.mubr.bf16.mxu0 %v5004_v54  ;;  %1448 = vmatprep.mubr.bf16.mxu1 %v5004_v54 }
 0x18c   :  { %1256 = vmatmul.mubr.bf16.gmra.mrb[36].mxu0 %v5006_v46  ;;  %1449 = vmatmul.mubr.bf16.gmra.mrb[36].mxu1 %v5006_v46 }
 0x18d   :  { %1265 = vmatprep.mubr.bf16.mxu0 %v5007_v62  ;;  %1458 = vmatprep.mubr.bf16.mxu1 %v5007_v62 }
 0x194   :  { %1266 = vmatmul.mubr.bf16.gmra.mrb[40].mxu0 %v5009_v2  ;;  %1459 = vmatmul.mubr.bf16.gmra.mrb[40].mxu1 %v5009_v2 }
 0x195   :  { %1275 = vmatprep.mubr.bf16.mxu0 %v5010_v11  ;;  %1468 = vmatprep.mubr.bf16.mxu1 %v5010_v11 }
 0x19c   :  { %1276 = vmatmul.mubr.bf16.gmra.mrb[44].mxu0 %v5012_v57  ;;  %1469 = vmatmul.mubr.bf16.gmra.mrb[44].mxu1 %v5012_v57 }
 0x19d   :  { %1285 = vmatprep.mubr.bf16.mxu0 %v5013_v58  ;;  %1478 = vmatprep.mubr.bf16.mxu1 %v5013_v58 }
 0x1a4   :  { %1286 = vmatmul.mubr.bf16.gmra.mrb[48].mxu0 %v5015_v53  ;;  %1479 = vmatmul.mubr.bf16.gmra.mrb[48].mxu1 %v5015_v53  ;;  %v863_v53 = vpop.permute.xlu0 %862 }
 0x1a5   :  { %1295 = vmatprep.mubr.bf16.mxu0 %v5016_v4  ;;  %1488 = vmatprep.mubr.bf16.mxu1 %v5016_v4  ;;  %v867_v4 = vpop.permute.xlu1 %866 }
 0x1ac   :  { %1296 = vmatmul.mubr.bf16.gmra.mrb[52].mxu0 %v5018_v41  ;;  %1489 = vmatmul.mubr.bf16.gmra.mrb[52].mxu1 %v5018_v41 }
 0x1ad   :  { %1305 = vmatprep.mubr.bf16.mxu0 %v5019_v63  ;;  %1498 = vmatprep.mubr.bf16.mxu1 %v5019_v63 }
 0x1b4   :  { %1306 = vmatmul.mubr.bf16.gmra.mrb[56].mxu0 %v5021_v7  ;;  %1499 = vmatmul.mubr.bf16.gmra.mrb[56].mxu1 %v5021_v7 }
 0x1b5   :  { %1315 = vmatprep.mubr.bf16.mxu0 %v5022_v1  ;;  %1508 = vmatprep.mubr.bf16.mxu1 %v5022_v1 }
 0x1bc   :  { %1316 = vmatmul.mubr.bf16.gmra.mrb[60].mxu0 %v5024_v16  ;;  %1509 = vmatmul.mubr.bf16.gmra.mrb[60].mxu1 %v5024_v16 }
 0x1bd   :  { %2063 = vmatprep.mubr.bf16.mxu0 %v5027_v22  ;;  %2256 = vmatprep.mubr.bf16.mxu1 %v5027_v22  ;;  %v871_v22 = vpop.permute.xlu0 %870 }
 0x217   :  { %v1167_v33 = vpop.f32.mrb[0].mxu0  ;;  %v1360_v36 = vpop.f32.mrb[0].mxu1 }
 0x218   :  { %v1168_v45 = vadd.f32 %v1167_v33, %v847_v20  ;;  %v1361_v18 = vadd.f32 %v1360_v36, %v847_v20  ;;  %v1169_v6 = vpop.f32.mrb[1].mxu0  ;;  %v1362_v9 = vpop.f32.mrb[1].mxu1 }
 0x219   :  { %v1170_v35 = vadd.f32 %v1169_v6, %v847_v20  ;;  %v1363_v44 = vadd.f32 %v1362_v9, %v847_v20  ;;  %v1171_v21 = vpop.f32.mrb[2].mxu0  ;;  %v1364_v39 = vpop.f32.mrb[2].mxu1 }
 0x21a   :  { %v1172_v55 = vadd.f32 %v1171_v21, %v851_v10  ;;  %v1365_v3 = vadd.f32 %v1364_v39, %v851_v10  ;;  %v1173_v48 = vpop.f32.mrb[3].mxu0  ;;  %v1366_v0 = vpop.f32.mrb[3].mxu1  ;;  %v1519_v17 = vmax.f32 %v1168_v45, 0.0  ;;  %v1521_v25 = vmax.f32 %v1361_v18, 0.0 }
 0x21b   :  { %v1174_v47 = vadd.f32 %v1173_v48, %v851_v10  ;;  %v1367_v8 = vadd.f32 %v1366_v0, %v851_v10  ;;  %v1520_v26 = vmax.f32 %v1170_v35, 0.0  ;;  %v1522_v28 = vmax.f32 %v1363_v44, 0.0 }
 0x21c   :  { %v1523_v42 = vmax.f32 %v1172_v55, 0.0  ;;  %v1525_v31 = vmax.f32 %v1365_v3, 0.0 }
 0x21d   :  { %v1524_v34 = vmax.f32 %v1174_v47, 0.0  ;;  %v1526_v40 = vmax.f32 %v1367_v8, 0.0 }
 0x21e   :  { %v1679_v49 = vpack.c.bf16 %v1523_v42, %v1519_v17  ;;  %v1681_v13 = vpack.c.bf16 %v1525_v31, %v1521_v25 }
 0x21f   :  { %v1680_v50 = vpack.c.bf16 %v1524_v34, %v1520_v26  ;;  %v1682_v29 = vpack.c.bf16 %v1526_v40, %v1522_v28  ;;  %v1177_v51 = vpop.f32.mrb[4].mxu0  ;;  %v1370_v52 = vpop.f32.mrb[4].mxu1 }
 0x220   :  { %v1178_v15 = vadd.f32 %v1177_v51, %v855_v19  ;;  %v1371_v32 = vadd.f32 %v1370_v52, %v855_v19  ;;  %v1179_v59 = vpop.f32.mrb[5].mxu0  ;;  %v1372_v60 = vpop.f32.mrb[5].mxu1 }
 0x221   :  { %v1180_v37 = vadd.f32 %v1179_v59, %v855_v19  ;;  %v1373_v24 = vadd.f32 %v1372_v60, %v855_v19  ;;  %v1181_v23 = vpop.f32.mrb[6].mxu0  ;;  %v1374_v38 = vpop.f32.mrb[6].mxu1  ;;  %2031 = vmatprep.subr.bf16.mxu0 %v1680_v50  ;;  %2224 = vmatprep.subr.bf16.mxu1 %v1682_v29 }
 0x222   :  { %v1182_v14 = vadd.f32 %v1181_v23, %v859_v27  ;;  %v1375_v61 = vadd.f32 %v1374_v38, %v859_v27  ;;  %v1183_v56 = vpop.f32.mrb[7].mxu0  ;;  %v1376_v5 = vpop.f32.mrb[7].mxu1  ;;  %2032 = vmatpush1.bf16.msra.mxu0 %v1679_v49  ;;  %2225 = vmatpush1.bf16.msra.mxu1 %v1681_v13  ;;  %v1527_v43 = vmax.f32 %v1178_v15, 0.0  ;;  %v1529_v54 = vmax.f32 %v1371_v32, 0.0 }
 0x223   :  { %v1184_v30 = vadd.f32 %v1183_v56, %v859_v27  ;;  %v1377_v12 = vadd.f32 %v1376_v5, %v859_v27  ;;  %v1528_v2 = vmax.f32 %v1180_v37, 0.0  ;;  %v1530_v11 = vmax.f32 %v1373_v24, 0.0  ;;  %v875_v26 = vpop.permute.xlu1 %874 }
 0x224   :  { %v1531_v46 = vmax.f32 %v1182_v14, 0.0  ;;  %v1533_v62 = vmax.f32 %v1375_v61, 0.0 }
 0x225   :  { %v1532_v57 = vmax.f32 %v1184_v30, 0.0  ;;  %v1534_v58 = vmax.f32 %v1377_v12, 0.0 }
 0x226   :  { %v1683_v41 = vpack.c.bf16 %v1531_v46, %v1527_v43  ;;  %v1685_v63 = vpack.c.bf16 %v1533_v62, %v1529_v54 }
 0x227   :  { %v1684_v7 = vpack.c.bf16 %v1532_v57, %v1528_v2  ;;  %v1686_v1 = vpack.c.bf16 %v1534_v58, %v1530_v11  ;;  %v1187_v16 = vpop.f32.mrb[8].mxu0  ;;  %v1380_v20 = vpop.f32.mrb[8].mxu1 }
 0x228   :  { %v1188_v19 = vadd.f32 %v1187_v16, %v863_v53  ;;  %v1381_v10 = vadd.f32 %v1380_v20, %v863_v53  ;;  %v1189_v33 = vpop.f32.mrb[9].mxu0  ;;  %v1382_v36 = vpop.f32.mrb[9].mxu1  ;;  %v5183_v16 = vld [vmem:[%s6811_s1 + $0x8] sm:$0xff] }
 0x229   :  { %v1190_v45 = vadd.f32 %v1189_v33, %v863_v53  ;;  %v1383_v18 = vadd.f32 %v1382_v36, %v863_v53  ;;  %v1191_v6 = vpop.f32.mrb[10].mxu0  ;;  %v1384_v9 = vpop.f32.mrb[10].mxu1  ;;  %2033 = vmatprep.subr.bf16.mxu0 %v1684_v7  ;;  %2226 = vmatprep.subr.bf16.mxu1 %v1686_v1  ;;  %v5281_v53 = vmov 3   ;;  %v5182_v1 = vld [vmem:[%s6811_s1] sm:$0xff] }
 0x22a   :  { %v1192_v35 = vadd.f32 %v1191_v6, %v867_v4  ;;  %v1385_v44 = vadd.f32 %v1384_v9, %v867_v4  ;;  %v1193_v21 = vpop.f32.mrb[11].mxu0  ;;  %v1386_v39 = vpop.f32.mrb[11].mxu1  ;;  %2034 = vmatpush1.bf16.msra.mxu0 %v1683_v41  ;;  %2227 = vmatpush1.bf16.msra.mxu1 %v1685_v63  ;;  %v1535_v48 = vmax.f32 %v1188_v19, 0.0  ;;  %v1537_v0 = vmax.f32 %v1381_v10, 0.0 }
 0x22b   :  { %v1194_v55 = vadd.f32 %v1193_v21, %v867_v4  ;;  %v1387_v3 = vadd.f32 %v1386_v39, %v867_v4  ;;  %v1536_v47 = vmax.f32 %v1190_v45, 0.0  ;;  %v1538_v8 = vmax.f32 %v1383_v18, 0.0  ;;  %v879_v2 = vpop.permute.xlu0 %878  ;;  %v883_v11 = vpop.permute.xlu1 %882  ;;  %4964 = vset.pattern.permute.xlu0 %v5281_v53  ;;  %4965 = vset.pattern.permute.xlu1 %v5281_v53 }
 0x22c   :  { %v1539_v17 = vmax.f32 %v1192_v35, 0.0  ;;  %v1541_v25 = vmax.f32 %v1385_v44, 0.0  ;;  %1744 = vperm.xlu0 %4964, %v5182_v1   ;;  %1748 = vperm.xlu1 %4965, %v5183_v16  }
 0x22d   :  { %v1540_v42 = vmax.f32 %v1194_v55, 0.0  ;;  %v1542_v31 = vmax.f32 %v1387_v3, 0.0  ;;  %v5184_v3 = vld [vmem:[%s6811_s1 + $0x18] sm:$0xff] }
 0x22e   :  { %v1687_v28 = vpack.c.bf16 %v1539_v17, %v1535_v48  ;;  %v1689_v34 = vpack.c.bf16 %v1541_v25, %v1537_v0  ;;  %v5185_v48 = vld [vmem:[%s6811_s1 + $0x10] sm:$0xff] }
 0x22f   :  { %v1688_v40 = vpack.c.bf16 %v1540_v42, %v1536_v47  ;;  %v1690_v27 = vpack.c.bf16 %v1542_v31, %v1538_v8  ;;  %v1197_v49 = vpop.f32.mrb[12].mxu0  ;;  %v1390_v13 = vpop.f32.mrb[12].mxu1 }
 0x230   :  { %v1198_v50 = vadd.f32 %v1197_v49, %v871_v22  ;;  %v1391_v29 = vadd.f32 %v1390_v13, %v871_v22  ;;  %v1199_v51 = vpop.f32.mrb[13].mxu0  ;;  %v1392_v52 = vpop.f32.mrb[13].mxu1  ;;  %1756 = vperm.xlu0 %4964, %v5184_v3   ;;  %1752 = vperm.xlu1 %4965, %v5185_v48  }
 0x231   :  { %v1200_v15 = vadd.f32 %v1199_v51, %v871_v22  ;;  %v1393_v32 = vadd.f32 %v1392_v52, %v871_v22  ;;  %v1201_v59 = vpop.f32.mrb[14].mxu0  ;;  %v1394_v60 = vpop.f32.mrb[14].mxu1  ;;  %2035 = vmatprep.subr.bf16.mxu0 %v1688_v40  ;;  %2228 = vmatprep.subr.bf16.mxu1 %v1690_v27  ;;  %v5187_v51 = vld [vmem:[%s6811_s1 + $0x20] sm:$0xff] }
 0x232   :  { %v1202_v37 = vadd.f32 %v1201_v59, %v875_v26  ;;  %v1395_v24 = vadd.f32 %v1394_v60, %v875_v26  ;;  %v1203_v23 = vpop.f32.mrb[15].mxu0  ;;  %v1396_v38 = vpop.f32.mrb[15].mxu1  ;;  %2036 = vmatpush1.bf16.msra.mxu0 %v1687_v28  ;;  %2229 = vmatpush1.bf16.msra.mxu1 %v1689_v34  ;;  %v1543_v14 = vmax.f32 %v1198_v50, 0.0  ;;  %v1545_v5 = vmax.f32 %v1391_v29, 0.0  ;;  %v5186_v29 = vld [vmem:[%s6811_s1 + $0x28] sm:$0xff] }
 0x233   :  { %v1204_v61 = vadd.f32 %v1203_v23, %v875_v26  ;;  %v1397_v56 = vadd.f32 %v1396_v38, %v875_v26  ;;  %v1544_v43 = vmax.f32 %v1200_v15, 0.0  ;;  %v1546_v54 = vmax.f32 %v1393_v32, 0.0  ;;  %v887_v26 = vpop.permute.xlu0 %886  ;;  %v891_v28 = vpop.permute.xlu1 %890 }
 0x234   :  { %v1547_v30 = vmax.f32 %v1202_v37, 0.0  ;;  %v1549_v12 = vmax.f32 %v1395_v24, 0.0  ;;  %1764 = vperm.xlu0 %4964, %v5186_v29   ;;  %1760 = vperm.xlu1 %4965, %v5187_v51  }
 0x235   :  { %v1548_v46 = vmax.f32 %v1204_v61, 0.0  ;;  %v1550_v62 = vmax.f32 %v1397_v56, 0.0 }
 0x236   :  { %v1691_v57 = vpack.c.bf16 %v1547_v30, %v1543_v14  ;;  %v1693_v58 = vpack.c.bf16 %v1549_v12, %v1545_v5  ;;  %v5188_v30 = vld [vmem:[%s6811_s1 + $0x38] sm:$0xff]  ;;  %v5189_v12 = vld [vmem:[%s6811_s1 + $0x30] sm:$0xff] }
 0x237   :  { %v1692_v4 = vpack.c.bf16 %v1548_v46, %v1544_v43  ;;  %v1694_v41 = vpack.c.bf16 %v1550_v62, %v1546_v54  ;;  %v1207_v63 = vpop.f32.mrb[16].mxu0  ;;  %v1400_v7 = vpop.f32.mrb[16].mxu1 }
 0x238   :  { %v1208_v20 = vadd.f32 %v1207_v63, %v879_v2  ;;  %v1401_v19 = vadd.f32 %v1400_v7, %v879_v2  ;;  %v1209_v10 = vpop.f32.mrb[17].mxu0  ;;  %v1402_v33 = vpop.f32.mrb[17].mxu1  ;;  %1772 = vperm.xlu0 %4964, %v5188_v30   ;;  %1768 = vperm.xlu1 %4965, %v5189_v12  }
 0x239   :  { %v1210_v36 = vadd.f32 %v1209_v10, %v879_v2  ;;  %v1403_v45 = vadd.f32 %v1402_v33, %v879_v2  ;;  %v1211_v18 = vpop.f32.mrb[18].mxu0  ;;  %v1404_v6 = vpop.f32.mrb[18].mxu1  ;;  %2037 = vmatprep.subr.bf16.mxu0 %v1692_v4  ;;  %2230 = vmatprep.subr.bf16.mxu1 %v1694_v41  ;;  %v5190_v10 = vld [vmem:[%s6811_s1 + $0x48] sm:$0xff]  ;;  %v5191_v33 = vld [vmem:[%s6811_s1 + $0x40] sm:$0xff] }
 0x23a   :  { %v1212_v9 = vadd.f32 %v1211_v18, %v883_v11  ;;  %v1405_v35 = vadd.f32 %v1404_v6, %v883_v11  ;;  %v1213_v44 = vpop.f32.mrb[19].mxu0  ;;  %v1406_v21 = vpop.f32.mrb[19].mxu1  ;;  %2038 = vmatpush1.bf16.msra.mxu0 %v1691_v57  ;;  %2231 = vmatpush1.bf16.msra.mxu1 %v1693_v58  ;;  %v1551_v0 = vmax.f32 %v1208_v20, 0.0  ;;  %v1553_v17 = vmax.f32 %v1401_v19, 0.0 }
 0x23b   :  { %v1214_v39 = vadd.f32 %v1213_v44, %v883_v11  ;;  %v1407_v55 = vadd.f32 %v1406_v21, %v883_v11  ;;  %v1552_v8 = vmax.f32 %v1210_v36, 0.0  ;;  %v1554_v42 = vmax.f32 %v1403_v45, 0.0  ;;  %v895_v4 = vpop.permute.xlu0 %894  ;;  %v899_v41 = vpop.permute.xlu1 %898 }
 0x23c   :  { %v1555_v25 = vmax.f32 %v1212_v9, 0.0  ;;  %v1557_v47 = vmax.f32 %v1405_v35, 0.0  ;;  %1780 = vperm.xlu0 %4964, %v5190_v10   ;;  %1776 = vperm.xlu1 %4965, %v5191_v33  }
 0x23d   :  { %v1556_v31 = vmax.f32 %v1214_v39, 0.0  ;;  %v1558_v22 = vmax.f32 %v1407_v55, 0.0 }
 0x23e   :  { %v1695_v34 = vpack.c.bf16 %v1555_v25, %v1551_v0  ;;  %v1697_v40 = vpack.c.bf16 %v1557_v47, %v1553_v17  ;;  %v5192_v25 = vld [vmem:[%s6811_s1 + $0x58] sm:$0xff]  ;;  %v5193_v47 = vld [vmem:[%s6811_s1 + $0x50] sm:$0xff] }
 0x23f   :  { %v1696_v27 = vpack.c.bf16 %v1556_v31, %v1552_v8  ;;  %v1698_v49 = vpack.c.bf16 %v1558_v22, %v1554_v42  ;;  %v1217_v13 = vpop.f32.mrb[20].mxu0  ;;  %v1410_v50 = vpop.f32.mrb[20].mxu1 }
 0x240   :  { %v1218_v52 = vadd.f32 %v1217_v13, %v887_v26  ;;  %v1411_v15 = vadd.f32 %v1410_v50, %v887_v26  ;;  %v1219_v32 = vpop.f32.mrb[21].mxu0  ;;  %v1412_v59 = vpop.f32.mrb[21].mxu1  ;;  %1788 = vperm.xlu0 %4964, %v5192_v25   ;;  %1784 = vperm.xlu1 %4965, %v5193_v47  }
 0x241   :  { %v1220_v60 = vadd.f32 %v1219_v32, %v887_v26  ;;  %v1413_v37 = vadd.f32 %v1412_v59, %v887_v26  ;;  %v1221_v24 = vpop.f32.mrb[22].mxu0  ;;  %v1414_v23 = vpop.f32.mrb[22].mxu1  ;;  %2039 = vmatprep.subr.bf16.mxu0 %v1696_v27  ;;  %2232 = vmatprep.subr.bf16.mxu1 %v1698_v49  ;;  %v5194_v32 = vld [vmem:[%s6811_s1 + $0x68] sm:$0xff]  ;;  %v5195_v59 = vld [vmem:[%s6811_s1 + $0x60] sm:$0xff] }
 0x242   :  { %v1222_v38 = vadd.f32 %v1221_v24, %v891_v28  ;;  %v1415_v14 = vadd.f32 %v1414_v23, %v891_v28  ;;  %v1223_v61 = vpop.f32.mrb[23].mxu0  ;;  %v1416_v56 = vpop.f32.mrb[23].mxu1  ;;  %2040 = vmatpush1.bf16.msra.mxu0 %v1695_v34  ;;  %2233 = vmatpush1.bf16.msra.mxu1 %v1697_v40  ;;  %v1559_v54 = vmax.f32 %v1218_v52, 0.0  ;;  %v1561_v46 = vmax.f32 %v1411_v15, 0.0 }
 0x243   :  { %v1224_v5 = vadd.f32 %v1223_v61, %v891_v28  ;;  %v1417_v43 = vadd.f32 %v1416_v56, %v891_v28  ;;  %v1560_v11 = vmax.f32 %v1220_v60, 0.0  ;;  %v1562_v57 = vmax.f32 %v1413_v37, 0.0  ;;  %v903_v27 = vpop.permute.xlu0 %902  ;;  %v907_v49 = vpop.permute.xlu1 %906 }
 0x244   :  { %v1563_v62 = vmax.f32 %v1222_v38, 0.0  ;;  %v1565_v2 = vmax.f32 %v1415_v14, 0.0  ;;  %1796 = vperm.xlu0 %4964, %v5194_v32   ;;  %1792 = vperm.xlu1 %4965, %v5195_v59  }
 0x245   :  { %v1564_v58 = vmax.f32 %v1224_v5, 0.0  ;;  %v1566_v53 = vmax.f32 %v1417_v43, 0.0 }
 0x246   :  { %v1699_v63 = vpack.c.bf16 %v1563_v62, %v1559_v54  ;;  %v1701_v7 = vpack.c.bf16 %v1565_v2, %v1561_v46  ;;  %v5196_v62 = vld [vmem:[%s6811_s1 + $0x78] sm:$0xff]  ;;  %v5197_v2 = vld [vmem:[%s6811_s1 + $0x70] sm:$0xff] }
 0x247   :  { %v1700_v1 = vpack.c.bf16 %v1564_v58, %v1560_v11  ;;  %v1702_v16 = vpack.c.bf16 %v1566_v53, %v1562_v57  ;;  %v1227_v20 = vpop.f32.mrb[24].mxu0  ;;  %v1420_v19 = vpop.f32.mrb[24].mxu1 }
 0x248   :  { %v1228_v36 = vadd.f32 %v1227_v20, %v895_v4  ;;  %v1421_v45 = vadd.f32 %v1420_v19, %v895_v4  ;;  %v1229_v18 = vpop.f32.mrb[25].mxu0  ;;  %v1422_v6 = vpop.f32.mrb[25].mxu1  ;;  %1804 = vperm.xlu0 %4964, %v5196_v62   ;;  %1800 = vperm.xlu1 %4965, %v5197_v2  }
 0x249   :  { %v1230_v9 = vadd.f32 %v1229_v18, %v895_v4  ;;  %v1423_v35 = vadd.f32 %v1422_v6, %v895_v4  ;;  %v1231_v44 = vpop.f32.mrb[26].mxu0  ;;  %v1424_v21 = vpop.f32.mrb[26].mxu1  ;;  %2041 = vmatprep.subr.bf16.mxu0 %v1700_v1  ;;  %2234 = vmatprep.subr.bf16.mxu1 %v1702_v16  ;;  %v5198_v18 = vld [vmem:[%s6811_s1 + $0x88] sm:$0xff]  ;;  %v5199_v6 = vld [vmem:[%s6811_s1 + $0x80] sm:$0xff] }
 0x24a   :  { %v1232_v39 = vadd.f32 %v1231_v44, %v899_v41  ;;  %v1425_v55 = vadd.f32 %v1424_v21, %v899_v41  ;;  %v1233_v3 = vpop.f32.mrb[27].mxu0  ;;  %v1426_v48 = vpop.f32.mrb[27].mxu1  ;;  %2042 = vmatpush1.bf16.msra.mxu0 %v1699_v63  ;;  %2235 = vmatpush1.bf16.msra.mxu1 %v1701_v7  ;;  %v1567_v8 = vmax.f32 %v1228_v36, 0.0  ;;  %v1569_v42 = vmax.f32 %v1421_v45, 0.0 }
 0x24b   :  { %v1234_v0 = vadd.f32 %v1233_v3, %v899_v41  ;;  %v1427_v17 = vadd.f32 %v1426_v48, %v899_v41  ;;  %v1568_v26 = vmax.f32 %v1230_v9, 0.0  ;;  %v1570_v28 = vmax.f32 %v1423_v35, 0.0  ;;  %v911_v1 = vpop.permute.xlu0 %910  ;;  %v915_v16 = vpop.permute.xlu1 %914 }
 0x24c   :  { %v1571_v31 = vmax.f32 %v1232_v39, 0.0  ;;  %v1573_v22 = vmax.f32 %v1425_v55, 0.0  ;;  %1812 = vperm.xlu0 %4964, %v5198_v18   ;;  %1808 = vperm.xlu1 %4965, %v5199_v6  }
 0x24d   :  { %v1572_v34 = vmax.f32 %v1234_v0, 0.0  ;;  %v1574_v40 = vmax.f32 %v1427_v17, 0.0 }
 0x24e   :  { %v1703_v13 = vpack.c.bf16 %v1571_v31, %v1567_v8  ;;  %v1705_v50 = vpack.c.bf16 %v1573_v22, %v1569_v42  ;;  %v5200_v31 = vld [vmem:[%s6811_s1 + $0x98] sm:$0xff]  ;;  %v5201_v22 = vld [vmem:[%s6811_s1 + $0x90] sm:$0xff] }
 0x24f   :  { %v1704_v29 = vpack.c.bf16 %v1572_v34, %v1568_v26  ;;  %v1706_v51 = vpack.c.bf16 %v1574_v40, %v1570_v28  ;;  %v1237_v52 = vpop.f32.mrb[28].mxu0  ;;  %v1430_v15 = vpop.f32.mrb[28].mxu1 }
 0x250   :  { %v1238_v60 = vadd.f32 %v1237_v52, %v903_v27  ;;  %v1431_v37 = vadd.f32 %v1430_v15, %v903_v27  ;;  %v1239_v24 = vpop.f32.mrb[29].mxu0  ;;  %v1432_v23 = vpop.f32.mrb[29].mxu1  ;;  %1820 = vperm.xlu0 %4964, %v5200_v31   ;;  %1816 = vperm.xlu1 %4965, %v5201_v22  }
 0x251   :  { %v1240_v38 = vadd.f32 %v1239_v24, %v903_v27  ;;  %v1433_v14 = vadd.f32 %v1432_v23, %v903_v27  ;;  %v1241_v61 = vpop.f32.mrb[30].mxu0  ;;  %v1434_v56 = vpop.f32.mrb[30].mxu1  ;;  %2043 = vmatprep.subr.bf16.mxu0 %v1704_v29  ;;  %2236 = vmatprep.subr.bf16.mxu1 %v1706_v51  ;;  %v5202_v24 = vld [vmem:[%s6811_s1 + $0xa8] sm:$0xff]  ;;  %v5203_v23 = vld [vmem:[%s6811_s1 + $0xa0] sm:$0xff] }
 0x252   :  { %v1242_v5 = vadd.f32 %v1241_v61, %v907_v49  ;;  %v1435_v43 = vadd.f32 %v1434_v56, %v907_v49  ;;  %v1243_v30 = vpop.f32.mrb[31].mxu0  ;;  %v1436_v12 = vpop.f32.mrb[31].mxu1  ;;  %2044 = vmatpush1.bf16.msra.mxu0 %v1703_v13  ;;  %2237 = vmatpush1.bf16.msra.mxu1 %v1705_v50  ;;  %v1575_v11 = vmax.f32 %v1238_v60, 0.0  ;;  %v1577_v57 = vmax.f32 %v1431_v37, 0.0 }
 0x253   :  { %v1244_v54 = vadd.f32 %v1243_v30, %v907_v49  ;;  %v1437_v46 = vadd.f32 %v1436_v12, %v907_v49  ;;  %v1576_v4 = vmax.f32 %v1240_v38, 0.0  ;;  %v1578_v41 = vmax.f32 %v1433_v14, 0.0  ;;  %v919_v29 = vpop.permute.xlu0 %918  ;;  %v923_v51 = vpop.permute.xlu1 %922 }
 0x254   :  { %v1579_v58 = vmax.f32 %v1242_v5, 0.0  ;;  %v1581_v53 = vmax.f32 %v1435_v43, 0.0  ;;  %1828 = vperm.xlu0 %4964, %v5202_v24   ;;  %1824 = vperm.xlu1 %4965, %v5203_v23  }
 0x255   :  { %v1580_v63 = vmax.f32 %v1244_v54, 0.0  ;;  %v1582_v7 = vmax.f32 %v1437_v46, 0.0 }
 0x256   :  { %v1707_v20 = vpack.c.bf16 %v1579_v58, %v1575_v11  ;;  %v1709_v19 = vpack.c.bf16 %v1581_v53, %v1577_v57  ;;  %v5204_v58 = vld [vmem:[%s6811_s1 + $0xb8] sm:$0xff]  ;;  %v5205_v53 = vld [vmem:[%s6811_s1 + $0xb0] sm:$0xff] }
 0x257   :  { %v1708_v10 = vpack.c.bf16 %v1580_v63, %v1576_v4  ;;  %v1710_v33 = vpack.c.bf16 %v1582_v7, %v1578_v41  ;;  %v1247_v36 = vpop.f32.mrb[32].mxu0  ;;  %v1440_v45 = vpop.f32.mrb[32].mxu1 }
 0x258   :  { %v1248_v9 = vadd.f32 %v1247_v36, %v911_v1  ;;  %v1441_v35 = vadd.f32 %v1440_v45, %v911_v1  ;;  %v1249_v44 = vpop.f32.mrb[33].mxu0  ;;  %v1442_v21 = vpop.f32.mrb[33].mxu1  ;;  %1836 = vperm.xlu0 %4964, %v5204_v58   ;;  %1832 = vperm.xlu1 %4965, %v5205_v53  }
 0x259   :  { %v1250_v39 = vadd.f32 %v1249_v44, %v911_v1  ;;  %v1443_v55 = vadd.f32 %v1442_v21, %v911_v1  ;;  %v1251_v3 = vpop.f32.mrb[34].mxu0  ;;  %v1444_v48 = vpop.f32.mrb[34].mxu1  ;;  %2045 = vmatprep.subr.bf16.mxu0 %v1708_v10  ;;  %2238 = vmatprep.subr.bf16.mxu1 %v1710_v33  ;;  %v5206_v44 = vld [vmem:[%s6811_s1 + $0xc8] sm:$0xff]  ;;  %v5207_v21 = vld [vmem:[%s6811_s1 + $0xc0] sm:$0xff] }
 0x25a   :  { %v1252_v0 = vadd.f32 %v1251_v3, %v915_v16  ;;  %v1445_v17 = vadd.f32 %v1444_v48, %v915_v16  ;;  %v1253_v25 = vpop.f32.mrb[35].mxu0  ;;  %v1446_v47 = vpop.f32.mrb[35].mxu1  ;;  %2046 = vmatpush1.bf16.msra.mxu0 %v1707_v20  ;;  %2239 = vmatpush1.bf16.msra.mxu1 %v1709_v19  ;;  %v1583_v26 = vmax.f32 %v1248_v9, 0.0  ;;  %v1585_v28 = vmax.f32 %v1441_v35, 0.0 }
 0x25b   :  { %v1254_v8 = vadd.f32 %v1253_v25, %v915_v16  ;;  %v1447_v42 = vadd.f32 %v1446_v47, %v915_v16  ;;  %v1584_v27 = vmax.f32 %v1250_v39, 0.0  ;;  %v1586_v49 = vmax.f32 %v1443_v55, 0.0  ;;  %v927_v10 = vpop.permute.xlu0 %926  ;;  %v931_v33 = vpop.permute.xlu1 %930 }
 0x25c   :  { %v1587_v34 = vmax.f32 %v1252_v0, 0.0  ;;  %v1589_v40 = vmax.f32 %v1445_v17, 0.0  ;;  %1844 = vperm.xlu0 %4964, %v5206_v44   ;;  %1840 = vperm.xlu1 %4965, %v5207_v21  }
 0x25d   :  { %v1588_v13 = vmax.f32 %v1254_v8, 0.0  ;;  %v1590_v50 = vmax.f32 %v1447_v42, 0.0 }
 0x25e   :  { %v1711_v52 = vpack.c.bf16 %v1587_v34, %v1583_v26  ;;  %v1713_v15 = vpack.c.bf16 %v1589_v40, %v1585_v28  ;;  %v5208_v34 = vld [vmem:[%s6811_s1 + $0xd8] sm:$0xff]  ;;  %v5209_v40 = vld [vmem:[%s6811_s1 + $0xd0] sm:$0xff] }
 0x25f   :  { %v1712_v32 = vpack.c.bf16 %v1588_v13, %v1584_v27  ;;  %v1714_v59 = vpack.c.bf16 %v1590_v50, %v1586_v49  ;;  %v1257_v60 = vpop.f32.mrb[36].mxu0  ;;  %v1450_v37 = vpop.f32.mrb[36].mxu1 }
 0x260   :  { %v1258_v38 = vadd.f32 %v1257_v60, %v919_v29  ;;  %v1451_v14 = vadd.f32 %v1450_v37, %v919_v29  ;;  %v1259_v61 = vpop.f32.mrb[37].mxu0  ;;  %v1452_v56 = vpop.f32.mrb[37].mxu1  ;;  %1852 = vperm.xlu0 %4964, %v5208_v34   ;;  %1848 = vperm.xlu1 %4965, %v5209_v40  }
 0x261   :  { %v1260_v5 = vadd.f32 %v1259_v61, %v919_v29  ;;  %v1453_v43 = vadd.f32 %v1452_v56, %v919_v29  ;;  %v1261_v30 = vpop.f32.mrb[38].mxu0  ;;  %v1454_v12 = vpop.f32.mrb[38].mxu1  ;;  %2047 = vmatprep.subr.bf16.mxu0 %v1712_v32  ;;  %2240 = vmatprep.subr.bf16.mxu1 %v1714_v59  ;;  %v5210_v61 = vld [vmem:[%s6811_s1 + $0xe8] sm:$0xff]  ;;  %v5211_v56 = vld [vmem:[%s6811_s1 + $0xe0] sm:$0xff] }
 0x262   :  { %v1262_v54 = vadd.f32 %v1261_v30, %v923_v51  ;;  %v1455_v46 = vadd.f32 %v1454_v12, %v923_v51  ;;  %v1263_v62 = vpop.f32.mrb[39].mxu0  ;;  %v1456_v2 = vpop.f32.mrb[39].mxu1  ;;  %2048 = vmatpush1.bf16.msra.mxu0 %v1711_v52  ;;  %2241 = vmatpush1.bf16.msra.mxu1 %v1713_v15  ;;  %v1591_v4 = vmax.f32 %v1258_v38, 0.0  ;;  %v1593_v41 = vmax.f32 %v1451_v14, 0.0 }
 0x263   :  { %v1264_v11 = vadd.f32 %v1263_v62, %v923_v51  ;;  %v1457_v57 = vadd.f32 %v1456_v2, %v923_v51  ;;  %v1592_v1 = vmax.f32 %v1260_v5, 0.0  ;;  %v1594_v16 = vmax.f32 %v1453_v43, 0.0  ;;  %v935_v32 = vpop.permute.xlu0 %934  ;;  %v939_v59 = vpop.permute.xlu1 %938 }
 0x264   :  { %v1595_v63 = vmax.f32 %v1262_v54, 0.0  ;;  %v1597_v7 = vmax.f32 %v1455_v46, 0.0  ;;  %1860 = vperm.xlu0 %4964, %v5210_v61   ;;  %1856 = vperm.xlu1 %4965, %v5211_v56  }
 0x265   :  { %v1596_v20 = vmax.f32 %v1264_v11, 0.0  ;;  %v1598_v19 = vmax.f32 %v1457_v57, 0.0 }
 0x266   :  { %v1715_v36 = vpack.c.bf16 %v1595_v63, %v1591_v4  ;;  %v1717_v45 = vpack.c.bf16 %v1597_v7, %v1593_v41  ;;  %v5212_v63 = vld [vmem:[%s6811_s1 + $0xf8] sm:$0xff]  ;;  %v5213_v7 = vld [vmem:[%s6811_s1 + $0xf0] sm:$0xff] }
 0x267   :  { %v1716_v18 = vpack.c.bf16 %v1596_v20, %v1592_v1  ;;  %v1718_v6 = vpack.c.bf16 %v1598_v19, %v1594_v16  ;;  %v1267_v9 = vpop.f32.mrb[40].mxu0  ;;  %v1460_v35 = vpop.f32.mrb[40].mxu1 }
 0x268   :  { %v1268_v39 = vadd.f32 %v1267_v9, %v927_v10  ;;  %v1461_v55 = vadd.f32 %v1460_v35, %v927_v10  ;;  %v1269_v3 = vpop.f32.mrb[41].mxu0  ;;  %v1462_v48 = vpop.f32.mrb[41].mxu1  ;;  %1868 = vperm.xlu0 %4964, %v5212_v63   ;;  %1864 = vperm.xlu1 %4965, %v5213_v7  }
 0x269   :  { %v1270_v0 = vadd.f32 %v1269_v3, %v927_v10  ;;  %v1463_v17 = vadd.f32 %v1462_v48, %v927_v10  ;;  %v1271_v25 = vpop.f32.mrb[42].mxu0  ;;  %v1464_v47 = vpop.f32.mrb[42].mxu1  ;;  %2049 = vmatprep.subr.bf16.mxu0 %v1716_v18  ;;  %2242 = vmatprep.subr.bf16.mxu1 %v1718_v6 }
 0x26a   :  { %v1272_v8 = vadd.f32 %v1271_v25, %v931_v33  ;;  %v1465_v42 = vadd.f32 %v1464_v47, %v931_v33  ;;  %v1273_v31 = vpop.f32.mrb[43].mxu0  ;;  %v1466_v22 = vpop.f32.mrb[43].mxu1  ;;  %2050 = vmatpush1.bf16.msra.mxu0 %v1715_v36  ;;  %2243 = vmatpush1.bf16.msra.mxu1 %v1717_v45  ;;  %v1599_v27 = vmax.f32 %v1268_v39, 0.0  ;;  %v1601_v49 = vmax.f32 %v1461_v55, 0.0 }
 0x26b   :  { %v1274_v26 = vadd.f32 %v1273_v31, %v931_v33  ;;  %v1467_v28 = vadd.f32 %v1466_v22, %v931_v33  ;;  %v1600_v29 = vmax.f32 %v1270_v0, 0.0  ;;  %v1602_v51 = vmax.f32 %v1463_v17, 0.0  ;;  %v943_v18 = vpop.permute.xlu0 %942  ;;  %v947_v6 = vpop.permute.xlu1 %946 }
 0x26c   :  { %v1603_v13 = vmax.f32 %v1272_v8, 0.0  ;;  %v1605_v50 = vmax.f32 %v1465_v42, 0.0 }
 0x26d   :  { %v1604_v52 = vmax.f32 %v1274_v26, 0.0  ;;  %v1606_v15 = vmax.f32 %v1467_v28, 0.0 }
 0x26e   :  { %v1719_v60 = vpack.c.bf16 %v1603_v13, %v1599_v27  ;;  %v1721_v37 = vpack.c.bf16 %v1605_v50, %v1601_v49 }
 0x26f   :  { %v1720_v24 = vpack.c.bf16 %v1604_v52, %v1600_v29  ;;  %v1722_v23 = vpack.c.bf16 %v1606_v15, %v1602_v51  ;;  %v1277_v38 = vpop.f32.mrb[44].mxu0  ;;  %v1470_v14 = vpop.f32.mrb[44].mxu1 }
 0x270   :  { %v1278_v5 = vadd.f32 %v1277_v38, %v935_v32  ;;  %v1471_v43 = vadd.f32 %v1470_v14, %v935_v32  ;;  %v1279_v30 = vpop.f32.mrb[45].mxu0  ;;  %v1472_v12 = vpop.f32.mrb[45].mxu1 }
 0x271   :  { %v1280_v54 = vadd.f32 %v1279_v30, %v935_v32  ;;  %v1473_v46 = vadd.f32 %v1472_v12, %v935_v32  ;;  %v1281_v62 = vpop.f32.mrb[46].mxu0  ;;  %v1474_v2 = vpop.f32.mrb[46].mxu1  ;;  %2051 = vmatprep.subr.bf16.mxu0 %v1720_v24  ;;  %2244 = vmatprep.subr.bf16.mxu1 %v1722_v23 }
 0x272   :  { %v1282_v11 = vadd.f32 %v1281_v62, %v939_v59  ;;  %v1475_v57 = vadd.f32 %v1474_v2, %v939_v59  ;;  %v1283_v58 = vpop.f32.mrb[47].mxu0  ;;  %v1476_v53 = vpop.f32.mrb[47].mxu1  ;;  %2052 = vmatpush1.bf16.msra.mxu0 %v1719_v60  ;;  %2245 = vmatpush1.bf16.msra.mxu1 %v1721_v37  ;;  %v1607_v1 = vmax.f32 %v1278_v5, 0.0  ;;  %v1609_v16 = vmax.f32 %v1471_v43, 0.0 }
 0x273   :  { %v1284_v4 = vadd.f32 %v1283_v58, %v939_v59  ;;  %v1477_v41 = vadd.f32 %v1476_v53, %v939_v59  ;;  %v1608_v10 = vmax.f32 %v1280_v54, 0.0  ;;  %v1610_v33 = vmax.f32 %v1473_v46, 0.0  ;;  %v951_v32 = vpop.permute.xlu0 %950  ;;  %v955_v59 = vpop.permute.xlu1 %954 }
 0x274   :  { %v1611_v20 = vmax.f32 %v1282_v11, 0.0  ;;  %v1613_v19 = vmax.f32 %v1475_v57, 0.0 }
 0x275   :  { %v1612_v36 = vmax.f32 %v1284_v4, 0.0  ;;  %v1614_v45 = vmax.f32 %v1477_v41, 0.0 }
 0x276   :  { %v1723_v9 = vpack.c.bf16 %v1611_v20, %v1607_v1  ;;  %v1725_v35 = vpack.c.bf16 %v1613_v19, %v1609_v16 }
 0x277   :  { %v1724_v44 = vpack.c.bf16 %v1612_v36, %v1608_v10  ;;  %v1726_v21 = vpack.c.bf16 %v1614_v45, %v1610_v33  ;;  %v1287_v39 = vpop.f32.mrb[48].mxu0  ;;  %v1480_v55 = vpop.f32.mrb[48].mxu1 }
 0x278   :  { %v1288_v3 = vadd.f32 %v1287_v39, %v943_v18  ;;  %v1481_v48 = vadd.f32 %v1480_v55, %v943_v18  ;;  %v1289_v0 = vpop.f32.mrb[49].mxu0  ;;  %v1482_v17 = vpop.f32.mrb[49].mxu1 }
 0x279   :  { %v1290_v25 = vadd.f32 %v1289_v0, %v943_v18  ;;  %v1483_v47 = vadd.f32 %v1482_v17, %v943_v18  ;;  %v1291_v8 = vpop.f32.mrb[50].mxu0  ;;  %v1484_v42 = vpop.f32.mrb[50].mxu1  ;;  %2053 = vmatprep.subr.bf16.mxu0 %v1724_v44  ;;  %2246 = vmatprep.subr.bf16.mxu1 %v1726_v21 }
 0x27a   :  { %v1292_v31 = vadd.f32 %v1291_v8, %v947_v6  ;;  %v1485_v22 = vadd.f32 %v1484_v42, %v947_v6  ;;  %v1293_v26 = vpop.f32.mrb[51].mxu0  ;;  %v1486_v28 = vpop.f32.mrb[51].mxu1  ;;  %2054 = vmatpush1.bf16.msra.mxu0 %v1723_v9  ;;  %2247 = vmatpush1.bf16.msra.mxu1 %v1725_v35  ;;  %v1615_v27 = vmax.f32 %v1288_v3, 0.0  ;;  %v1617_v49 = vmax.f32 %v1481_v48, 0.0 }
 0x27b   :  { %v1294_v34 = vadd.f32 %v1293_v26, %v947_v6  ;;  %v1487_v40 = vadd.f32 %v1486_v28, %v947_v6  ;;  %v1616_v29 = vmax.f32 %v1290_v25, 0.0  ;;  %v1618_v51 = vmax.f32 %v1483_v47, 0.0  ;;  %v959_v10 = vpop.permute.xlu0 %958  ;;  %v963_v33 = vpop.permute.xlu1 %962 }
 0x27c   :  { %v1619_v13 = vmax.f32 %v1292_v31, 0.0  ;;  %v1621_v50 = vmax.f32 %v1485_v22, 0.0 }
 0x27d   :  { %v1620_v52 = vmax.f32 %v1294_v34, 0.0  ;;  %v1622_v15 = vmax.f32 %v1487_v40, 0.0 }
 0x27e   :  { %v1727_v60 = vpack.c.bf16 %v1619_v13, %v1615_v27  ;;  %v1729_v37 = vpack.c.bf16 %v1621_v50, %v1617_v49 }
 0x27f   :  { %v1728_v24 = vpack.c.bf16 %v1620_v52, %v1616_v29  ;;  %v1730_v23 = vpack.c.bf16 %v1622_v15, %v1618_v51  ;;  %v1297_v38 = vpop.f32.mrb[52].mxu0  ;;  %v1490_v14 = vpop.f32.mrb[52].mxu1 }
 0x280   :  { %v1298_v61 = vadd.f32 %v1297_v38, %v951_v32  ;;  %v1491_v56 = vadd.f32 %v1490_v14, %v951_v32  ;;  %v1299_v5 = vpop.f32.mrb[53].mxu0  ;;  %v1492_v43 = vpop.f32.mrb[53].mxu1 }
 0x281   :  { %v1300_v30 = vadd.f32 %v1299_v5, %v951_v32  ;;  %v1493_v12 = vadd.f32 %v1492_v43, %v951_v32  ;;  %v1301_v54 = vpop.f32.mrb[54].mxu0  ;;  %v1494_v46 = vpop.f32.mrb[54].mxu1  ;;  %2055 = vmatprep.subr.bf16.mxu0 %v1728_v24  ;;  %2248 = vmatprep.subr.bf16.mxu1 %v1730_v23 }
 0x282   :  { %v1302_v62 = vadd.f32 %v1301_v54, %v955_v59  ;;  %v1495_v2 = vadd.f32 %v1494_v46, %v955_v59  ;;  %v1303_v11 = vpop.f32.mrb[55].mxu0  ;;  %v1496_v57 = vpop.f32.mrb[55].mxu1  ;;  %2056 = vmatpush1.bf16.msra.mxu0 %v1727_v60  ;;  %2249 = vmatpush1.bf16.msra.mxu1 %v1729_v37  ;;  %v1623_v4 = vmax.f32 %v1298_v61, 0.0  ;;  %v1625_v41 = vmax.f32 %v1491_v56, 0.0 }
 0x283   :  { %v1304_v58 = vadd.f32 %v1303_v11, %v955_v59  ;;  %v1497_v53 = vadd.f32 %v1496_v57, %v955_v59  ;;  %v1624_v1 = vmax.f32 %v1300_v30, 0.0  ;;  %v1626_v16 = vmax.f32 %v1493_v12, 0.0  ;;  %v967_v29 = vpop.permute.xlu0 %966  ;;  %v971_v51 = vpop.permute.xlu1 %970 }
 0x284   :  { %v1627_v63 = vmax.f32 %v1302_v62, 0.0  ;;  %v1629_v7 = vmax.f32 %v1495_v2, 0.0 }
 0x285   :  { %v1628_v20 = vmax.f32 %v1304_v58, 0.0  ;;  %v1630_v19 = vmax.f32 %v1497_v53, 0.0 }
 0x286   :  { %v1731_v36 = vpack.c.bf16 %v1627_v63, %v1623_v4  ;;  %v1733_v45 = vpack.c.bf16 %v1629_v7, %v1625_v41 }
 0x287   :  { %v1732_v18 = vpack.c.bf16 %v1628_v20, %v1624_v1  ;;  %v1734_v6 = vpack.c.bf16 %v1630_v19, %v1626_v16  ;;  %v1307_v9 = vpop.f32.mrb[56].mxu0  ;;  %v1500_v35 = vpop.f32.mrb[56].mxu1 }
 0x288   :  { %v1308_v44 = vadd.f32 %v1307_v9, %v959_v10  ;;  %v1501_v21 = vadd.f32 %v1500_v35, %v959_v10  ;;  %v1309_v39 = vpop.f32.mrb[57].mxu0  ;;  %v1502_v55 = vpop.f32.mrb[57].mxu1  ;;  %v5036_v9 = vld [vmem:[%s6814_s3 + $0x30] ss:$8 sps:$4 sm:$0xff]   ;;  %v5037_v35 = vld [vmem:[%s6814_s3 + $0x44] ss:$8 sps:$4 sm:$0xff]  }
 0x289   :  { %v1310_v3 = vadd.f32 %v1309_v39, %v959_v10  ;;  %v1503_v48 = vadd.f32 %v1502_v55, %v959_v10  ;;  %v1311_v0 = vpop.f32.mrb[58].mxu0  ;;  %v1504_v17 = vpop.f32.mrb[58].mxu1  ;;  %2057 = vmatprep.subr.bf16.mxu0 %v1732_v18  ;;  %2250 = vmatprep.subr.bf16.mxu1 %v1734_v6  ;;  %v5025_v10 = vld [vmem:[%s6814_s3] ss:$8 sps:$4 sm:$0xff]   ;;  %v5034_v6 = vld [vmem:[%s6814_s3 + $0x34] ss:$8 sps:$4 sm:$0xff]  }
 0x28a   :  { %v1312_v25 = vadd.f32 %v1311_v0, %v963_v33  ;;  %v1505_v47 = vadd.f32 %v1504_v17, %v963_v33  ;;  %v1313_v8 = vpop.f32.mrb[59].mxu0  ;;  %v1506_v42 = vpop.f32.mrb[59].mxu1  ;;  %2058 = vmatpush1.bf16.msra.mxu0 %v1731_v36  ;;  %2251 = vmatpush1.bf16.msra.mxu1 %v1733_v45  ;;  %v1631_v26 = vmax.f32 %v1308_v44, 0.0  ;;  %v1633_v28 = vmax.f32 %v1501_v21, 0.0  ;;  %v5030_v36 = vld [vmem:[%s6814_s3 + $0x10] ss:$8 sps:$4 sm:$0xff]  }
 0x28b   :  { %v1314_v31 = vadd.f32 %v1313_v8, %v963_v33  ;;  %v1507_v22 = vadd.f32 %v1506_v42, %v963_v33  ;;  %v1632_v27 = vmax.f32 %v1310_v3, 0.0  ;;  %v1634_v49 = vmax.f32 %v1503_v48, 0.0  ;;  %v5028_v33 = vld [vmem:[%s6814_s3 + $0x14] ss:$8 sps:$4 sm:$0xff]   ;;  %v5031_v45 = vld [vmem:[%s6814_s3 + $0x24] ss:$8 sps:$4 sm:$0xff]  }
 0x28c   :  { %v1635_v34 = vmax.f32 %v1312_v25, 0.0  ;;  %v1637_v40 = vmax.f32 %v1505_v47, 0.0  ;;  %v5033_v18 = vld [vmem:[%s6814_s3 + $0x20] ss:$8 sps:$4 sm:$0xff]   ;;  %v5040_v21 = vld [vmem:[%s6814_s3 + $0x54] ss:$8 sps:$4 sm:$0xff]  }
 0x28d   :  { %v1636_v13 = vmax.f32 %v1314_v31, 0.0  ;;  %v1638_v50 = vmax.f32 %v1507_v22, 0.0  ;;  %v5039_v44 = vld [vmem:[%s6814_s3 + $0x40] ss:$8 sps:$4 sm:$0xff]   ;;  %v5042_v39 = vld [vmem:[%s6814_s3 + $0x50] ss:$8 sps:$4 sm:$0xff]  }
 0x28e   :  { %v1735_v52 = vpack.c.bf16 %v1635_v34, %v1631_v26  ;;  %v1737_v15 = vpack.c.bf16 %v1637_v40, %v1633_v28  ;;  %v5043_v55 = vld [vmem:[%s6814_s3 + $0x64] ss:$8 sps:$4 sm:$0xff]   ;;  %v5045_v3 = vld [vmem:[%s6814_s3 + $0x60] ss:$8 sps:$4 sm:$0xff]   ;;  %v5046_v48 = vld [vmem:[%s6814_s3 + $0x74] ss:$8 sps:$4 sm:$0xff]  }
 0x28f   :  { %v1736_v32 = vpack.c.bf16 %v1636_v13, %v1632_v27  ;;  %v1738_v59 = vpack.c.bf16 %v1638_v50, %v1634_v49  ;;  %v1317_v60 = vpop.f32.mrb[60].mxu0  ;;  %v1510_v37 = vpop.f32.mrb[60].mxu1  ;;  %v5048_v0 = vld [vmem:[%s6814_s3 + $0x70] ss:$8 sps:$4 sm:$0xff]   ;;  %v5049_v17 = vld [vmem:[%s6814_s3 + $0x84] ss:$8 sps:$4 sm:$0xff]  }
 0x290   :  { %v1318_v24 = vadd.f32 %v1317_v60, %v967_v29  ;;  %v1511_v23 = vadd.f32 %v1510_v37, %v967_v29  ;;  %v1319_v38 = vpop.f32.mrb[61].mxu0  ;;  %v1512_v14 = vpop.f32.mrb[61].mxu1  ;;  %v5051_v25 = vld [vmem:[%s6814_s3 + $0x80] ss:$8 sps:$4 sm:$0xff]   ;;  %v5052_v47 = vld [vmem:[%s6814_s3 + $0x94] ss:$8 sps:$4 sm:$0xff]  }
 0x291   :  { %v1320_v61 = vadd.f32 %v1319_v38, %v967_v29  ;;  %v1513_v56 = vadd.f32 %v1512_v14, %v967_v29  ;;  %v1321_v5 = vpop.f32.mrb[62].mxu0  ;;  %v1514_v43 = vpop.f32.mrb[62].mxu1  ;;  %2059 = vmatprep.subr.bf16.mxu0 %v1736_v32  ;;  %2252 = vmatprep.subr.bf16.mxu1 %v1738_v59  ;;  %v5054_v8 = vld [vmem:[%s6814_s3 + $0x90] ss:$8 sps:$4 sm:$0xff]   ;;  %v5055_v42 = vld [vmem:[%s6814_s3 + $0xa4] ss:$8 sps:$4 sm:$0xff]  }
 0x292   :  { %v1322_v30 = vadd.f32 %v1321_v5, %v971_v51  ;;  %v1515_v12 = vadd.f32 %v1514_v43, %v971_v51  ;;  %v1323_v54 = vpop.f32.mrb[63].mxu0  ;;  %v1516_v46 = vpop.f32.mrb[63].mxu1  ;;  %2060 = vmatpush1.bf16.msra.mxu0 %v1735_v52  ;;  %2253 = vmatpush1.bf16.msra.mxu1 %v1737_v15  ;;  %v1639_v11 = vmax.f32 %v1318_v24, 0.0  ;;  %v1641_v57 = vmax.f32 %v1511_v23, 0.0  ;;  %v5057_v31 = vld [vmem:[%s6814_s3 + $0xa0] ss:$8 sps:$4 sm:$0xff]  }
 0x293   :  { %v1324_v62 = vadd.f32 %v1323_v54, %v971_v51  ;;  %v1517_v2 = vadd.f32 %v1516_v46, %v971_v51  ;;  %v1640_v4 = vmax.f32 %v1320_v61, 0.0  ;;  %v1642_v41 = vmax.f32 %v1513_v56, 0.0  ;;  %v5058_v22 = vld [vmem:[%s6814_s3 + $0xb4] ss:$8 sps:$4 sm:$0xff]   ;;  %v5060_v26 = vld [vmem:[%s6814_s3 + $0xb0] ss:$8 sps:$4 sm:$0xff]  }
 0x294   :  { %v1643_v58 = vmax.f32 %v1322_v30, 0.0  ;;  %v1645_v53 = vmax.f32 %v1515_v12, 0.0  ;;  %v5061_v28 = vld [vmem:[%s6814_s3 + $0xc4] ss:$8 sps:$4 sm:$0xff]   ;;  %v5063_v34 = vld [vmem:[%s6814_s3 + $0xc0] ss:$8 sps:$4 sm:$0xff]  }
 0x295   :  { %v1644_v63 = vmax.f32 %v1324_v62, 0.0  ;;  %v1646_v7 = vmax.f32 %v1517_v2, 0.0  ;;  %v5064_v40 = vld [vmem:[%s6814_s3 + $0xd4] ss:$8 sps:$4 sm:$0xff]   ;;  %v5066_v27 = vld [vmem:[%s6814_s3 + $0xd0] ss:$8 sps:$4 sm:$0xff]  }
 0x296   :  { %v1739_v1 = vpack.c.bf16 %v1643_v58, %v1639_v11  ;;  %v1741_v16 = vpack.c.bf16 %v1645_v53, %v1641_v57  ;;  %v5067_v49 = vld [vmem:[%s6814_s3 + $0xe4] ss:$8 sps:$4 sm:$0xff]   ;;  %v5069_v13 = vld [vmem:[%s6814_s3 + $0xe0] ss:$8 sps:$4 sm:$0xff]   ;;  %v5070_v50 = vld [vmem:[%s6814_s3 + $0xf4] ss:$8 sps:$4 sm:$0xff]  }
 0x297   :  { %v1740_v20 = vpack.c.bf16 %v1644_v63, %v1640_v4  ;;  %v1742_v19 = vpack.c.bf16 %v1646_v7, %v1642_v41  ;;  %v5072_v29 = vld [vmem:[%s6814_s3 + $0xf0] ss:$8 sps:$4 sm:$0xff]   ;;  %v5075_v57 = vld [vmem:[%s6815_s4 + $0x4] ss:$8 sps:$4 sm:$0xff]  }
 0x299   :  { %2061 = vmatprep.subr.bf16.mxu0 %v1740_v20  ;;  %2254 = vmatprep.subr.bf16.mxu1 %v1742_v19 }
 0x29a   :  { %2062 = vmatpush1.bf16.msra.mxu0 %v1739_v1  ;;  %2255 = vmatpush1.bf16.msra.mxu1 %v1741_v16 }
 0x29d   :  { %2064 = vmatmul.mubr.bf16.vlgmr.msra.gmra.mrb[64].mxu0 %v5025_v10  ;;  %2257 = vmatmul.mubr.bf16.vlgmr.msra.gmra.mrb[64].mxu1 %v5025_v10 }
 0x29e   :  { %2073 = vmatprep.mubr.bf16.mxu0 %v5028_v33  ;;  %2266 = vmatprep.mubr.bf16.mxu1 %v5028_v33 }
 0x2a5   :  { %2074 = vmatmul.mubr.bf16.gmra.mrb[68].mxu0 %v5030_v36  ;;  %2267 = vmatmul.mubr.bf16.gmra.mrb[68].mxu1 %v5030_v36 }
 0x2a6   :  { %2083 = vmatprep.mubr.bf16.mxu0 %v5031_v45  ;;  %2276 = vmatprep.mubr.bf16.mxu1 %v5031_v45 }
 0x2ab   :  { %v1745_v51 = vpop.permute.xlu0 %1744  ;;  %v1749_v52 = vpop.permute.xlu1 %1748 }
 0x2ad   :  { %2084 = vmatmul.mubr.bf16.gmra.mrb[72].mxu0 %v5033_v18  ;;  %2277 = vmatmul.mubr.bf16.gmra.mrb[72].mxu1 %v5033_v18 }
 0x2ae   :  { %2093 = vmatprep.mubr.bf16.mxu0 %v5034_v6  ;;  %2286 = vmatprep.mubr.bf16.mxu1 %v5034_v6 }
 0x2af   :  { %v1753_v58 = vpop.permute.xlu1 %1752  ;;  %v1757_v7 = vpop.permute.xlu0 %1756 }
 0x2b5   :  { %2094 = vmatmul.mubr.bf16.gmra.mrb[76].mxu0 %v5036_v9  ;;  %2287 = vmatmul.mubr.bf16.gmra.mrb[76].mxu1 %v5036_v9 }
 0x2b6   :  { %2103 = vmatprep.mubr.bf16.mxu0 %v5037_v35  ;;  %2296 = vmatprep.mubr.bf16.mxu1 %v5037_v35 }
 0x2bd   :  { %2104 = vmatmul.mubr.bf16.gmra.mrb[80].mxu0 %v5039_v44  ;;  %2297 = vmatmul.mubr.bf16.gmra.mrb[80].mxu1 %v5039_v44 }
 0x2be   :  { %2113 = vmatprep.mubr.bf16.mxu0 %v5040_v21  ;;  %2306 = vmatprep.mubr.bf16.mxu1 %v5040_v21 }
 0x2c5   :  { %2114 = vmatmul.mubr.bf16.gmra.mrb[84].mxu0 %v5042_v39  ;;  %2307 = vmatmul.mubr.bf16.gmra.mrb[84].mxu1 %v5042_v39 }
 0x2c6   :  { %2123 = vmatprep.mubr.bf16.mxu0 %v5043_v55  ;;  %2316 = vmatprep.mubr.bf16.mxu1 %v5043_v55 }
 0x2cd   :  { %2124 = vmatmul.mubr.bf16.gmra.mrb[88].mxu0 %v5045_v3  ;;  %2317 = vmatmul.mubr.bf16.gmra.mrb[88].mxu1 %v5045_v3 }
 0x2ce   :  { %2133 = vmatprep.mubr.bf16.mxu0 %v5046_v48  ;;  %2326 = vmatprep.mubr.bf16.mxu1 %v5046_v48 }
 0x2d5   :  { %2134 = vmatmul.mubr.bf16.gmra.mrb[92].mxu0 %v5048_v0  ;;  %2327 = vmatmul.mubr.bf16.gmra.mrb[92].mxu1 %v5048_v0 }
 0x2d6   :  { %2143 = vmatprep.mubr.bf16.mxu0 %v5049_v17  ;;  %2336 = vmatprep.mubr.bf16.mxu1 %v5049_v17 }
 0x2dd   :  { %2144 = vmatmul.mubr.bf16.gmra.mrb[96].mxu0 %v5051_v25  ;;  %2337 = vmatmul.mubr.bf16.gmra.mrb[96].mxu1 %v5051_v25 }
 0x2de   :  { %2153 = vmatprep.mubr.bf16.mxu0 %v5052_v47  ;;  %2346 = vmatprep.mubr.bf16.mxu1 %v5052_v47 }
 0x2e5   :  { %2154 = vmatmul.mubr.bf16.gmra.mrb[100].mxu0 %v5054_v8  ;;  %2347 = vmatmul.mubr.bf16.gmra.mrb[100].mxu1 %v5054_v8 }
 0x2e6   :  { %2163 = vmatprep.mubr.bf16.mxu0 %v5055_v42  ;;  %2356 = vmatprep.mubr.bf16.mxu1 %v5055_v42 }
 0x2ed   :  { %2164 = vmatmul.mubr.bf16.gmra.mrb[104].mxu0 %v5057_v31  ;;  %2357 = vmatmul.mubr.bf16.gmra.mrb[104].mxu1 %v5057_v31 }
 0x2ee   :  { %2173 = vmatprep.mubr.bf16.mxu0 %v5058_v22  ;;  %2366 = vmatprep.mubr.bf16.mxu1 %v5058_v22 }
 0x2f5   :  { %2174 = vmatmul.mubr.bf16.gmra.mrb[108].mxu0 %v5060_v26  ;;  %2367 = vmatmul.mubr.bf16.gmra.mrb[108].mxu1 %v5060_v26 }
 0x2f6   :  { %2183 = vmatprep.mubr.bf16.mxu0 %v5061_v28  ;;  %2376 = vmatprep.mubr.bf16.mxu1 %v5061_v28 }
 0x2fd   :  { %2184 = vmatmul.mubr.bf16.gmra.mrb[112].mxu0 %v5063_v34  ;;  %2377 = vmatmul.mubr.bf16.gmra.mrb[112].mxu1 %v5063_v34  ;;  %v1765_v34 = vpop.permute.xlu0 %1764 }
 0x2fe   :  { %2193 = vmatprep.mubr.bf16.mxu0 %v5064_v40  ;;  %2386 = vmatprep.mubr.bf16.mxu1 %v5064_v40  ;;  %v1761_v40 = vpop.permute.xlu1 %1760 }
 0x305   :  { %2194 = vmatmul.mubr.bf16.gmra.mrb[116].mxu0 %v5066_v27  ;;  %2387 = vmatmul.mubr.bf16.gmra.mrb[116].mxu1 %v5066_v27 }
 0x306   :  { %2203 = vmatprep.mubr.bf16.mxu0 %v5067_v49  ;;  %2396 = vmatprep.mubr.bf16.mxu1 %v5067_v49 }
 0x30d   :  { %2204 = vmatmul.mubr.bf16.gmra.mrb[120].mxu0 %v5069_v13  ;;  %2397 = vmatmul.mubr.bf16.gmra.mrb[120].mxu1 %v5069_v13 }
 0x30e   :  { %2213 = vmatprep.mubr.bf16.mxu0 %v5070_v50  ;;  %2406 = vmatprep.mubr.bf16.mxu1 %v5070_v50 }
 0x315   :  { %2214 = vmatmul.mubr.bf16.gmra.mrb[124].mxu0 %v5072_v29  ;;  %2407 = vmatmul.mubr.bf16.gmra.mrb[124].mxu1 %v5072_v29 }
 0x316   :  { %2961 = vmatprep.mubr.bf16.mxu0 %v5075_v57  ;;  %3154 = vmatprep.mubr.bf16.mxu1 %v5075_v57 }
 0x370   :  { %v2065_v15 = vpop.f32.mrb[64].mxu0  ;;  %v2258_v32 = vpop.f32.mrb[64].mxu1 }
 0x371   :  { %v2066_v59 = vadd.f32 %v2065_v15, %v1745_v51  ;;  %v2259_v60 = vadd.f32 %v2258_v32, %v1745_v51  ;;  %v2067_v37 = vpop.f32.mrb[65].mxu0  ;;  %v2260_v24 = vpop.f32.mrb[65].mxu1 }
 0x372   :  { %v2068_v23 = vadd.f32 %v2067_v37, %v1745_v51  ;;  %v2261_v38 = vadd.f32 %v2260_v24, %v1745_v51  ;;  %v2069_v14 = vpop.f32.mrb[66].mxu0  ;;  %v2262_v61 = vpop.f32.mrb[66].mxu1 }
 0x373   :  { %v2070_v56 = vadd.f32 %v2069_v14, %v1749_v52  ;;  %v2263_v5 = vadd.f32 %v2262_v61, %v1749_v52  ;;  %v2071_v43 = vpop.f32.mrb[67].mxu0  ;;  %v2264_v30 = vpop.f32.mrb[67].mxu1  ;;  %v2417_v12 = vmax.f32 %v2066_v59, 0.0  ;;  %v2419_v54 = vmax.f32 %v2259_v60, 0.0 }
 0x374   :  { %v2072_v46 = vadd.f32 %v2071_v43, %v1749_v52  ;;  %v2265_v62 = vadd.f32 %v2264_v30, %v1749_v52  ;;  %v2418_v53 = vmax.f32 %v2068_v23, 0.0  ;;  %v2420_v4 = vmax.f32 %v2261_v38, 0.0 }
 0x375   :  { %v2421_v2 = vmax.f32 %v2070_v56, 0.0  ;;  %v2423_v11 = vmax.f32 %v2263_v5, 0.0 }
 0x376   :  { %v2422_v41 = vmax.f32 %v2072_v46, 0.0  ;;  %v2424_v63 = vmax.f32 %v2265_v62, 0.0 }
 0x377   :  { %v2577_v1 = vpack.c.bf16 %v2421_v2, %v2417_v12  ;;  %v2579_v16 = vpack.c.bf16 %v2423_v11, %v2419_v54 }
 0x378   :  { %v2578_v20 = vpack.c.bf16 %v2422_v41, %v2418_v53  ;;  %v2580_v19 = vpack.c.bf16 %v2424_v63, %v2420_v4  ;;  %v2075_v10 = vpop.f32.mrb[68].mxu0  ;;  %v2268_v33 = vpop.f32.mrb[68].mxu1  ;;  %v5282_v63 = vmov 4  }
 0x379   :  { %v2076_v36 = vadd.f32 %v2075_v10, %v1753_v58  ;;  %v2269_v45 = vadd.f32 %v2268_v33, %v1753_v58  ;;  %v2077_v18 = vpop.f32.mrb[69].mxu0  ;;  %v2270_v6 = vpop.f32.mrb[69].mxu1  ;;  %4966 = vset.pattern.permute.xlu1 %v5282_v63  ;;  %4967 = vset.pattern.permute.xlu0 %v5282_v63  ;;  %v5215_v10 = vld [vmem:[%s6811_s1 + $0x8] sm:$0xff] }
 0x37a   :  { %v2078_v9 = vadd.f32 %v2077_v18, %v1753_v58  ;;  %v2271_v35 = vadd.f32 %v2270_v6, %v1753_v58  ;;  %v2079_v44 = vpop.f32.mrb[70].mxu0  ;;  %v2272_v21 = vpop.f32.mrb[70].mxu1  ;;  %2929 = vmatprep.subr.bf16.mxu0 %v2578_v20  ;;  %3122 = vmatprep.subr.bf16.mxu1 %v2580_v19  ;;  %v5214_v19 = vld [vmem:[%s6811_s1] sm:$0xff] }
 0x37b   :  { %v2080_v39 = vadd.f32 %v2079_v44, %v1757_v7  ;;  %v2273_v55 = vadd.f32 %v2272_v21, %v1757_v7  ;;  %v2081_v3 = vpop.f32.mrb[71].mxu0  ;;  %v2274_v48 = vpop.f32.mrb[71].mxu1  ;;  %2930 = vmatpush1.bf16.msra.mxu0 %v2577_v1  ;;  %3123 = vmatpush1.bf16.msra.mxu1 %v2579_v16  ;;  %v2425_v0 = vmax.f32 %v2076_v36, 0.0  ;;  %v2427_v47 = vmax.f32 %v2269_v45, 0.0 }
 0x37c   :  { %v2082_v17 = vadd.f32 %v2081_v3, %v1757_v7  ;;  %v2275_v25 = vadd.f32 %v2274_v48, %v1757_v7  ;;  %v2426_v31 = vmax.f32 %v2078_v9, 0.0  ;;  %v2428_v22 = vmax.f32 %v2271_v35, 0.0  ;;  %v1773_v58 = vpop.permute.xlu0 %1772  ;;  %v1769_v53 = vpop.permute.xlu1 %1768  ;;  %2642 = vperm.xlu1 %4966, %v5214_v19   ;;  %2646 = vperm.xlu0 %4967, %v5215_v10  }
 0x37d   :  { %v2429_v8 = vmax.f32 %v2080_v39, 0.0  ;;  %v2431_v42 = vmax.f32 %v2273_v55, 0.0 }
 0x37e   :  { %v2430_v26 = vmax.f32 %v2082_v17, 0.0  ;;  %v2432_v28 = vmax.f32 %v2275_v25, 0.0  ;;  %v5216_v17 = vld [vmem:[%s6811_s1 + $0x10] sm:$0xff]  ;;  %v5217_v25 = vld [vmem:[%s6811_s1 + $0x20] sm:$0xff] }
 0x37f   :  { %v2581_v27 = vpack.c.bf16 %v2429_v8, %v2425_v0  ;;  %v2583_v49 = vpack.c.bf16 %v2431_v42, %v2427_v47 }
 0x380   :  { %v2582_v13 = vpack.c.bf16 %v2430_v26, %v2426_v31  ;;  %v2584_v50 = vpack.c.bf16 %v2432_v28, %v2428_v22  ;;  %v2085_v29 = vpop.f32.mrb[72].mxu0  ;;  %v2278_v51 = vpop.f32.mrb[72].mxu1  ;;  %2650 = vperm.xlu1 %4966, %v5216_v17   ;;  %2658 = vperm.xlu0 %4967, %v5217_v25  }
 0x381   :  { %v2086_v52 = vadd.f32 %v2085_v29, %v1761_v40  ;;  %v2279_v15 = vadd.f32 %v2278_v51, %v1761_v40  ;;  %v2087_v32 = vpop.f32.mrb[73].mxu0  ;;  %v2280_v59 = vpop.f32.mrb[73].mxu1 }
 0x382   :  { %v2088_v60 = vadd.f32 %v2087_v32, %v1761_v40  ;;  %v2281_v37 = vadd.f32 %v2280_v59, %v1761_v40  ;;  %v2089_v24 = vpop.f32.mrb[74].mxu0  ;;  %v2282_v23 = vpop.f32.mrb[74].mxu1  ;;  %2931 = vmatprep.subr.bf16.mxu0 %v2582_v13  ;;  %3124 = vmatprep.subr.bf16.mxu1 %v2584_v50  ;;  %v5219_v32 = vld [vmem:[%s6811_s1 + $0x30] sm:$0xff] }
 0x383   :  { %v2090_v38 = vadd.f32 %v2089_v24, %v1765_v34  ;;  %v2283_v14 = vadd.f32 %v2282_v23, %v1765_v34  ;;  %v2091_v61 = vpop.f32.mrb[75].mxu0  ;;  %v2284_v56 = vpop.f32.mrb[75].mxu1  ;;  %2932 = vmatpush1.bf16.msra.mxu0 %v2581_v27  ;;  %3125 = vmatpush1.bf16.msra.mxu1 %v2583_v49  ;;  %v2433_v5 = vmax.f32 %v2086_v52, 0.0  ;;  %v2435_v12 = vmax.f32 %v2279_v15, 0.0  ;;  %v5218_v15 = vld [vmem:[%s6811_s1 + $0x18] sm:$0xff] }
 0x384   :  { %v2092_v43 = vadd.f32 %v2091_v61, %v1765_v34  ;;  %v2285_v30 = vadd.f32 %v2284_v56, %v1765_v34  ;;  %v2434_v54 = vmax.f32 %v2088_v60, 0.0  ;;  %v2436_v2 = vmax.f32 %v2281_v37, 0.0  ;;  %v1781_v40 = vpop.permute.xlu0 %1780  ;;  %v1777_v27 = vpop.permute.xlu1 %1776  ;;  %2654 = vperm.xlu1 %4966, %v5218_v15   ;;  %2666 = vperm.xlu0 %4967, %v5219_v32  }
 0x385   :  { %v2437_v46 = vmax.f32 %v2090_v38, 0.0  ;;  %v2439_v62 = vmax.f32 %v2283_v14, 0.0 }
 0x386   :  { %v2438_v11 = vmax.f32 %v2092_v43, 0.0  ;;  %v2440_v57 = vmax.f32 %v2285_v30, 0.0 }
 0x387   :  { %v2585_v4 = vpack.c.bf16 %v2437_v46, %v2433_v5  ;;  %v2587_v41 = vpack.c.bf16 %v2439_v62, %v2435_v12  ;;  %v5220_v46 = vld [vmem:[%s6811_s1 + $0x28] sm:$0xff]  ;;  %v5221_v62 = vld [vmem:[%s6811_s1 + $0x40] sm:$0xff] }
 0x388   :  { %v2586_v7 = vpack.c.bf16 %v2438_v11, %v2434_v54  ;;  %v2588_v1 = vpack.c.bf16 %v2440_v57, %v2436_v2  ;;  %v2095_v16 = vpop.f32.mrb[76].mxu0  ;;  %v2288_v20 = vpop.f32.mrb[76].mxu1  ;;  %2662 = vperm.xlu1 %4966, %v5220_v46   ;;  %2674 = vperm.xlu0 %4967, %v5221_v62  }
 0x389   :  { %v2096_v33 = vadd.f32 %v2095_v16, %v1769_v53  ;;  %v2289_v36 = vadd.f32 %v2288_v20, %v1769_v53  ;;  %v2097_v45 = vpop.f32.mrb[77].mxu0  ;;  %v2290_v18 = vpop.f32.mrb[77].mxu1 }
 0x38a   :  { %v2098_v6 = vadd.f32 %v2097_v45, %v1769_v53  ;;  %v2291_v9 = vadd.f32 %v2290_v18, %v1769_v53  ;;  %v2099_v35 = vpop.f32.mrb[78].mxu0  ;;  %v2292_v44 = vpop.f32.mrb[78].mxu1  ;;  %2933 = vmatprep.subr.bf16.mxu0 %v2586_v7  ;;  %3126 = vmatprep.subr.bf16.mxu1 %v2588_v1  ;;  %v5222_v45 = vld [vmem:[%s6811_s1 + $0x38] sm:$0xff]  ;;  %v5223_v18 = vld [vmem:[%s6811_s1 + $0x50] sm:$0xff] }
 0x38b   :  { %v2100_v21 = vadd.f32 %v2099_v35, %v1773_v58  ;;  %v2293_v39 = vadd.f32 %v2292_v44, %v1773_v58  ;;  %v2101_v55 = vpop.f32.mrb[79].mxu0  ;;  %v2294_v3 = vpop.f32.mrb[79].mxu1  ;;  %2934 = vmatpush1.bf16.msra.mxu0 %v2585_v4  ;;  %3127 = vmatpush1.bf16.msra.mxu1 %v2587_v41  ;;  %v2441_v47 = vmax.f32 %v2096_v33, 0.0  ;;  %v2443_v8 = vmax.f32 %v2289_v36, 0.0 }
 0x38c   :  { %v2102_v48 = vadd.f32 %v2101_v55, %v1773_v58  ;;  %v2295_v0 = vadd.f32 %v2294_v3, %v1773_v58  ;;  %v2442_v22 = vmax.f32 %v2098_v6, 0.0  ;;  %v2444_v26 = vmax.f32 %v2291_v9, 0.0  ;;  %v1789_v7 = vpop.permute.xlu0 %1788  ;;  %v1785_v1 = vpop.permute.xlu1 %1784  ;;  %2670 = vperm.xlu1 %4966, %v5222_v45   ;;  %2682 = vperm.xlu0 %4967, %v5223_v18  }
 0x38d   :  { %v2445_v42 = vmax.f32 %v2100_v21, 0.0  ;;  %v2447_v31 = vmax.f32 %v2293_v39, 0.0 }
 0x38e   :  { %v2446_v28 = vmax.f32 %v2102_v48, 0.0  ;;  %v2448_v34 = vmax.f32 %v2295_v0, 0.0 }
 0x38f   :  { %v2589_v49 = vpack.c.bf16 %v2445_v42, %v2441_v47  ;;  %v2591_v13 = vpack.c.bf16 %v2447_v31, %v2443_v8  ;;  %v5224_v42 = vld [vmem:[%s6811_s1 + $0x48] sm:$0xff]  ;;  %v5225_v31 = vld [vmem:[%s6811_s1 + $0x60] sm:$0xff] }
 0x390   :  { %v2590_v50 = vpack.c.bf16 %v2446_v28, %v2442_v22  ;;  %v2592_v29 = vpack.c.bf16 %v2448_v34, %v2444_v26  ;;  %v2105_v51 = vpop.f32.mrb[80].mxu0  ;;  %v2298_v52 = vpop.f32.mrb[80].mxu1  ;;  %2678 = vperm.xlu1 %4966, %v5224_v42   ;;  %2690 = vperm.xlu0 %4967, %v5225_v31  }
 0x391   :  { %v2106_v59 = vadd.f32 %v2105_v51, %v1777_v27  ;;  %v2299_v60 = vadd.f32 %v2298_v52, %v1777_v27  ;;  %v2107_v37 = vpop.f32.mrb[81].mxu0  ;;  %v2300_v24 = vpop.f32.mrb[81].mxu1 }
 0x392   :  { %v2108_v23 = vadd.f32 %v2107_v37, %v1777_v27  ;;  %v2301_v38 = vadd.f32 %v2300_v24, %v1777_v27  ;;  %v2109_v14 = vpop.f32.mrb[82].mxu0  ;;  %v2302_v61 = vpop.f32.mrb[82].mxu1  ;;  %2935 = vmatprep.subr.bf16.mxu0 %v2590_v50  ;;  %3128 = vmatprep.subr.bf16.mxu1 %v2592_v29  ;;  %v5226_v37 = vld [vmem:[%s6811_s1 + $0x58] sm:$0xff]  ;;  %v5227_v24 = vld [vmem:[%s6811_s1 + $0x70] sm:$0xff] }
 0x393   :  { %v2110_v56 = vadd.f32 %v2109_v14, %v1781_v40  ;;  %v2303_v5 = vadd.f32 %v2302_v61, %v1781_v40  ;;  %v2111_v43 = vpop.f32.mrb[83].mxu0  ;;  %v2304_v30 = vpop.f32.mrb[83].mxu1  ;;  %2936 = vmatpush1.bf16.msra.mxu0 %v2589_v49  ;;  %3129 = vmatpush1.bf16.msra.mxu1 %v2591_v13  ;;  %v2449_v2 = vmax.f32 %v2106_v59, 0.0  ;;  %v2451_v11 = vmax.f32 %v2299_v60, 0.0 }
 0x394   :  { %v2112_v12 = vadd.f32 %v2111_v43, %v1781_v40  ;;  %v2305_v54 = vadd.f32 %v2304_v30, %v1781_v40  ;;  %v2450_v53 = vmax.f32 %v2108_v23, 0.0  ;;  %v2452_v4 = vmax.f32 %v2301_v38, 0.0  ;;  %v1797_v50 = vpop.permute.xlu0 %1796  ;;  %v1793_v29 = vpop.permute.xlu1 %1792  ;;  %2686 = vperm.xlu1 %4966, %v5226_v37   ;;  %2698 = vperm.xlu0 %4967, %v5227_v24  }
 0x395   :  { %v2453_v57 = vmax.f32 %v2110_v56, 0.0  ;;  %v2455_v58 = vmax.f32 %v2303_v5, 0.0 }
 0x396   :  { %v2454_v41 = vmax.f32 %v2112_v12, 0.0  ;;  %v2456_v63 = vmax.f32 %v2305_v54, 0.0 }
 0x397   :  { %v2593_v16 = vpack.c.bf16 %v2453_v57, %v2449_v2  ;;  %v2595_v20 = vpack.c.bf16 %v2455_v58, %v2451_v11  ;;  %v5228_v57 = vld [vmem:[%s6811_s1 + $0x68] sm:$0xff]  ;;  %v5229_v58 = vld [vmem:[%s6811_s1 + $0x80] sm:$0xff] }
 0x398   :  { %v2594_v19 = vpack.c.bf16 %v2454_v41, %v2450_v53  ;;  %v2596_v10 = vpack.c.bf16 %v2456_v63, %v2452_v4  ;;  %v2115_v33 = vpop.f32.mrb[84].mxu0  ;;  %v2308_v36 = vpop.f32.mrb[84].mxu1  ;;  %2694 = vperm.xlu1 %4966, %v5228_v57   ;;  %2706 = vperm.xlu0 %4967, %v5229_v58  }
 0x399   :  { %v2116_v6 = vadd.f32 %v2115_v33, %v1785_v1  ;;  %v2309_v9 = vadd.f32 %v2308_v36, %v1785_v1  ;;  %v2117_v35 = vpop.f32.mrb[85].mxu0  ;;  %v2310_v44 = vpop.f32.mrb[85].mxu1 }
 0x39a   :  { %v2118_v21 = vadd.f32 %v2117_v35, %v1785_v1  ;;  %v2311_v39 = vadd.f32 %v2310_v44, %v1785_v1  ;;  %v2119_v55 = vpop.f32.mrb[86].mxu0  ;;  %v2312_v3 = vpop.f32.mrb[86].mxu1  ;;  %2937 = vmatprep.subr.bf16.mxu0 %v2594_v19  ;;  %3130 = vmatprep.subr.bf16.mxu1 %v2596_v10  ;;  %v5230_v35 = vld [vmem:[%s6811_s1 + $0x78] sm:$0xff]  ;;  %v5231_v44 = vld [vmem:[%s6811_s1 + $0x90] sm:$0xff] }
 0x39b   :  { %v2120_v48 = vadd.f32 %v2119_v55, %v1789_v7  ;;  %v2313_v0 = vadd.f32 %v2312_v3, %v1789_v7  ;;  %v2121_v17 = vpop.f32.mrb[87].mxu0  ;;  %v2314_v25 = vpop.f32.mrb[87].mxu1  ;;  %2938 = vmatpush1.bf16.msra.mxu0 %v2593_v16  ;;  %3131 = vmatpush1.bf16.msra.mxu1 %v2595_v20  ;;  %v2457_v22 = vmax.f32 %v2116_v6, 0.0  ;;  %v2459_v26 = vmax.f32 %v2309_v9, 0.0 }
 0x39c   :  { %v2122_v47 = vadd.f32 %v2121_v17, %v1789_v7  ;;  %v2315_v8 = vadd.f32 %v2314_v25, %v1789_v7  ;;  %v2458_v40 = vmax.f32 %v2118_v21, 0.0  ;;  %v2460_v27 = vmax.f32 %v2311_v39, 0.0  ;;  %v1805_v19 = vpop.permute.xlu0 %1804  ;;  %v1801_v10 = vpop.permute.xlu1 %1800  ;;  %2702 = vperm.xlu1 %4966, %v5230_v35   ;;  %2714 = vperm.xlu0 %4967, %v5231_v44  }
 0x39d   :  { %v2461_v28 = vmax.f32 %v2120_v48, 0.0  ;;  %v2463_v34 = vmax.f32 %v2313_v0, 0.0 }
 0x39e   :  { %v2462_v49 = vmax.f32 %v2122_v47, 0.0  ;;  %v2464_v13 = vmax.f32 %v2315_v8, 0.0 }
 0x39f   :  { %v2597_v51 = vpack.c.bf16 %v2461_v28, %v2457_v22  ;;  %v2599_v52 = vpack.c.bf16 %v2463_v34, %v2459_v26  ;;  %v5232_v28 = vld [vmem:[%s6811_s1 + $0x88] sm:$0xff]  ;;  %v5233_v34 = vld [vmem:[%s6811_s1 + $0xa0] sm:$0xff] }
 0x3a0   :  { %v2598_v15 = vpack.c.bf16 %v2462_v49, %v2458_v40  ;;  %v2600_v32 = vpack.c.bf16 %v2464_v13, %v2460_v27  ;;  %v2125_v59 = vpop.f32.mrb[88].mxu0  ;;  %v2318_v60 = vpop.f32.mrb[88].mxu1  ;;  %2710 = vperm.xlu1 %4966, %v5232_v28   ;;  %2722 = vperm.xlu0 %4967, %v5233_v34  }
 0x3a1   :  { %v2126_v23 = vadd.f32 %v2125_v59, %v1793_v29  ;;  %v2319_v38 = vadd.f32 %v2318_v60, %v1793_v29  ;;  %v2127_v14 = vpop.f32.mrb[89].mxu0  ;;  %v2320_v61 = vpop.f32.mrb[89].mxu1 }
 0x3a2   :  { %v2128_v56 = vadd.f32 %v2127_v14, %v1793_v29  ;;  %v2321_v5 = vadd.f32 %v2320_v61, %v1793_v29  ;;  %v2129_v43 = vpop.f32.mrb[90].mxu0  ;;  %v2322_v30 = vpop.f32.mrb[90].mxu1  ;;  %2939 = vmatprep.subr.bf16.mxu0 %v2598_v15  ;;  %3132 = vmatprep.subr.bf16.mxu1 %v2600_v32  ;;  %v5234_v14 = vld [vmem:[%s6811_s1 + $0x98] sm:$0xff]  ;;  %v5235_v61 = vld [vmem:[%s6811_s1 + $0xb0] sm:$0xff] }
 0x3a3   :  { %v2130_v12 = vadd.f32 %v2129_v43, %v1797_v50  ;;  %v2323_v54 = vadd.f32 %v2322_v30, %v1797_v50  ;;  %v2131_v46 = vpop.f32.mrb[91].mxu0  ;;  %v2324_v62 = vpop.f32.mrb[91].mxu1  ;;  %2940 = vmatpush1.bf16.msra.mxu0 %v2597_v51  ;;  %3133 = vmatpush1.bf16.msra.mxu1 %v2599_v52  ;;  %v2465_v53 = vmax.f32 %v2126_v23, 0.0  ;;  %v2467_v4 = vmax.f32 %v2319_v38, 0.0 }
 0x3a4   :  { %v2132_v2 = vadd.f32 %v2131_v46, %v1797_v50  ;;  %v2325_v11 = vadd.f32 %v2324_v62, %v1797_v50  ;;  %v2466_v7 = vmax.f32 %v2128_v56, 0.0  ;;  %v2468_v1 = vmax.f32 %v2321_v5, 0.0  ;;  %v1813_v15 = vpop.permute.xlu0 %1812  ;;  %v1809_v32 = vpop.permute.xlu1 %1808  ;;  %2718 = vperm.xlu1 %4966, %v5234_v14   ;;  %2730 = vperm.xlu0 %4967, %v5235_v61  }
 0x3a5   :  { %v2469_v41 = vmax.f32 %v2130_v12, 0.0  ;;  %v2471_v63 = vmax.f32 %v2323_v54, 0.0 }
 0x3a6   :  { %v2470_v16 = vmax.f32 %v2132_v2, 0.0  ;;  %v2472_v20 = vmax.f32 %v2325_v11, 0.0 }
 0x3a7   :  { %v2601_v33 = vpack.c.bf16 %v2469_v41, %v2465_v53  ;;  %v2603_v36 = vpack.c.bf16 %v2471_v63, %v2467_v4  ;;  %v5236_v41 = vld [vmem:[%s6811_s1 + $0xa8] sm:$0xff]  ;;  %v5237_v63 = vld [vmem:[%s6811_s1 + $0xc0] sm:$0xff] }
 0x3a8   :  { %v2602_v45 = vpack.c.bf16 %v2470_v16, %v2466_v7  ;;  %v2604_v18 = vpack.c.bf16 %v2472_v20, %v2468_v1  ;;  %v2135_v6 = vpop.f32.mrb[92].mxu0  ;;  %v2328_v9 = vpop.f32.mrb[92].mxu1  ;;  %2726 = vperm.xlu1 %4966, %v5236_v41   ;;  %2738 = vperm.xlu0 %4967, %v5237_v63  }
 0x3a9   :  { %v2136_v21 = vadd.f32 %v2135_v6, %v1801_v10  ;;  %v2329_v39 = vadd.f32 %v2328_v9, %v1801_v10  ;;  %v2137_v55 = vpop.f32.mrb[93].mxu0  ;;  %v2330_v3 = vpop.f32.mrb[93].mxu1 }
 0x3aa   :  { %v2138_v48 = vadd.f32 %v2137_v55, %v1801_v10  ;;  %v2331_v0 = vadd.f32 %v2330_v3, %v1801_v10  ;;  %v2139_v17 = vpop.f32.mrb[94].mxu0  ;;  %v2332_v25 = vpop.f32.mrb[94].mxu1  ;;  %2941 = vmatprep.subr.bf16.mxu0 %v2602_v45  ;;  %3134 = vmatprep.subr.bf16.mxu1 %v2604_v18  ;;  %v5238_v55 = vld [vmem:[%s6811_s1 + $0xb8] sm:$0xff]  ;;  %v5239_v3 = vld [vmem:[%s6811_s1 + $0xd0] sm:$0xff] }
 0x3ab   :  { %v2140_v47 = vadd.f32 %v2139_v17, %v1805_v19  ;;  %v2333_v8 = vadd.f32 %v2332_v25, %v1805_v19  ;;  %v2141_v42 = vpop.f32.mrb[95].mxu0  ;;  %v2334_v31 = vpop.f32.mrb[95].mxu1  ;;  %2942 = vmatpush1.bf16.msra.mxu0 %v2601_v33  ;;  %3135 = vmatpush1.bf16.msra.mxu1 %v2603_v36  ;;  %v2473_v40 = vmax.f32 %v2136_v21, 0.0  ;;  %v2475_v27 = vmax.f32 %v2329_v39, 0.0 }
 0x3ac   :  { %v2142_v22 = vadd.f32 %v2141_v42, %v1805_v19  ;;  %v2335_v26 = vadd.f32 %v2334_v31, %v1805_v19  ;;  %v2474_v50 = vmax.f32 %v2138_v48, 0.0  ;;  %v2476_v29 = vmax.f32 %v2331_v0, 0.0  ;;  %v1821_v45 = vpop.permute.xlu0 %1820  ;;  %v1817_v18 = vpop.permute.xlu1 %1816  ;;  %2734 = vperm.xlu1 %4966, %v5238_v55   ;;  %2746 = vperm.xlu0 %4967, %v5239_v3  }
 0x3ad   :  { %v2477_v49 = vmax.f32 %v2140_v47, 0.0  ;;  %v2479_v13 = vmax.f32 %v2333_v8, 0.0 }
 0x3ae   :  { %v2478_v51 = vmax.f32 %v2142_v22, 0.0  ;;  %v2480_v52 = vmax.f32 %v2335_v26, 0.0 }
 0x3af   :  { %v2605_v59 = vpack.c.bf16 %v2477_v49, %v2473_v40  ;;  %v2607_v60 = vpack.c.bf16 %v2479_v13, %v2475_v27  ;;  %v5240_v49 = vld [vmem:[%s6811_s1 + $0xc8] sm:$0xff]  ;;  %v5241_v13 = vld [vmem:[%s6811_s1 + $0xe0] sm:$0xff] }
 0x3b0   :  { %v2606_v37 = vpack.c.bf16 %v2478_v51, %v2474_v50  ;;  %v2608_v24 = vpack.c.bf16 %v2480_v52, %v2476_v29  ;;  %v2145_v23 = vpop.f32.mrb[96].mxu0  ;;  %v2338_v38 = vpop.f32.mrb[96].mxu1  ;;  %2742 = vperm.xlu1 %4966, %v5240_v49   ;;  %2754 = vperm.xlu0 %4967, %v5241_v13  }
 0x3b1   :  { %v2146_v56 = vadd.f32 %v2145_v23, %v1809_v32  ;;  %v2339_v5 = vadd.f32 %v2338_v38, %v1809_v32  ;;  %v2147_v43 = vpop.f32.mrb[97].mxu0  ;;  %v2340_v30 = vpop.f32.mrb[97].mxu1 }
 0x3b2   :  { %v2148_v12 = vadd.f32 %v2147_v43, %v1809_v32  ;;  %v2341_v54 = vadd.f32 %v2340_v30, %v1809_v32  ;;  %v2149_v46 = vpop.f32.mrb[98].mxu0  ;;  %v2342_v62 = vpop.f32.mrb[98].mxu1  ;;  %2943 = vmatprep.subr.bf16.mxu0 %v2606_v37  ;;  %3136 = vmatprep.subr.bf16.mxu1 %v2608_v24  ;;  %v5242_v43 = vld [vmem:[%s6811_s1 + $0xd8] sm:$0xff]  ;;  %v5243_v30 = vld [vmem:[%s6811_s1 + $0xf0] sm:$0xff] }
 0x3b3   :  { %v2150_v2 = vadd.f32 %v2149_v46, %v1813_v15  ;;  %v2343_v11 = vadd.f32 %v2342_v62, %v1813_v15  ;;  %v2151_v57 = vpop.f32.mrb[99].mxu0  ;;  %v2344_v58 = vpop.f32.mrb[99].mxu1  ;;  %2944 = vmatpush1.bf16.msra.mxu0 %v2605_v59  ;;  %3137 = vmatpush1.bf16.msra.mxu1 %v2607_v60  ;;  %v2481_v7 = vmax.f32 %v2146_v56, 0.0  ;;  %v2483_v1 = vmax.f32 %v2339_v5, 0.0 }
 0x3b4   :  { %v2152_v53 = vadd.f32 %v2151_v57, %v1813_v15  ;;  %v2345_v4 = vadd.f32 %v2344_v58, %v1813_v15  ;;  %v2482_v19 = vmax.f32 %v2148_v12, 0.0  ;;  %v2484_v10 = vmax.f32 %v2341_v54, 0.0  ;;  %v1829_v37 = vpop.permute.xlu0 %1828  ;;  %v1825_v24 = vpop.permute.xlu1 %1824  ;;  %2750 = vperm.xlu1 %4966, %v5242_v43   ;;  %2762 = vperm.xlu0 %4967, %v5243_v30  }
 0x3b5   :  { %v2485_v16 = vmax.f32 %v2150_v2, 0.0  ;;  %v2487_v20 = vmax.f32 %v2343_v11, 0.0 }
 0x3b6   :  { %v2486_v33 = vmax.f32 %v2152_v53, 0.0  ;;  %v2488_v36 = vmax.f32 %v2345_v4, 0.0 }
 0x3b7   :  { %v2609_v6 = vpack.c.bf16 %v2485_v16, %v2481_v7  ;;  %v2611_v9 = vpack.c.bf16 %v2487_v20, %v2483_v1  ;;  %v5244_v16 = vld [vmem:[%s6811_s1 + $0xe8] sm:$0xff] }
 0x3b8   :  { %v2610_v35 = vpack.c.bf16 %v2486_v33, %v2482_v19  ;;  %v2612_v44 = vpack.c.bf16 %v2488_v36, %v2484_v10  ;;  %v2155_v21 = vpop.f32.mrb[100].mxu0  ;;  %v2348_v39 = vpop.f32.mrb[100].mxu1  ;;  %2758 = vperm.xlu1 %4966, %v5244_v16  }
 0x3b9   :  { %v2156_v48 = vadd.f32 %v2155_v21, %v1817_v18  ;;  %v2349_v0 = vadd.f32 %v2348_v39, %v1817_v18  ;;  %v2157_v17 = vpop.f32.mrb[101].mxu0  ;;  %v2350_v25 = vpop.f32.mrb[101].mxu1 }
 0x3ba   :  { %v2158_v47 = vadd.f32 %v2157_v17, %v1817_v18  ;;  %v2351_v8 = vadd.f32 %v2350_v25, %v1817_v18  ;;  %v2159_v42 = vpop.f32.mrb[102].mxu0  ;;  %v2352_v31 = vpop.f32.mrb[102].mxu1  ;;  %2945 = vmatprep.subr.bf16.mxu0 %v2610_v35  ;;  %3138 = vmatprep.subr.bf16.mxu1 %v2612_v44 }
 0x3bb   :  { %v2160_v22 = vadd.f32 %v2159_v42, %v1821_v45  ;;  %v2353_v26 = vadd.f32 %v2352_v31, %v1821_v45  ;;  %v2161_v28 = vpop.f32.mrb[103].mxu0  ;;  %v2354_v34 = vpop.f32.mrb[103].mxu1  ;;  %2946 = vmatpush1.bf16.msra.mxu0 %v2609_v6  ;;  %3139 = vmatpush1.bf16.msra.mxu1 %v2611_v9  ;;  %v2489_v50 = vmax.f32 %v2156_v48, 0.0  ;;  %v2491_v29 = vmax.f32 %v2349_v0, 0.0  ;;  %v5245_v0 = vld [vmem:[%s6811_s1 + $0xf8] sm:$0xff] }
 0x3bc   :  { %v2162_v40 = vadd.f32 %v2161_v28, %v1821_v45  ;;  %v2355_v27 = vadd.f32 %v2354_v34, %v1821_v45  ;;  %v2490_v15 = vmax.f32 %v2158_v47, 0.0  ;;  %v2492_v32 = vmax.f32 %v2351_v8, 0.0  ;;  %v1837_v9 = vpop.permute.xlu0 %1836  ;;  %v1833_v35 = vpop.permute.xlu1 %1832  ;;  %2766 = vperm.xlu1 %4966, %v5245_v0  }
 0x3bd   :  { %v2493_v51 = vmax.f32 %v2160_v22, 0.0  ;;  %v2495_v52 = vmax.f32 %v2353_v26, 0.0 }
 0x3be   :  { %v2494_v59 = vmax.f32 %v2162_v40, 0.0  ;;  %v2496_v60 = vmax.f32 %v2355_v27, 0.0 }
 0x3bf   :  { %v2613_v23 = vpack.c.bf16 %v2493_v51, %v2489_v50  ;;  %v2615_v38 = vpack.c.bf16 %v2495_v52, %v2491_v29 }
 0x3c0   :  { %v2614_v14 = vpack.c.bf16 %v2494_v59, %v2490_v15  ;;  %v2616_v61 = vpack.c.bf16 %v2496_v60, %v2492_v32  ;;  %v2165_v56 = vpop.f32.mrb[104].mxu0  ;;  %v2358_v5 = vpop.f32.mrb[104].mxu1 }
 0x3c1   :  { %v2166_v12 = vadd.f32 %v2165_v56, %v1825_v24  ;;  %v2359_v54 = vadd.f32 %v2358_v5, %v1825_v24  ;;  %v2167_v46 = vpop.f32.mrb[105].mxu0  ;;  %v2360_v62 = vpop.f32.mrb[105].mxu1 }
 0x3c2   :  { %v2168_v2 = vadd.f32 %v2167_v46, %v1825_v24  ;;  %v2361_v11 = vadd.f32 %v2360_v62, %v1825_v24  ;;  %v2169_v57 = vpop.f32.mrb[106].mxu0  ;;  %v2362_v58 = vpop.f32.mrb[106].mxu1  ;;  %2947 = vmatprep.subr.bf16.mxu0 %v2614_v14  ;;  %3140 = vmatprep.subr.bf16.mxu1 %v2616_v61 }
 0x3c3   :  { %v2170_v53 = vadd.f32 %v2169_v57, %v1829_v37  ;;  %v2363_v4 = vadd.f32 %v2362_v58, %v1829_v37  ;;  %v2171_v41 = vpop.f32.mrb[107].mxu0  ;;  %v2364_v63 = vpop.f32.mrb[107].mxu1  ;;  %2948 = vmatpush1.bf16.msra.mxu0 %v2613_v23  ;;  %3141 = vmatpush1.bf16.msra.mxu1 %v2615_v38  ;;  %v2497_v20 = vmax.f32 %v2166_v12, 0.0  ;;  %v2499_v19 = vmax.f32 %v2359_v54, 0.0 }
 0x3c4   :  { %v2172_v7 = vadd.f32 %v2171_v41, %v1829_v37  ;;  %v2365_v1 = vadd.f32 %v2364_v63, %v1829_v37  ;;  %v2498_v36 = vmax.f32 %v2168_v2, 0.0  ;;  %v2500_v45 = vmax.f32 %v2361_v11, 0.0  ;;  %v1845_v37 = vpop.permute.xlu0 %1844  ;;  %v1841_v24 = vpop.permute.xlu1 %1840 }
 0x3c5   :  { %v2501_v10 = vmax.f32 %v2170_v53, 0.0  ;;  %v2503_v33 = vmax.f32 %v2363_v4, 0.0 }
 0x3c6   :  { %v2502_v18 = vmax.f32 %v2172_v7, 0.0  ;;  %v2504_v6 = vmax.f32 %v2365_v1, 0.0 }
 0x3c7   :  { %v2617_v44 = vpack.c.bf16 %v2501_v10, %v2497_v20  ;;  %v2619_v21 = vpack.c.bf16 %v2503_v33, %v2499_v19 }
 0x3c8   :  { %v2618_v39 = vpack.c.bf16 %v2502_v18, %v2498_v36  ;;  %v2620_v55 = vpack.c.bf16 %v2504_v6, %v2500_v45  ;;  %v2175_v3 = vpop.f32.mrb[108].mxu0  ;;  %v2368_v48 = vpop.f32.mrb[108].mxu1 }
 0x3c9   :  { %v2176_v17 = vadd.f32 %v2175_v3, %v1833_v35  ;;  %v2369_v25 = vadd.f32 %v2368_v48, %v1833_v35  ;;  %v2177_v47 = vpop.f32.mrb[109].mxu0  ;;  %v2370_v8 = vpop.f32.mrb[109].mxu1 }
 0x3ca   :  { %v2178_v42 = vadd.f32 %v2177_v47, %v1833_v35  ;;  %v2371_v31 = vadd.f32 %v2370_v8, %v1833_v35  ;;  %v2179_v22 = vpop.f32.mrb[110].mxu0  ;;  %v2372_v26 = vpop.f32.mrb[110].mxu1  ;;  %2949 = vmatprep.subr.bf16.mxu0 %v2618_v39  ;;  %3142 = vmatprep.subr.bf16.mxu1 %v2620_v55 }
 0x3cb   :  { %v2180_v28 = vadd.f32 %v2179_v22, %v1837_v9  ;;  %v2373_v34 = vadd.f32 %v2372_v26, %v1837_v9  ;;  %v2181_v40 = vpop.f32.mrb[111].mxu0  ;;  %v2374_v27 = vpop.f32.mrb[111].mxu1  ;;  %2950 = vmatpush1.bf16.msra.mxu0 %v2617_v44  ;;  %3143 = vmatpush1.bf16.msra.mxu1 %v2619_v21  ;;  %v2505_v50 = vmax.f32 %v2176_v17, 0.0  ;;  %v2507_v29 = vmax.f32 %v2369_v25, 0.0 }
 0x3cc   :  { %v2182_v49 = vadd.f32 %v2181_v40, %v1837_v9  ;;  %v2375_v13 = vadd.f32 %v2374_v27, %v1837_v9  ;;  %v2506_v15 = vmax.f32 %v2178_v42, 0.0  ;;  %v2508_v32 = vmax.f32 %v2371_v31, 0.0  ;;  %v1853_v45 = vpop.permute.xlu0 %1852  ;;  %v1849_v18 = vpop.permute.xlu1 %1848 }
 0x3cd   :  { %v2509_v51 = vmax.f32 %v2180_v28, 0.0  ;;  %v2511_v52 = vmax.f32 %v2373_v34, 0.0 }
 0x3ce   :  { %v2510_v59 = vmax.f32 %v2182_v49, 0.0  ;;  %v2512_v60 = vmax.f32 %v2375_v13, 0.0 }
 0x3cf   :  { %v2621_v23 = vpack.c.bf16 %v2509_v51, %v2505_v50  ;;  %v2623_v38 = vpack.c.bf16 %v2511_v52, %v2507_v29 }
 0x3d0   :  { %v2622_v14 = vpack.c.bf16 %v2510_v59, %v2506_v15  ;;  %v2624_v61 = vpack.c.bf16 %v2512_v60, %v2508_v32  ;;  %v2185_v56 = vpop.f32.mrb[112].mxu0  ;;  %v2378_v5 = vpop.f32.mrb[112].mxu1 }
 0x3d1   :  { %v2186_v43 = vadd.f32 %v2185_v56, %v1841_v24  ;;  %v2379_v30 = vadd.f32 %v2378_v5, %v1841_v24  ;;  %v2187_v12 = vpop.f32.mrb[113].mxu0  ;;  %v2380_v54 = vpop.f32.mrb[113].mxu1 }
 0x3d2   :  { %v2188_v46 = vadd.f32 %v2187_v12, %v1841_v24  ;;  %v2381_v62 = vadd.f32 %v2380_v54, %v1841_v24  ;;  %v2189_v2 = vpop.f32.mrb[114].mxu0  ;;  %v2382_v11 = vpop.f32.mrb[114].mxu1  ;;  %2951 = vmatprep.subr.bf16.mxu0 %v2622_v14  ;;  %3144 = vmatprep.subr.bf16.mxu1 %v2624_v61 }
 0x3d3   :  { %v2190_v57 = vadd.f32 %v2189_v2, %v1845_v37  ;;  %v2383_v58 = vadd.f32 %v2382_v11, %v1845_v37  ;;  %v2191_v53 = vpop.f32.mrb[115].mxu0  ;;  %v2384_v4 = vpop.f32.mrb[115].mxu1  ;;  %2952 = vmatpush1.bf16.msra.mxu0 %v2621_v23  ;;  %3145 = vmatpush1.bf16.msra.mxu1 %v2623_v38  ;;  %v2513_v7 = vmax.f32 %v2186_v43, 0.0  ;;  %v2515_v1 = vmax.f32 %v2379_v30, 0.0 }
 0x3d4   :  { %v2192_v41 = vadd.f32 %v2191_v53, %v1845_v37  ;;  %v2385_v63 = vadd.f32 %v2384_v4, %v1845_v37  ;;  %v2514_v19 = vmax.f32 %v2188_v46, 0.0  ;;  %v2516_v10 = vmax.f32 %v2381_v62, 0.0  ;;  %v1861_v15 = vpop.permute.xlu0 %1860  ;;  %v1857_v32 = vpop.permute.xlu1 %1856 }
 0x3d5   :  { %v2517_v16 = vmax.f32 %v2190_v57, 0.0  ;;  %v2519_v20 = vmax.f32 %v2383_v58, 0.0 }
 0x3d6   :  { %v2518_v33 = vmax.f32 %v2192_v41, 0.0  ;;  %v2520_v36 = vmax.f32 %v2385_v63, 0.0 }
 0x3d7   :  { %v2625_v6 = vpack.c.bf16 %v2517_v16, %v2513_v7  ;;  %v2627_v9 = vpack.c.bf16 %v2519_v20, %v2515_v1 }
 0x3d8   :  { %v2626_v35 = vpack.c.bf16 %v2518_v33, %v2514_v19  ;;  %v2628_v44 = vpack.c.bf16 %v2520_v36, %v2516_v10  ;;  %v2195_v21 = vpop.f32.mrb[116].mxu0  ;;  %v2388_v39 = vpop.f32.mrb[116].mxu1 }
 0x3d9   :  { %v2196_v55 = vadd.f32 %v2195_v21, %v1849_v18  ;;  %v2389_v3 = vadd.f32 %v2388_v39, %v1849_v18  ;;  %v2197_v48 = vpop.f32.mrb[117].mxu0  ;;  %v2390_v0 = vpop.f32.mrb[117].mxu1 }
 0x3da   :  { %v2198_v17 = vadd.f32 %v2197_v48, %v1849_v18  ;;  %v2391_v25 = vadd.f32 %v2390_v0, %v1849_v18  ;;  %v2199_v47 = vpop.f32.mrb[118].mxu0  ;;  %v2392_v8 = vpop.f32.mrb[118].mxu1  ;;  %2953 = vmatprep.subr.bf16.mxu0 %v2626_v35  ;;  %3146 = vmatprep.subr.bf16.mxu1 %v2628_v44 }
 0x3db   :  { %v2200_v42 = vadd.f32 %v2199_v47, %v1853_v45  ;;  %v2393_v31 = vadd.f32 %v2392_v8, %v1853_v45  ;;  %v2201_v22 = vpop.f32.mrb[119].mxu0  ;;  %v2394_v26 = vpop.f32.mrb[119].mxu1  ;;  %2954 = vmatpush1.bf16.msra.mxu0 %v2625_v6  ;;  %3147 = vmatpush1.bf16.msra.mxu1 %v2627_v9  ;;  %v2521_v40 = vmax.f32 %v2196_v55, 0.0  ;;  %v2523_v27 = vmax.f32 %v2389_v3, 0.0 }
 0x3dc   :  { %v2202_v28 = vadd.f32 %v2201_v22, %v1853_v45  ;;  %v2395_v34 = vadd.f32 %v2394_v26, %v1853_v45  ;;  %v2522_v50 = vmax.f32 %v2198_v17, 0.0  ;;  %v2524_v29 = vmax.f32 %v2391_v25, 0.0  ;;  %v1869_v19 = vpop.permute.xlu0 %1868  ;;  %v1865_v10 = vpop.permute.xlu1 %1864 }
 0x3dd   :  { %v2525_v49 = vmax.f32 %v2200_v42, 0.0  ;;  %v2527_v13 = vmax.f32 %v2393_v31, 0.0 }
 0x3de   :  { %v2526_v51 = vmax.f32 %v2202_v28, 0.0  ;;  %v2528_v52 = vmax.f32 %v2395_v34, 0.0 }
 0x3df   :  { %v2629_v59 = vpack.c.bf16 %v2525_v49, %v2521_v40  ;;  %v2631_v60 = vpack.c.bf16 %v2527_v13, %v2523_v27 }
 0x3e0   :  { %v2630_v37 = vpack.c.bf16 %v2526_v51, %v2522_v50  ;;  %v2632_v24 = vpack.c.bf16 %v2528_v52, %v2524_v29  ;;  %v2205_v23 = vpop.f32.mrb[120].mxu0  ;;  %v2398_v38 = vpop.f32.mrb[120].mxu1 }
 0x3e1   :  { %v2206_v14 = vadd.f32 %v2205_v23, %v1857_v32  ;;  %v2399_v61 = vadd.f32 %v2398_v38, %v1857_v32  ;;  %v2207_v56 = vpop.f32.mrb[121].mxu0  ;;  %v2400_v5 = vpop.f32.mrb[121].mxu1  ;;  %v5084_v23 = vld [vmem:[%s6815_s4 + $0x30] ss:$8 sps:$4 sm:$0xff]   ;;  %v5085_v38 = vld [vmem:[%s6815_s4 + $0x44] ss:$8 sps:$4 sm:$0xff]  }
 0x3e2   :  { %v2208_v43 = vadd.f32 %v2207_v56, %v1857_v32  ;;  %v2401_v30 = vadd.f32 %v2400_v5, %v1857_v32  ;;  %v2209_v12 = vpop.f32.mrb[122].mxu0  ;;  %v2402_v54 = vpop.f32.mrb[122].mxu1  ;;  %2955 = vmatprep.subr.bf16.mxu0 %v2630_v37  ;;  %3148 = vmatprep.subr.bf16.mxu1 %v2632_v24  ;;  %v5076_v32 = vld [vmem:[%s6815_s4 + $0x14] ss:$8 sps:$4 sm:$0xff]   ;;  %v5081_v37 = vld [vmem:[%s6815_s4 + $0x20] ss:$8 sps:$4 sm:$0xff]  }
 0x3e3   :  { %v2210_v46 = vadd.f32 %v2209_v12, %v1861_v15  ;;  %v2403_v62 = vadd.f32 %v2402_v54, %v1861_v15  ;;  %v2211_v2 = vpop.f32.mrb[123].mxu0  ;;  %v2404_v11 = vpop.f32.mrb[123].mxu1  ;;  %2956 = vmatpush1.bf16.msra.mxu0 %v2629_v59  ;;  %3149 = vmatpush1.bf16.msra.mxu1 %v2631_v60  ;;  %v2529_v53 = vmax.f32 %v2206_v14, 0.0  ;;  %v2531_v4 = vmax.f32 %v2399_v61, 0.0  ;;  %v5078_v59 = vld [vmem:[%s6815_s4 + $0x10] ss:$8 sps:$4 sm:$0xff]  }
 0x3e4   :  { %v2212_v57 = vadd.f32 %v2211_v2, %v1861_v15  ;;  %v2405_v58 = vadd.f32 %v2404_v11, %v1861_v15  ;;  %v2530_v7 = vmax.f32 %v2208_v43, 0.0  ;;  %v2532_v1 = vmax.f32 %v2401_v30, 0.0  ;;  %v5073_v15 = vld [vmem:[%s6815_s4] ss:$8 sps:$4 sm:$0xff]   ;;  %v5079_v60 = vld [vmem:[%s6815_s4 + $0x24] ss:$8 sps:$4 sm:$0xff]  }
 0x3e5   :  { %v2533_v41 = vmax.f32 %v2210_v46, 0.0  ;;  %v2535_v63 = vmax.f32 %v2403_v62, 0.0  ;;  %v5082_v24 = vld [vmem:[%s6815_s4 + $0x34] ss:$8 sps:$4 sm:$0xff]   ;;  %v5087_v14 = vld [vmem:[%s6815_s4 + $0x40] ss:$8 sps:$4 sm:$0xff]  }
 0x3e6   :  { %v2534_v16 = vmax.f32 %v2212_v57, 0.0  ;;  %v2536_v20 = vmax.f32 %v2405_v58, 0.0  ;;  %v5088_v61 = vld [vmem:[%s6815_s4 + $0x54] ss:$8 sps:$4 sm:$0xff]   ;;  %v5090_v56 = vld [vmem:[%s6815_s4 + $0x50] ss:$8 sps:$4 sm:$0xff]  }
 0x3e7   :  { %v2633_v33 = vpack.c.bf16 %v2533_v41, %v2529_v53  ;;  %v2635_v36 = vpack.c.bf16 %v2535_v63, %v2531_v4  ;;  %v5091_v5 = vld [vmem:[%s6815_s4 + $0x64] ss:$8 sps:$4 sm:$0xff]   ;;  %v5093_v43 = vld [vmem:[%s6815_s4 + $0x60] ss:$8 sps:$4 sm:$0xff]   ;;  %v5094_v30 = vld [vmem:[%s6815_s4 + $0x74] ss:$8 sps:$4 sm:$0xff]  }
 0x3e8   :  { %v2634_v45 = vpack.c.bf16 %v2534_v16, %v2530_v7  ;;  %v2636_v18 = vpack.c.bf16 %v2536_v20, %v2532_v1  ;;  %v2215_v6 = vpop.f32.mrb[124].mxu0  ;;  %v2408_v9 = vpop.f32.mrb[124].mxu1  ;;  %v5096_v12 = vld [vmem:[%s6815_s4 + $0x70] ss:$8 sps:$4 sm:$0xff]   ;;  %v5097_v54 = vld [vmem:[%s6815_s4 + $0x84] ss:$8 sps:$4 sm:$0xff]  }
 0x3e9   :  { %v2216_v35 = vadd.f32 %v2215_v6, %v1865_v10  ;;  %v2409_v44 = vadd.f32 %v2408_v9, %v1865_v10  ;;  %v2217_v21 = vpop.f32.mrb[125].mxu0  ;;  %v2410_v39 = vpop.f32.mrb[125].mxu1  ;;  %v5099_v46 = vld [vmem:[%s6815_s4 + $0x80] ss:$8 sps:$4 sm:$0xff]   ;;  %v5100_v62 = vld [vmem:[%s6815_s4 + $0x94] ss:$8 sps:$4 sm:$0xff]  }
 0x3ea   :  { %v2218_v55 = vadd.f32 %v2217_v21, %v1865_v10  ;;  %v2411_v3 = vadd.f32 %v2410_v39, %v1865_v10  ;;  %v2219_v48 = vpop.f32.mrb[126].mxu0  ;;  %v2412_v0 = vpop.f32.mrb[126].mxu1  ;;  %2957 = vmatprep.subr.bf16.mxu0 %v2634_v45  ;;  %3150 = vmatprep.subr.bf16.mxu1 %v2636_v18  ;;  %v5102_v2 = vld [vmem:[%s6815_s4 + $0x90] ss:$8 sps:$4 sm:$0xff]   ;;  %v5103_v11 = vld [vmem:[%s6815_s4 + $0xa4] ss:$8 sps:$4 sm:$0xff]  }
 0x3eb   :  { %v2220_v17 = vadd.f32 %v2219_v48, %v1869_v19  ;;  %v2413_v25 = vadd.f32 %v2412_v0, %v1869_v19  ;;  %v2221_v47 = vpop.f32.mrb[127].mxu0  ;;  %v2414_v8 = vpop.f32.mrb[127].mxu1  ;;  %2958 = vmatpush1.bf16.msra.mxu0 %v2633_v33  ;;  %3151 = vmatpush1.bf16.msra.mxu1 %v2635_v36  ;;  %v2537_v22 = vmax.f32 %v2216_v35, 0.0  ;;  %v2539_v26 = vmax.f32 %v2409_v44, 0.0  ;;  %v5105_v57 = vld [vmem:[%s6815_s4 + $0xa0] ss:$8 sps:$4 sm:$0xff]  }
 0x3ec   :  { %v2222_v42 = vadd.f32 %v2221_v47, %v1869_v19  ;;  %v2415_v31 = vadd.f32 %v2414_v8, %v1869_v19  ;;  %v2538_v40 = vmax.f32 %v2218_v55, 0.0  ;;  %v2540_v27 = vmax.f32 %v2411_v3, 0.0  ;;  %v5106_v58 = vld [vmem:[%s6815_s4 + $0xb4] ss:$8 sps:$4 sm:$0xff]   ;;  %v5108_v53 = vld [vmem:[%s6815_s4 + $0xb0] ss:$8 sps:$4 sm:$0xff]  }
 0x3ed   :  { %v2541_v28 = vmax.f32 %v2220_v17, 0.0  ;;  %v2543_v34 = vmax.f32 %v2413_v25, 0.0  ;;  %v5109_v4 = vld [vmem:[%s6815_s4 + $0xc4] ss:$8 sps:$4 sm:$0xff]   ;;  %v5111_v41 = vld [vmem:[%s6815_s4 + $0xc0] ss:$8 sps:$4 sm:$0xff]  }
 0x3ee   :  { %v2542_v49 = vmax.f32 %v2222_v42, 0.0  ;;  %v2544_v13 = vmax.f32 %v2415_v31, 0.0  ;;  %v5112_v63 = vld [vmem:[%s6815_s4 + $0xd4] ss:$8 sps:$4 sm:$0xff]   ;;  %v5114_v7 = vld [vmem:[%s6815_s4 + $0xd0] ss:$8 sps:$4 sm:$0xff]  }
 0x3ef   :  { %v2637_v50 = vpack.c.bf16 %v2541_v28, %v2537_v22  ;;  %v2639_v29 = vpack.c.bf16 %v2543_v34, %v2539_v26  ;;  %v5115_v1 = vld [vmem:[%s6815_s4 + $0xe4] ss:$8 sps:$4 sm:$0xff]   ;;  %v5117_v16 = vld [vmem:[%s6815_s4 + $0xe0] ss:$8 sps:$4 sm:$0xff]   ;;  %v5118_v20 = vld [vmem:[%s6815_s4 + $0xf4] ss:$8 sps:$4 sm:$0xff]  }
 0x3f0   :  { %v2638_v51 = vpack.c.bf16 %v2542_v49, %v2538_v40  ;;  %v2640_v52 = vpack.c.bf16 %v2544_v13, %v2540_v27  ;;  %v5120_v19 = vld [vmem:[%s6815_s4 + $0xf0] ss:$8 sps:$4 sm:$0xff]   ;;  %v5123_v28 = vld [vmem:[%s6816_s5 + $0x4] ss:$8 sps:$4 sm:$0xff]  }
 0x3f2   :  { %2959 = vmatprep.subr.bf16.mxu0 %v2638_v51  ;;  %3152 = vmatprep.subr.bf16.mxu1 %v2640_v52 }
 0x3f3   :  { %2960 = vmatpush1.bf16.msra.mxu0 %v2637_v50  ;;  %3153 = vmatpush1.bf16.msra.mxu1 %v2639_v29 }
 0x3f6   :  { %2962 = vmatmul.mubr.bf16.vlgmr.msra.gmra.mrb[128].mxu0 %v5073_v15  ;;  %3155 = vmatmul.mubr.bf16.vlgmr.msra.gmra.mrb[128].mxu1 %v5073_v15 }
 0x3f7   :  { %2971 = vmatprep.mubr.bf16.mxu0 %v5076_v32  ;;  %3164 = vmatprep.mubr.bf16.mxu1 %v5076_v32 }
 0x3fb   :  { %v2643_v10 = vpop.permute.xlu1 %2642  ;;  %v2647_v36 = vpop.permute.xlu0 %2646 }
 0x3fe   :  { %2972 = vmatmul.mubr.bf16.gmra.mrb[132].mxu0 %v5078_v59  ;;  %3165 = vmatmul.mubr.bf16.gmra.mrb[132].mxu1 %v5078_v59 }
 0x3ff   :  { %2981 = vmatprep.mubr.bf16.mxu0 %v5079_v60  ;;  %3174 = vmatprep.mubr.bf16.mxu1 %v5079_v60  ;;  %v2651_v33 = vpop.permute.xlu1 %2650 }
 0x403   :  { %v2655_v13 = vpop.permute.xlu1 %2654 }
 0x406   :  { %2982 = vmatmul.mubr.bf16.gmra.mrb[136].mxu0 %v5081_v37  ;;  %3175 = vmatmul.mubr.bf16.gmra.mrb[136].mxu1 %v5081_v37 }
 0x407   :  { %2991 = vmatprep.mubr.bf16.mxu0 %v5082_v24  ;;  %3184 = vmatprep.mubr.bf16.mxu1 %v5082_v24 }
 0x40e   :  { %2992 = vmatmul.mubr.bf16.gmra.mrb[140].mxu0 %v5084_v23  ;;  %3185 = vmatmul.mubr.bf16.gmra.mrb[140].mxu1 %v5084_v23 }
 0x40f   :  { %3001 = vmatprep.mubr.bf16.mxu0 %v5085_v38  ;;  %3194 = vmatprep.mubr.bf16.mxu1 %v5085_v38 }
 0x416   :  { %3002 = vmatmul.mubr.bf16.gmra.mrb[144].mxu0 %v5087_v14  ;;  %3195 = vmatmul.mubr.bf16.gmra.mrb[144].mxu1 %v5087_v14 }
 0x417   :  { %3011 = vmatprep.mubr.bf16.mxu0 %v5088_v61  ;;  %3204 = vmatprep.mubr.bf16.mxu1 %v5088_v61 }
 0x41e   :  { %3012 = vmatmul.mubr.bf16.gmra.mrb[148].mxu0 %v5090_v56  ;;  %3205 = vmatmul.mubr.bf16.gmra.mrb[148].mxu1 %v5090_v56 }
 0x41f   :  { %3021 = vmatprep.mubr.bf16.mxu0 %v5091_v5  ;;  %3214 = vmatprep.mubr.bf16.mxu1 %v5091_v5 }
 0x426   :  { %3022 = vmatmul.mubr.bf16.gmra.mrb[152].mxu0 %v5093_v43  ;;  %3215 = vmatmul.mubr.bf16.gmra.mrb[152].mxu1 %v5093_v43 }
 0x427   :  { %3031 = vmatprep.mubr.bf16.mxu0 %v5094_v30  ;;  %3224 = vmatprep.mubr.bf16.mxu1 %v5094_v30 }
 0x42e   :  { %3032 = vmatmul.mubr.bf16.gmra.mrb[156].mxu0 %v5096_v12  ;;  %3225 = vmatmul.mubr.bf16.gmra.mrb[156].mxu1 %v5096_v12 }
 0x42f   :  { %3041 = vmatprep.mubr.bf16.mxu0 %v5097_v54  ;;  %3234 = vmatprep.mubr.bf16.mxu1 %v5097_v54 }
 0x436   :  { %3042 = vmatmul.mubr.bf16.gmra.mrb[160].mxu0 %v5099_v46  ;;  %3235 = vmatmul.mubr.bf16.gmra.mrb[160].mxu1 %v5099_v46 }
 0x437   :  { %3051 = vmatprep.mubr.bf16.mxu0 %v5100_v62  ;;  %3244 = vmatprep.mubr.bf16.mxu1 %v5100_v62 }
 0x43e   :  { %3052 = vmatmul.mubr.bf16.gmra.mrb[164].mxu0 %v5102_v2  ;;  %3245 = vmatmul.mubr.bf16.gmra.mrb[164].mxu1 %v5102_v2 }
 0x43f   :  { %3061 = vmatprep.mubr.bf16.mxu0 %v5103_v11  ;;  %3254 = vmatprep.mubr.bf16.mxu1 %v5103_v11 }
 0x446   :  { %3062 = vmatmul.mubr.bf16.gmra.mrb[168].mxu0 %v5105_v57  ;;  %3255 = vmatmul.mubr.bf16.gmra.mrb[168].mxu1 %v5105_v57 }
 0x447   :  { %3071 = vmatprep.mubr.bf16.mxu0 %v5106_v58  ;;  %3264 = vmatprep.mubr.bf16.mxu1 %v5106_v58 }
 0x44e   :  { %3072 = vmatmul.mubr.bf16.gmra.mrb[172].mxu0 %v5108_v53  ;;  %3265 = vmatmul.mubr.bf16.gmra.mrb[172].mxu1 %v5108_v53 }
 0x44f   :  { %3081 = vmatprep.mubr.bf16.mxu0 %v5109_v4  ;;  %3274 = vmatprep.mubr.bf16.mxu1 %v5109_v4 }
 0x456   :  { %3082 = vmatmul.mubr.bf16.gmra.mrb[176].mxu0 %v5111_v41  ;;  %3275 = vmatmul.mubr.bf16.gmra.mrb[176].mxu1 %v5111_v41  ;;  %v2659_v41 = vpop.permute.xlu0 %2658 }
 0x457   :  { %3091 = vmatprep.mubr.bf16.mxu0 %v5112_v63  ;;  %3284 = vmatprep.mubr.bf16.mxu1 %v5112_v63  ;;  %v2663_v63 = vpop.permute.xlu1 %2662 }
 0x45e   :  { %3092 = vmatmul.mubr.bf16.gmra.mrb[180].mxu0 %v5114_v7  ;;  %3285 = vmatmul.mubr.bf16.gmra.mrb[180].mxu1 %v5114_v7 }
 0x45f   :  { %3101 = vmatprep.mubr.bf16.mxu0 %v5115_v1  ;;  %3294 = vmatprep.mubr.bf16.mxu1 %v5115_v1 }
 0x466   :  { %3102 = vmatmul.mubr.bf16.gmra.mrb[184].mxu0 %v5117_v16  ;;  %3295 = vmatmul.mubr.bf16.gmra.mrb[184].mxu1 %v5117_v16 }
 0x467   :  { %3111 = vmatprep.mubr.bf16.mxu0 %v5118_v20  ;;  %3304 = vmatprep.mubr.bf16.mxu1 %v5118_v20 }
 0x46e   :  { %3112 = vmatmul.mubr.bf16.gmra.mrb[188].mxu0 %v5120_v19  ;;  %3305 = vmatmul.mubr.bf16.gmra.mrb[188].mxu1 %v5120_v19 }
 0x46f   :  { %3859 = vmatprep.mubr.bf16.mxu0 %v5123_v28  ;;  %4052 = vmatprep.mubr.bf16.mxu1 %v5123_v28  ;;  %v2667_v28 = vpop.permute.xlu0 %2666 }
 0x4c9   :  { %v2963_v45 = vpop.f32.mrb[128].mxu0  ;;  %v3156_v18 = vpop.f32.mrb[128].mxu1 }
 0x4ca   :  { %v2964_v6 = vadd.f32 %v2963_v45, %v2643_v10  ;;  %v3157_v9 = vadd.f32 %v3156_v18, %v2643_v10  ;;  %v2965_v35 = vpop.f32.mrb[129].mxu0  ;;  %v3158_v44 = vpop.f32.mrb[129].mxu1 }
 0x4cb   :  { %v2966_v21 = vadd.f32 %v2965_v35, %v2643_v10  ;;  %v3159_v39 = vadd.f32 %v3158_v44, %v2643_v10  ;;  %v2967_v55 = vpop.f32.mrb[130].mxu0  ;;  %v3160_v3 = vpop.f32.mrb[130].mxu1 }
 0x4cc   :  { %v2968_v48 = vadd.f32 %v2967_v55, %v2647_v36  ;;  %v3161_v0 = vadd.f32 %v3160_v3, %v2647_v36  ;;  %v2969_v17 = vpop.f32.mrb[131].mxu0  ;;  %v3162_v25 = vpop.f32.mrb[131].mxu1  ;;  %v3315_v47 = vmax.f32 %v2964_v6, 0.0  ;;  %v3317_v8 = vmax.f32 %v3157_v9, 0.0 }
 0x4cd   :  { %v2970_v42 = vadd.f32 %v2969_v17, %v2647_v36  ;;  %v3163_v31 = vadd.f32 %v3162_v25, %v2647_v36  ;;  %v3316_v34 = vmax.f32 %v2966_v21, 0.0  ;;  %v3318_v40 = vmax.f32 %v3159_v39, 0.0 }
 0x4ce   :  { %v3319_v22 = vmax.f32 %v2968_v48, 0.0  ;;  %v3321_v26 = vmax.f32 %v3161_v0, 0.0 }
 0x4cf   :  { %v3320_v27 = vmax.f32 %v2970_v42, 0.0  ;;  %v3322_v49 = vmax.f32 %v3163_v31, 0.0 }
 0x4d0   :  { %v3475_v50 = vpack.c.bf16 %v3319_v22, %v3315_v47  ;;  %v3477_v29 = vpack.c.bf16 %v3321_v26, %v3317_v8 }
 0x4d1   :  { %v3476_v51 = vpack.c.bf16 %v3320_v27, %v3316_v34  ;;  %v3478_v52 = vpack.c.bf16 %v3322_v49, %v3318_v40  ;;  %v2973_v15 = vpop.f32.mrb[132].mxu0  ;;  %v3166_v32 = vpop.f32.mrb[132].mxu1  ;;  %v5283_v49 = vmov 5  }
 0x4d2   :  { %v2974_v59 = vadd.f32 %v2973_v15, %v2651_v33  ;;  %v3167_v60 = vadd.f32 %v3166_v32, %v2651_v33  ;;  %v2975_v37 = vpop.f32.mrb[133].mxu0  ;;  %v3168_v24 = vpop.f32.mrb[133].mxu1  ;;  %4968 = vset.pattern.permute.xlu1 %v5283_v49 }
 0x4d3   :  { %v2976_v23 = vadd.f32 %v2975_v37, %v2651_v33  ;;  %v3169_v38 = vadd.f32 %v3168_v24, %v2651_v33  ;;  %v2977_v14 = vpop.f32.mrb[134].mxu0  ;;  %v3170_v61 = vpop.f32.mrb[134].mxu1  ;;  %3827 = vmatprep.subr.bf16.mxu0 %v3476_v51  ;;  %4020 = vmatprep.subr.bf16.mxu1 %v3478_v52  ;;  %v5246_v52 = vld [vmem:[%s6811_s1 + $0x8] sm:$0xff] }
 0x4d4   :  { %v2978_v56 = vadd.f32 %v2977_v14, %v2655_v13  ;;  %v3171_v5 = vadd.f32 %v3170_v61, %v2655_v13  ;;  %v2979_v43 = vpop.f32.mrb[135].mxu0  ;;  %v3172_v30 = vpop.f32.mrb[135].mxu1  ;;  %3828 = vmatpush1.bf16.msra.mxu0 %v3475_v50  ;;  %4021 = vmatpush1.bf16.msra.mxu1 %v3477_v29  ;;  %v3323_v12 = vmax.f32 %v2974_v59, 0.0  ;;  %v3325_v62 = vmax.f32 %v3167_v60, 0.0 }
 0x4d5   :  { %v2980_v54 = vadd.f32 %v2979_v43, %v2655_v13  ;;  %v3173_v46 = vadd.f32 %v3172_v30, %v2655_v13  ;;  %v3324_v57 = vmax.f32 %v2976_v23, 0.0  ;;  %v3326_v58 = vmax.f32 %v3169_v38, 0.0  ;;  %v2671_v34 = vpop.permute.xlu1 %2670  ;;  %3544 = vperm.xlu1 %4968, %v5246_v52  }
 0x4d6   :  { %v3327_v2 = vmax.f32 %v2978_v56, 0.0  ;;  %v3329_v11 = vmax.f32 %v3171_v5, 0.0 }
 0x4d7   :  { %v3328_v53 = vmax.f32 %v2980_v54, 0.0  ;;  %v3330_v4 = vmax.f32 %v3173_v46, 0.0 }
 0x4d8   :  { %v3479_v7 = vpack.c.bf16 %v3327_v2, %v3323_v12  ;;  %v3481_v1 = vpack.c.bf16 %v3329_v11, %v3325_v62  ;;  %v6354_v12 = vld [vmem:[%s6811_s1 + $0x10] sm:$0xff] }
 0x4d9   :  { %v3480_v16 = vpack.c.bf16 %v3328_v53, %v3324_v57  ;;  %v3482_v20 = vpack.c.bf16 %v3330_v4, %v3326_v58  ;;  %v2983_v19 = vpop.f32.mrb[136].mxu0  ;;  %v3176_v10 = vpop.f32.mrb[136].mxu1  ;;  %3548 = vperm.xlu1 %4968, %v6354_v12  }
 0x4da   :  { %v2984_v33 = vadd.f32 %v2983_v19, %v2659_v41  ;;  %v3177_v36 = vadd.f32 %v3176_v10, %v2659_v41  ;;  %v2985_v45 = vpop.f32.mrb[137].mxu0  ;;  %v3178_v18 = vpop.f32.mrb[137].mxu1  ;;  %v5248_v10 = vld [vmem:[%s6811_s1 + $0x20] sm:$0xff] }
 0x4db   :  { %v2986_v6 = vadd.f32 %v2985_v45, %v2659_v41  ;;  %v3179_v9 = vadd.f32 %v3178_v18, %v2659_v41  ;;  %v2987_v35 = vpop.f32.mrb[138].mxu0  ;;  %v3180_v44 = vpop.f32.mrb[138].mxu1  ;;  %3829 = vmatprep.subr.bf16.mxu0 %v3480_v16  ;;  %4022 = vmatprep.subr.bf16.mxu1 %v3482_v20 }
 0x4dc   :  { %v2988_v21 = vadd.f32 %v2987_v35, %v2663_v63  ;;  %v3181_v39 = vadd.f32 %v3180_v44, %v2663_v63  ;;  %v2989_v55 = vpop.f32.mrb[139].mxu0  ;;  %v3182_v3 = vpop.f32.mrb[139].mxu1  ;;  %3830 = vmatpush1.bf16.msra.mxu0 %v3479_v7  ;;  %4023 = vmatpush1.bf16.msra.mxu1 %v3481_v1  ;;  %v3331_v48 = vmax.f32 %v2984_v33, 0.0  ;;  %v3333_v25 = vmax.f32 %v3177_v36, 0.0 }
 0x4dd   :  { %v2990_v0 = vadd.f32 %v2989_v55, %v2663_v63  ;;  %v3183_v17 = vadd.f32 %v3182_v3, %v2663_v63  ;;  %v3332_v47 = vmax.f32 %v2986_v6, 0.0  ;;  %v3334_v31 = vmax.f32 %v3179_v9, 0.0  ;;  %v2675_v4 = vpop.permute.xlu0 %2674  ;;  %v2679_v41 = vpop.permute.xlu1 %2678  ;;  %3556 = vperm.xlu1 %4968, %v5248_v10  }
 0x4de   :  { %v3335_v8 = vmax.f32 %v2988_v21, 0.0  ;;  %v3337_v42 = vmax.f32 %v3181_v39, 0.0  ;;  %v5284_v33 = vmov 6  }
 0x4df   :  { %v3336_v22 = vmax.f32 %v2990_v0, 0.0  ;;  %v3338_v26 = vmax.f32 %v3183_v17, 0.0  ;;  %4970 = vset.pattern.permute.xlu0 %v5284_v33 }
 0x4e0   :  { %v3483_v40 = vpack.c.bf16 %v3335_v8, %v3331_v48  ;;  %v3485_v27 = vpack.c.bf16 %v3337_v42, %v3333_v25  ;;  %4346 = vperm.xlu0 %4970, %v5246_v52   ;;  %v5249_v25 = vld [vmem:[%s6811_s1 + $0x30] sm:$0xff] }
 0x4e1   :  { %v3484_v13 = vpack.c.bf16 %v3336_v22, %v3332_v47  ;;  %v3486_v50 = vpack.c.bf16 %v3338_v26, %v3334_v31  ;;  %v2993_v29 = vpop.f32.mrb[140].mxu0  ;;  %v3186_v51 = vpop.f32.mrb[140].mxu1  ;;  %3564 = vperm.xlu1 %4968, %v5249_v25  }
 0x4e2   :  { %v2994_v15 = vadd.f32 %v2993_v29, %v2667_v28  ;;  %v3187_v32 = vadd.f32 %v3186_v51, %v2667_v28  ;;  %v2995_v59 = vpop.f32.mrb[141].mxu0  ;;  %v3188_v60 = vpop.f32.mrb[141].mxu1 }
 0x4e3   :  { %v2996_v37 = vadd.f32 %v2995_v59, %v2667_v28  ;;  %v3189_v24 = vadd.f32 %v3188_v60, %v2667_v28  ;;  %v2997_v23 = vpop.f32.mrb[142].mxu0  ;;  %v3190_v38 = vpop.f32.mrb[142].mxu1  ;;  %3831 = vmatprep.subr.bf16.mxu0 %v3484_v13  ;;  %4024 = vmatprep.subr.bf16.mxu1 %v3486_v50 }
 0x4e4   :  { %v2998_v14 = vadd.f32 %v2997_v23, %v2671_v34  ;;  %v3191_v61 = vadd.f32 %v3190_v38, %v2671_v34  ;;  %v2999_v56 = vpop.f32.mrb[143].mxu0  ;;  %v3192_v5 = vpop.f32.mrb[143].mxu1  ;;  %3832 = vmatpush1.bf16.msra.mxu0 %v3483_v40  ;;  %4025 = vmatpush1.bf16.msra.mxu1 %v3485_v27  ;;  %v3339_v54 = vmax.f32 %v2994_v15, 0.0  ;;  %v3341_v46 = vmax.f32 %v3187_v32, 0.0  ;;  %v5250_v32 = vld [vmem:[%s6811_s1 + $0x40] sm:$0xff] }
 0x4e5   :  { %v3000_v43 = vadd.f32 %v2999_v56, %v2671_v34  ;;  %v3193_v30 = vadd.f32 %v3192_v5, %v2671_v34  ;;  %v3340_v11 = vmax.f32 %v2996_v37, 0.0  ;;  %v3342_v57 = vmax.f32 %v3189_v24, 0.0  ;;  %4358 = vperm.xlu0 %4970, %v5248_v10   ;;  %v2683_v40 = vpop.permute.xlu0 %2682  ;;  %v2687_v27 = vpop.permute.xlu1 %2686  ;;  %3572 = vperm.xlu1 %4968, %v5250_v32  }
 0x4e6   :  { %v3343_v62 = vmax.f32 %v2998_v14, 0.0  ;;  %v3345_v2 = vmax.f32 %v3191_v61, 0.0 }
 0x4e7   :  { %v3344_v58 = vmax.f32 %v3000_v43, 0.0  ;;  %v3346_v53 = vmax.f32 %v3193_v30, 0.0 }
 0x4e8   :  { %v3487_v63 = vpack.c.bf16 %v3343_v62, %v3339_v54  ;;  %v3489_v7 = vpack.c.bf16 %v3345_v2, %v3341_v46  ;;  %v5251_v62 = vld [vmem:[%s6811_s1 + $0x50] sm:$0xff] }
 0x4e9   :  { %v3488_v1 = vpack.c.bf16 %v3344_v58, %v3340_v11  ;;  %v3490_v16 = vpack.c.bf16 %v3346_v53, %v3342_v57  ;;  %v3003_v20 = vpop.f32.mrb[144].mxu0  ;;  %v3196_v19 = vpop.f32.mrb[144].mxu1  ;;  %4366 = vperm.xlu0 %4970, %v5249_v25   ;;  %3580 = vperm.xlu1 %4968, %v5251_v62  }
 0x4ea   :  { %v3004_v36 = vadd.f32 %v3003_v20, %v2675_v4  ;;  %v3197_v45 = vadd.f32 %v3196_v19, %v2675_v4  ;;  %v3005_v18 = vpop.f32.mrb[145].mxu0  ;;  %v3198_v6 = vpop.f32.mrb[145].mxu1 }
 0x4eb   :  { %v3006_v9 = vadd.f32 %v3005_v18, %v2675_v4  ;;  %v3199_v35 = vadd.f32 %v3198_v6, %v2675_v4  ;;  %v3007_v44 = vpop.f32.mrb[146].mxu0  ;;  %v3200_v21 = vpop.f32.mrb[146].mxu1  ;;  %3833 = vmatprep.subr.bf16.mxu0 %v3488_v1  ;;  %4026 = vmatprep.subr.bf16.mxu1 %v3490_v16  ;;  %v5252_v18 = vld [vmem:[%s6811_s1 + $0x60] sm:$0xff] }
 0x4ec   :  { %v3008_v39 = vadd.f32 %v3007_v44, %v2679_v41  ;;  %v3201_v55 = vadd.f32 %v3200_v21, %v2679_v41  ;;  %v3009_v3 = vpop.f32.mrb[147].mxu0  ;;  %v3202_v48 = vpop.f32.mrb[147].mxu1  ;;  %3834 = vmatpush1.bf16.msra.mxu0 %v3487_v63  ;;  %4027 = vmatpush1.bf16.msra.mxu1 %v3489_v7  ;;  %v3347_v47 = vmax.f32 %v3004_v36, 0.0  ;;  %v3349_v8 = vmax.f32 %v3197_v45, 0.0 }
 0x4ed   :  { %v3010_v0 = vadd.f32 %v3009_v3, %v2679_v41  ;;  %v3203_v17 = vadd.f32 %v3202_v48, %v2679_v41  ;;  %v3348_v22 = vmax.f32 %v3006_v9, 0.0  ;;  %v3350_v26 = vmax.f32 %v3199_v35, 0.0  ;;  %4374 = vperm.xlu0 %4970, %v5250_v32   ;;  %v2691_v7 = vpop.permute.xlu0 %2690  ;;  %v2695_v1 = vpop.permute.xlu1 %2694  ;;  %3588 = vperm.xlu1 %4968, %v5252_v18  }
 0x4ee   :  { %v3351_v42 = vmax.f32 %v3008_v39, 0.0  ;;  %v3353_v31 = vmax.f32 %v3201_v55, 0.0 }
 0x4ef   :  { %v3352_v28 = vmax.f32 %v3010_v0, 0.0  ;;  %v3354_v34 = vmax.f32 %v3203_v17, 0.0 }
 0x4f0   :  { %v3491_v13 = vpack.c.bf16 %v3351_v42, %v3347_v47  ;;  %v3493_v50 = vpack.c.bf16 %v3353_v31, %v3349_v8  ;;  %v5253_v42 = vld [vmem:[%s6811_s1 + $0x70] sm:$0xff] }
 0x4f1   :  { %v3492_v29 = vpack.c.bf16 %v3352_v28, %v3348_v22  ;;  %v3494_v51 = vpack.c.bf16 %v3354_v34, %v3350_v26  ;;  %v3013_v52 = vpop.f32.mrb[148].mxu0  ;;  %v3206_v15 = vpop.f32.mrb[148].mxu1  ;;  %4382 = vperm.xlu0 %4970, %v5251_v62   ;;  %3596 = vperm.xlu1 %4968, %v5253_v42  }
 0x4f2   :  { %v3014_v59 = vadd.f32 %v3013_v52, %v2683_v40  ;;  %v3207_v60 = vadd.f32 %v3206_v15, %v2683_v40  ;;  %v3015_v37 = vpop.f32.mrb[149].mxu0  ;;  %v3208_v24 = vpop.f32.mrb[149].mxu1 }
 0x4f3   :  { %v3016_v23 = vadd.f32 %v3015_v37, %v2683_v40  ;;  %v3209_v38 = vadd.f32 %v3208_v24, %v2683_v40  ;;  %v3017_v14 = vpop.f32.mrb[150].mxu0  ;;  %v3210_v61 = vpop.f32.mrb[150].mxu1  ;;  %3835 = vmatprep.subr.bf16.mxu0 %v3492_v29  ;;  %4028 = vmatprep.subr.bf16.mxu1 %v3494_v51  ;;  %v5254_v37 = vld [vmem:[%s6811_s1 + $0x80] sm:$0xff] }
 0x4f4   :  { %v3018_v56 = vadd.f32 %v3017_v14, %v2687_v27  ;;  %v3211_v5 = vadd.f32 %v3210_v61, %v2687_v27  ;;  %v3019_v43 = vpop.f32.mrb[151].mxu0  ;;  %v3212_v30 = vpop.f32.mrb[151].mxu1  ;;  %3836 = vmatpush1.bf16.msra.mxu0 %v3491_v13  ;;  %4029 = vmatpush1.bf16.msra.mxu1 %v3493_v50  ;;  %v3355_v2 = vmax.f32 %v3014_v59, 0.0  ;;  %v3357_v11 = vmax.f32 %v3207_v60, 0.0 }
 0x4f5   :  { %v3020_v54 = vadd.f32 %v3019_v43, %v2687_v27  ;;  %v3213_v46 = vadd.f32 %v3212_v30, %v2687_v27  ;;  %v3356_v53 = vmax.f32 %v3016_v23, 0.0  ;;  %v3358_v4 = vmax.f32 %v3209_v38, 0.0  ;;  %4390 = vperm.xlu0 %4970, %v5252_v18   ;;  %v2699_v50 = vpop.permute.xlu0 %2698  ;;  %v2703_v29 = vpop.permute.xlu1 %2702  ;;  %3604 = vperm.xlu1 %4968, %v5254_v37  }
 0x4f6   :  { %v3359_v57 = vmax.f32 %v3018_v56, 0.0  ;;  %v3361_v58 = vmax.f32 %v3211_v5, 0.0 }
 0x4f7   :  { %v3360_v41 = vmax.f32 %v3020_v54, 0.0  ;;  %v3362_v63 = vmax.f32 %v3213_v46, 0.0 }
 0x4f8   :  { %v3495_v16 = vpack.c.bf16 %v3359_v57, %v3355_v2  ;;  %v3497_v20 = vpack.c.bf16 %v3361_v58, %v3357_v11  ;;  %v5255_v57 = vld [vmem:[%s6811_s1 + $0x90] sm:$0xff] }
 0x4f9   :  { %v3496_v19 = vpack.c.bf16 %v3360_v41, %v3356_v53  ;;  %v3498_v10 = vpack.c.bf16 %v3362_v63, %v3358_v4  ;;  %v3023_v36 = vpop.f32.mrb[152].mxu0  ;;  %v3216_v45 = vpop.f32.mrb[152].mxu1  ;;  %4398 = vperm.xlu0 %4970, %v5253_v42   ;;  %3612 = vperm.xlu1 %4968, %v5255_v57  }
 0x4fa   :  { %v3024_v6 = vadd.f32 %v3023_v36, %v2691_v7  ;;  %v3217_v9 = vadd.f32 %v3216_v45, %v2691_v7  ;;  %v3025_v35 = vpop.f32.mrb[153].mxu0  ;;  %v3218_v44 = vpop.f32.mrb[153].mxu1 }
 0x4fb   :  { %v3026_v21 = vadd.f32 %v3025_v35, %v2691_v7  ;;  %v3219_v39 = vadd.f32 %v3218_v44, %v2691_v7  ;;  %v3027_v55 = vpop.f32.mrb[154].mxu0  ;;  %v3220_v3 = vpop.f32.mrb[154].mxu1  ;;  %3837 = vmatprep.subr.bf16.mxu0 %v3496_v19  ;;  %4030 = vmatprep.subr.bf16.mxu1 %v3498_v10  ;;  %v5256_v35 = vld [vmem:[%s6811_s1 + $0xa0] sm:$0xff] }
 0x4fc   :  { %v3028_v48 = vadd.f32 %v3027_v55, %v2695_v1  ;;  %v3221_v0 = vadd.f32 %v3220_v3, %v2695_v1  ;;  %v3029_v17 = vpop.f32.mrb[155].mxu0  ;;  %v3222_v25 = vpop.f32.mrb[155].mxu1  ;;  %3838 = vmatpush1.bf16.msra.mxu0 %v3495_v16  ;;  %4031 = vmatpush1.bf16.msra.mxu1 %v3497_v20  ;;  %v3363_v31 = vmax.f32 %v3024_v6, 0.0  ;;  %v3365_v22 = vmax.f32 %v3217_v9, 0.0 }
 0x4fd   :  { %v3030_v47 = vadd.f32 %v3029_v17, %v2695_v1  ;;  %v3223_v8 = vadd.f32 %v3222_v25, %v2695_v1  ;;  %v3364_v34 = vmax.f32 %v3026_v21, 0.0  ;;  %v3366_v40 = vmax.f32 %v3219_v39, 0.0  ;;  %4406 = vperm.xlu0 %4970, %v5254_v37   ;;  %v2707_v20 = vpop.permute.xlu0 %2706  ;;  %v2711_v19 = vpop.permute.xlu1 %2710  ;;  %3620 = vperm.xlu1 %4968, %v5256_v35  }
 0x4fe   :  { %v3367_v26 = vmax.f32 %v3028_v48, 0.0  ;;  %v3369_v28 = vmax.f32 %v3221_v0, 0.0 }
 0x4ff   :  { %v3368_v27 = vmax.f32 %v3030_v47, 0.0  ;;  %v3370_v13 = vmax.f32 %v3223_v8, 0.0 }
 0x500   :  { %v3499_v51 = vpack.c.bf16 %v3367_v26, %v3363_v31  ;;  %v3501_v52 = vpack.c.bf16 %v3369_v28, %v3365_v22  ;;  %v5257_v26 = vld [vmem:[%s6811_s1 + $0xb0] sm:$0xff] }
 0x501   :  { %v3500_v15 = vpack.c.bf16 %v3368_v27, %v3364_v34  ;;  %v3502_v32 = vpack.c.bf16 %v3370_v13, %v3366_v40  ;;  %v3033_v59 = vpop.f32.mrb[156].mxu0  ;;  %v3226_v60 = vpop.f32.mrb[156].mxu1  ;;  %4414 = vperm.xlu0 %4970, %v5255_v57   ;;  %3628 = vperm.xlu1 %4968, %v5257_v26  }
 0x502   :  { %v3034_v24 = vadd.f32 %v3033_v59, %v2699_v50  ;;  %v3227_v23 = vadd.f32 %v3226_v60, %v2699_v50  ;;  %v3035_v38 = vpop.f32.mrb[157].mxu0  ;;  %v3228_v14 = vpop.f32.mrb[157].mxu1 }
 0x503   :  { %v3036_v61 = vadd.f32 %v3035_v38, %v2699_v50  ;;  %v3229_v56 = vadd.f32 %v3228_v14, %v2699_v50  ;;  %v3037_v5 = vpop.f32.mrb[158].mxu0  ;;  %v3230_v43 = vpop.f32.mrb[158].mxu1  ;;  %3839 = vmatprep.subr.bf16.mxu0 %v3500_v15  ;;  %4032 = vmatprep.subr.bf16.mxu1 %v3502_v32  ;;  %v5258_v38 = vld [vmem:[%s6811_s1 + $0xc0] sm:$0xff] }
 0x504   :  { %v3038_v30 = vadd.f32 %v3037_v5, %v2703_v29  ;;  %v3231_v54 = vadd.f32 %v3230_v43, %v2703_v29  ;;  %v3039_v46 = vpop.f32.mrb[159].mxu0  ;;  %v3232_v62 = vpop.f32.mrb[159].mxu1  ;;  %3840 = vmatpush1.bf16.msra.mxu0 %v3499_v51  ;;  %4033 = vmatpush1.bf16.msra.mxu1 %v3501_v52  ;;  %v3371_v58 = vmax.f32 %v3034_v24, 0.0  ;;  %v3373_v53 = vmax.f32 %v3227_v23, 0.0 }
 0x505   :  { %v3040_v2 = vadd.f32 %v3039_v46, %v2703_v29  ;;  %v3233_v11 = vadd.f32 %v3232_v62, %v2703_v29  ;;  %v3372_v63 = vmax.f32 %v3036_v61, 0.0  ;;  %v3374_v7 = vmax.f32 %v3229_v56, 0.0  ;;  %4422 = vperm.xlu0 %4970, %v5256_v35   ;;  %v2715_v52 = vpop.permute.xlu0 %2714  ;;  %v2719_v15 = vpop.permute.xlu1 %2718  ;;  %3636 = vperm.xlu1 %4968, %v5258_v38  }
 0x506   :  { %v3375_v4 = vmax.f32 %v3038_v30, 0.0  ;;  %v3377_v41 = vmax.f32 %v3231_v54, 0.0 }
 0x507   :  { %v3376_v1 = vmax.f32 %v3040_v2, 0.0  ;;  %v3378_v16 = vmax.f32 %v3233_v11, 0.0 }
 0x508   :  { %v3503_v10 = vpack.c.bf16 %v3375_v4, %v3371_v58  ;;  %v3505_v36 = vpack.c.bf16 %v3377_v41, %v3373_v53  ;;  %v6394_v4 = vld [vmem:[%s6811_s1 + $0xd0] sm:$0xff] }
 0x509   :  { %v3504_v45 = vpack.c.bf16 %v3376_v1, %v3372_v63  ;;  %v3506_v18 = vpack.c.bf16 %v3378_v16, %v3374_v7  ;;  %v3043_v6 = vpop.f32.mrb[160].mxu0  ;;  %v3236_v9 = vpop.f32.mrb[160].mxu1  ;;  %4430 = vperm.xlu0 %4970, %v5257_v26   ;;  %3644 = vperm.xlu1 %4968, %v6394_v4  }
 0x50a   :  { %v3044_v44 = vadd.f32 %v3043_v6, %v2707_v20  ;;  %v3237_v21 = vadd.f32 %v3236_v9, %v2707_v20  ;;  %v3045_v39 = vpop.f32.mrb[161].mxu0  ;;  %v3238_v55 = vpop.f32.mrb[161].mxu1 }
 0x50b   :  { %v3046_v3 = vadd.f32 %v3045_v39, %v2707_v20  ;;  %v3239_v48 = vadd.f32 %v3238_v55, %v2707_v20  ;;  %v3047_v0 = vpop.f32.mrb[162].mxu0  ;;  %v3240_v17 = vpop.f32.mrb[162].mxu1  ;;  %3841 = vmatprep.subr.bf16.mxu0 %v3504_v45  ;;  %4034 = vmatprep.subr.bf16.mxu1 %v3506_v18 }
 0x50c   :  { %v3048_v25 = vadd.f32 %v3047_v0, %v2711_v19  ;;  %v3241_v47 = vadd.f32 %v3240_v17, %v2711_v19  ;;  %v3049_v8 = vpop.f32.mrb[163].mxu0  ;;  %v3242_v42 = vpop.f32.mrb[163].mxu1  ;;  %3842 = vmatpush1.bf16.msra.mxu0 %v3503_v10  ;;  %4035 = vmatpush1.bf16.msra.mxu1 %v3505_v36  ;;  %v3379_v28 = vmax.f32 %v3044_v44, 0.0  ;;  %v3381_v34 = vmax.f32 %v3237_v21, 0.0  ;;  %v6401_v0 = vld [vmem:[%s6811_s1] sm:$0xff]  ;;  %v6407_v17 = vld [vmem:[%s6811_s1 + $0xd8] sm:$0xff] }
 0x50d   :  { %v3050_v31 = vadd.f32 %v3049_v8, %v2711_v19  ;;  %v3243_v22 = vadd.f32 %v3242_v42, %v2711_v19  ;;  %v3380_v13 = vmax.f32 %v3046_v3, 0.0  ;;  %v3382_v50 = vmax.f32 %v3239_v48, 0.0  ;;  %4438 = vperm.xlu0 %4970, %v5258_v38   ;;  %v2723_v36 = vpop.permute.xlu0 %2722  ;;  %v2727_v45 = vpop.permute.xlu1 %2726  ;;  %4969 = vset.pattern.permute.xlu1 %v5284_v33 }
 0x50e   :  { %v3383_v40 = vmax.f32 %v3048_v25, 0.0  ;;  %v3385_v27 = vmax.f32 %v3241_v47, 0.0  ;;  %4342 = vperm.xlu1 %4969, %v6401_v0  }
 0x50f   :  { %v3384_v29 = vmax.f32 %v3050_v31, 0.0  ;;  %v3386_v51 = vmax.f32 %v3243_v22, 0.0 }
 0x510   :  { %v3507_v32 = vpack.c.bf16 %v3383_v40, %v3379_v28  ;;  %v3509_v59 = vpack.c.bf16 %v3385_v27, %v3381_v34 }
 0x511   :  { %v3508_v60 = vpack.c.bf16 %v3384_v29, %v3380_v13  ;;  %v3510_v37 = vpack.c.bf16 %v3386_v51, %v3382_v50  ;;  %v3053_v24 = vpop.f32.mrb[164].mxu0  ;;  %v3246_v23 = vpop.f32.mrb[164].mxu1  ;;  %4450 = vperm.xlu0 %4970, %v6407_v17  }
 0x512   :  { %v3054_v14 = vadd.f32 %v3053_v24, %v2715_v52  ;;  %v3247_v61 = vadd.f32 %v3246_v23, %v2715_v52  ;;  %v3055_v56 = vpop.f32.mrb[165].mxu0  ;;  %v3248_v5 = vpop.f32.mrb[165].mxu1  ;;  %4350 = vperm.xlu1 %4969, %v6354_v12  }
 0x513   :  { %v3056_v43 = vadd.f32 %v3055_v56, %v2715_v52  ;;  %v3249_v30 = vadd.f32 %v3248_v5, %v2715_v52  ;;  %v3057_v54 = vpop.f32.mrb[166].mxu0  ;;  %v3250_v46 = vpop.f32.mrb[166].mxu1  ;;  %3843 = vmatprep.subr.bf16.mxu0 %v3508_v60  ;;  %4036 = vmatprep.subr.bf16.mxu1 %v3510_v37 }
 0x514   :  { %v3058_v62 = vadd.f32 %v3057_v54, %v2719_v15  ;;  %v3251_v2 = vadd.f32 %v3250_v46, %v2719_v15  ;;  %v3059_v11 = vpop.f32.mrb[167].mxu0  ;;  %v3252_v57 = vpop.f32.mrb[167].mxu1  ;;  %3844 = vmatpush1.bf16.msra.mxu0 %v3507_v32  ;;  %4037 = vmatpush1.bf16.msra.mxu1 %v3509_v59  ;;  %v3387_v41 = vmax.f32 %v3054_v14, 0.0  ;;  %v3389_v63 = vmax.f32 %v3247_v61, 0.0 }
 0x515   :  { %v3060_v58 = vadd.f32 %v3059_v11, %v2719_v15  ;;  %v3253_v53 = vadd.f32 %v3252_v57, %v2719_v15  ;;  %v3388_v16 = vmax.f32 %v3056_v43, 0.0  ;;  %v3390_v20 = vmax.f32 %v3249_v30, 0.0  ;;  %4972 = vset.pattern.permute.xlu0 %v5283_v49  ;;  %v2731_v59 = vpop.permute.xlu0 %2730  ;;  %v2735_v60 = vpop.permute.xlu1 %2734  ;;  %v5262_v30 = vld [vmem:[%s6811_s1 + $0x18] sm:$0xff] }
 0x516   :  { %v3391_v7 = vmax.f32 %v3058_v62, 0.0  ;;  %v3393_v1 = vmax.f32 %v3251_v2, 0.0  ;;  %3540 = vperm.xlu0 %4972, %v6401_v0   ;;  %4354 = vperm.xlu1 %4969, %v5262_v30  }
 0x517   :  { %v3392_v19 = vmax.f32 %v3060_v58, 0.0  ;;  %v3394_v10 = vmax.f32 %v3253_v53, 0.0 }
 0x518   :  { %v3511_v18 = vpack.c.bf16 %v3391_v7, %v3387_v41  ;;  %v3513_v6 = vpack.c.bf16 %v3393_v1, %v3389_v63 }
 0x519   :  { %v3512_v9 = vpack.c.bf16 %v3392_v19, %v3388_v16  ;;  %v3514_v35 = vpack.c.bf16 %v3394_v10, %v3390_v20  ;;  %v3063_v44 = vpop.f32.mrb[168].mxu0  ;;  %v3256_v21 = vpop.f32.mrb[168].mxu1  ;;  %v5263_v19 = vld [vmem:[%s6811_s1 + $0x28] sm:$0xff] }
 0x51a   :  { %v3064_v39 = vadd.f32 %v3063_v44, %v2723_v36  ;;  %v3257_v55 = vadd.f32 %v3256_v21, %v2723_v36  ;;  %v3065_v3 = vpop.f32.mrb[169].mxu0  ;;  %v3258_v48 = vpop.f32.mrb[169].mxu1  ;;  %3552 = vperm.xlu0 %4972, %v5262_v30   ;;  %4362 = vperm.xlu1 %4969, %v5263_v19  }
 0x51b   :  { %v3066_v25 = vadd.f32 %v3065_v3, %v2723_v36  ;;  %v3259_v47 = vadd.f32 %v3258_v48, %v2723_v36  ;;  %v3067_v8 = vpop.f32.mrb[170].mxu0  ;;  %v3260_v42 = vpop.f32.mrb[170].mxu1  ;;  %3845 = vmatprep.subr.bf16.mxu0 %v3512_v9  ;;  %4038 = vmatprep.subr.bf16.mxu1 %v3514_v35 }
 0x51c   :  { %v3068_v31 = vadd.f32 %v3067_v8, %v2727_v45  ;;  %v3261_v22 = vadd.f32 %v3260_v42, %v2727_v45  ;;  %v3069_v26 = vpop.f32.mrb[171].mxu0  ;;  %v3262_v28 = vpop.f32.mrb[171].mxu1  ;;  %3846 = vmatpush1.bf16.msra.mxu0 %v3511_v18  ;;  %4039 = vmatpush1.bf16.msra.mxu1 %v3513_v6  ;;  %v3395_v27 = vmax.f32 %v3064_v39, 0.0  ;;  %v3397_v13 = vmax.f32 %v3257_v55, 0.0  ;;  %v5264_v42 = vld [vmem:[%s6811_s1 + $0x38] sm:$0xff] }
 0x51d   :  { %v3070_v34 = vadd.f32 %v3069_v26, %v2727_v45  ;;  %v3263_v40 = vadd.f32 %v3262_v28, %v2727_v45  ;;  %v3396_v51 = vmax.f32 %v3066_v25, 0.0  ;;  %v3398_v52 = vmax.f32 %v3259_v47, 0.0  ;;  %v2739_v6 = vpop.permute.xlu0 %2738  ;;  %v2743_v9 = vpop.permute.xlu1 %2742 }
 0x51e   :  { %v3399_v50 = vmax.f32 %v3068_v31, 0.0  ;;  %v3401_v29 = vmax.f32 %v3261_v22, 0.0  ;;  %3560 = vperm.xlu0 %4972, %v5263_v19   ;;  %4370 = vperm.xlu1 %4969, %v5264_v42  }
 0x51f   :  { %v3400_v15 = vmax.f32 %v3070_v34, 0.0  ;;  %v3402_v32 = vmax.f32 %v3263_v40, 0.0 }
 0x520   :  { %v3515_v37 = vpack.c.bf16 %v3399_v50, %v3395_v27  ;;  %v3517_v24 = vpack.c.bf16 %v3401_v29, %v3397_v13 }
 0x521   :  { %v3516_v23 = vpack.c.bf16 %v3400_v15, %v3396_v51  ;;  %v3518_v38 = vpack.c.bf16 %v3402_v32, %v3398_v52  ;;  %v3073_v14 = vpop.f32.mrb[172].mxu0  ;;  %v3266_v61 = vpop.f32.mrb[172].mxu1 }
 0x522   :  { %v3074_v56 = vadd.f32 %v3073_v14, %v2731_v59  ;;  %v3267_v5 = vadd.f32 %v3266_v61, %v2731_v59  ;;  %v3075_v43 = vpop.f32.mrb[173].mxu0  ;;  %v3268_v12 = vpop.f32.mrb[173].mxu1  ;;  %3568 = vperm.xlu0 %4972, %v5264_v42  }
 0x523   :  { %v3076_v54 = vadd.f32 %v3075_v43, %v2731_v59  ;;  %v3269_v46 = vadd.f32 %v3268_v12, %v2731_v59  ;;  %v3077_v62 = vpop.f32.mrb[174].mxu0  ;;  %v3270_v2 = vpop.f32.mrb[174].mxu1  ;;  %3847 = vmatprep.subr.bf16.mxu0 %v3516_v23  ;;  %4040 = vmatprep.subr.bf16.mxu1 %v3518_v38  ;;  %v5265_v59 = vld [vmem:[%s6811_s1 + $0x48] sm:$0xff] }
 0x524   :  { %v3078_v11 = vadd.f32 %v3077_v62, %v2735_v60  ;;  %v3271_v57 = vadd.f32 %v3270_v2, %v2735_v60  ;;  %v3079_v58 = vpop.f32.mrb[175].mxu0  ;;  %v3272_v53 = vpop.f32.mrb[175].mxu1  ;;  %3848 = vmatpush1.bf16.msra.mxu0 %v3515_v37  ;;  %4041 = vmatpush1.bf16.msra.mxu1 %v3517_v24  ;;  %v3403_v7 = vmax.f32 %v3074_v56, 0.0  ;;  %v3405_v1 = vmax.f32 %v3267_v5, 0.0 }
 0x525   :  { %v3080_v41 = vadd.f32 %v3079_v58, %v2735_v60  ;;  %v3273_v63 = vadd.f32 %v3272_v53, %v2735_v60  ;;  %v3404_v10 = vmax.f32 %v3076_v54, 0.0  ;;  %v3406_v36 = vmax.f32 %v3269_v46, 0.0  ;;  %4378 = vperm.xlu1 %4969, %v5265_v59   ;;  %v2747_v38 = vpop.permute.xlu0 %2746  ;;  %v2751_v14 = vpop.permute.xlu1 %2750 }
 0x526   :  { %v3407_v16 = vmax.f32 %v3078_v11, 0.0  ;;  %v3409_v20 = vmax.f32 %v3271_v57, 0.0  ;;  %3576 = vperm.xlu0 %4972, %v5265_v59   ;;  %v5266_v11 = vld [vmem:[%s6811_s1 + $0x58] sm:$0xff] }
 0x527   :  { %v3408_v45 = vmax.f32 %v3080_v41, 0.0  ;;  %v3410_v18 = vmax.f32 %v3273_v63, 0.0 }
 0x528   :  { %v3519_v35 = vpack.c.bf16 %v3407_v16, %v3403_v7  ;;  %v3521_v44 = vpack.c.bf16 %v3409_v20, %v3405_v1 }
 0x529   :  { %v3520_v21 = vpack.c.bf16 %v3408_v45, %v3404_v10  ;;  %v3522_v39 = vpack.c.bf16 %v3410_v18, %v3406_v36  ;;  %v3083_v55 = vpop.f32.mrb[176].mxu0  ;;  %v3276_v3 = vpop.f32.mrb[176].mxu1  ;;  %4386 = vperm.xlu1 %4969, %v5266_v11  }
 0x52a   :  { %v3084_v48 = vadd.f32 %v3083_v55, %v2739_v6  ;;  %v3277_v25 = vadd.f32 %v3276_v3, %v2739_v6  ;;  %v3085_v47 = vpop.f32.mrb[177].mxu0  ;;  %v3278_v8 = vpop.f32.mrb[177].mxu1  ;;  %3584 = vperm.xlu0 %4972, %v5266_v11  }
 0x52b   :  { %v3086_v31 = vadd.f32 %v3085_v47, %v2739_v6  ;;  %v3279_v22 = vadd.f32 %v3278_v8, %v2739_v6  ;;  %v3087_v26 = vpop.f32.mrb[178].mxu0  ;;  %v3280_v28 = vpop.f32.mrb[178].mxu1  ;;  %3849 = vmatprep.subr.bf16.mxu0 %v3520_v21  ;;  %4042 = vmatprep.subr.bf16.mxu1 %v3522_v39  ;;  %v5267_v6 = vld [vmem:[%s6811_s1 + $0x68] sm:$0xff] }
 0x52c   :  { %v3088_v34 = vadd.f32 %v3087_v26, %v2743_v9  ;;  %v3281_v40 = vadd.f32 %v3280_v28, %v2743_v9  ;;  %v3089_v27 = vpop.f32.mrb[179].mxu0  ;;  %v3282_v13 = vpop.f32.mrb[179].mxu1  ;;  %3850 = vmatpush1.bf16.msra.mxu0 %v3519_v35  ;;  %4043 = vmatpush1.bf16.msra.mxu1 %v3521_v44  ;;  %v3411_v51 = vmax.f32 %v3084_v48, 0.0  ;;  %v3413_v52 = vmax.f32 %v3277_v25, 0.0 }
 0x52d   :  { %v3090_v50 = vadd.f32 %v3089_v27, %v2743_v9  ;;  %v3283_v29 = vadd.f32 %v3282_v13, %v2743_v9  ;;  %v3412_v60 = vmax.f32 %v3086_v31, 0.0  ;;  %v3414_v37 = vmax.f32 %v3279_v22, 0.0  ;;  %4394 = vperm.xlu1 %4969, %v5267_v6   ;;  %v2755_v39 = vpop.permute.xlu0 %2754  ;;  %v2759_v55 = vpop.permute.xlu1 %2758 }
 0x52e   :  { %v3415_v15 = vmax.f32 %v3088_v34, 0.0  ;;  %v3417_v32 = vmax.f32 %v3281_v40, 0.0  ;;  %3592 = vperm.xlu0 %4972, %v5267_v6   ;;  %v5268_v34 = vld [vmem:[%s6811_s1 + $0x78] sm:$0xff] }
 0x52f   :  { %v3416_v24 = vmax.f32 %v3090_v50, 0.0  ;;  %v3418_v23 = vmax.f32 %v3283_v29, 0.0 }
 0x530   :  { %v3523_v61 = vpack.c.bf16 %v3415_v15, %v3411_v51  ;;  %v3525_v56 = vpack.c.bf16 %v3417_v32, %v3413_v52 }
 0x531   :  { %v3524_v5 = vpack.c.bf16 %v3416_v24, %v3412_v60  ;;  %v3526_v43 = vpack.c.bf16 %v3418_v23, %v3414_v37  ;;  %v3093_v12 = vpop.f32.mrb[180].mxu0  ;;  %v3286_v30 = vpop.f32.mrb[180].mxu1  ;;  %4402 = vperm.xlu1 %4969, %v5268_v34  }
 0x532   :  { %v3094_v54 = vadd.f32 %v3093_v12, %v2747_v38  ;;  %v3287_v46 = vadd.f32 %v3286_v30, %v2747_v38  ;;  %v3095_v62 = vpop.f32.mrb[181].mxu0  ;;  %v3288_v2 = vpop.f32.mrb[181].mxu1  ;;  %3600 = vperm.xlu0 %4972, %v5268_v34   ;;  %v5273_v34 = vld [vmem:[%s6811_s1 + $0xc8] sm:$0xff] }
 0x533   :  { %v3096_v57 = vadd.f32 %v3095_v62, %v2747_v38  ;;  %v3289_v58 = vadd.f32 %v3288_v2, %v2747_v38  ;;  %v3097_v53 = vpop.f32.mrb[182].mxu0  ;;  %v3290_v41 = vpop.f32.mrb[182].mxu1  ;;  %3851 = vmatprep.subr.bf16.mxu0 %v3524_v5  ;;  %4044 = vmatprep.subr.bf16.mxu1 %v3526_v43  ;;  %v5269_v38 = vld [vmem:[%s6811_s1 + $0x88] sm:$0xff] }
 0x534   :  { %v3098_v63 = vadd.f32 %v3097_v53, %v2751_v14  ;;  %v3291_v7 = vadd.f32 %v3290_v41, %v2751_v14  ;;  %v3099_v1 = vpop.f32.mrb[183].mxu0  ;;  %v3292_v16 = vpop.f32.mrb[183].mxu1  ;;  %3852 = vmatpush1.bf16.msra.mxu0 %v3523_v61  ;;  %4045 = vmatpush1.bf16.msra.mxu1 %v3525_v56  ;;  %v3419_v10 = vmax.f32 %v3094_v54, 0.0  ;;  %v3421_v36 = vmax.f32 %v3287_v46, 0.0 }
 0x535   :  { %v3100_v20 = vadd.f32 %v3099_v1, %v2751_v14  ;;  %v3293_v19 = vadd.f32 %v3292_v16, %v2751_v14  ;;  %v3420_v9 = vmax.f32 %v3096_v57, 0.0  ;;  %v3422_v35 = vmax.f32 %v3289_v58, 0.0  ;;  %4410 = vperm.xlu1 %4969, %v5269_v38   ;;  %v2763_v43 = vpop.permute.xlu0 %2762  ;;  %v2767_v12 = vpop.permute.xlu1 %2766 }
 0x536   :  { %v3423_v45 = vmax.f32 %v3098_v63, 0.0  ;;  %v3425_v18 = vmax.f32 %v3291_v7, 0.0  ;;  %3608 = vperm.xlu0 %4972, %v5269_v38   ;;  %v5270_v63 = vld [vmem:[%s6811_s1 + $0x98] sm:$0xff]  ;;  %v5147_v38 = vld [vmem:[%s6816_s5 + $0x80] ss:$8 sps:$4 sm:$0xff]  }
 0x537   :  { %v3424_v44 = vmax.f32 %v3100_v20, 0.0  ;;  %v3426_v21 = vmax.f32 %v3293_v19, 0.0 }
 0x538   :  { %v3527_v3 = vpack.c.bf16 %v3423_v45, %v3419_v10  ;;  %v3529_v48 = vpack.c.bf16 %v3425_v18, %v3421_v36 }
 0x539   :  { %v3528_v25 = vpack.c.bf16 %v3424_v44, %v3420_v9  ;;  %v3530_v47 = vpack.c.bf16 %v3426_v21, %v3422_v35  ;;  %v3103_v8 = vpop.f32.mrb[184].mxu0  ;;  %v3296_v42 = vpop.f32.mrb[184].mxu1  ;;  %4418 = vperm.xlu1 %4969, %v5270_v63  }
 0x53a   :  { %v3104_v31 = vadd.f32 %v3103_v8, %v2755_v39  ;;  %v3297_v22 = vadd.f32 %v3296_v42, %v2755_v39  ;;  %v3105_v26 = vpop.f32.mrb[185].mxu0  ;;  %v3298_v28 = vpop.f32.mrb[185].mxu1  ;;  %3616 = vperm.xlu0 %4972, %v5270_v63  }
 0x53b   :  { %v3106_v40 = vadd.f32 %v3105_v26, %v2755_v39  ;;  %v3299_v27 = vadd.f32 %v3298_v28, %v2755_v39  ;;  %v3107_v13 = vpop.f32.mrb[186].mxu0  ;;  %v3300_v50 = vpop.f32.mrb[186].mxu1  ;;  %3853 = vmatprep.subr.bf16.mxu0 %v3528_v25  ;;  %4046 = vmatprep.subr.bf16.mxu1 %v3530_v47  ;;  %v5271_v39 = vld [vmem:[%s6811_s1 + $0xa8] sm:$0xff]  ;;  %v5124_v28 = vld [vmem:[%s6816_s5 + $0x14] ss:$8 sps:$4 sm:$0xff]  }
 0x53c   :  { %v3108_v29 = vadd.f32 %v3107_v13, %v2759_v55  ;;  %v3301_v51 = vadd.f32 %v3300_v50, %v2759_v55  ;;  %v3109_v52 = vpop.f32.mrb[187].mxu0  ;;  %v3302_v15 = vpop.f32.mrb[187].mxu1  ;;  %3854 = vmatpush1.bf16.msra.mxu0 %v3527_v3  ;;  %4047 = vmatpush1.bf16.msra.mxu1 %v3529_v48  ;;  %v3427_v60 = vmax.f32 %v3104_v31, 0.0  ;;  %v3429_v37 = vmax.f32 %v3297_v22, 0.0  ;;  %v5272_v22 = vld [vmem:[%s6811_s1 + $0xb8] sm:$0xff]  ;;  %v5275_v13 = vld [vmem:[%s6811_s1 + $0xe8] sm:$0xff] }
 0x53d   :  { %v3110_v32 = vadd.f32 %v3109_v52, %v2759_v55  ;;  %v3303_v59 = vadd.f32 %v3302_v15, %v2759_v55  ;;  %v3428_v14 = vmax.f32 %v3106_v40, 0.0  ;;  %v3430_v61 = vmax.f32 %v3299_v27, 0.0  ;;  %4426 = vperm.xlu1 %4969, %v5271_v39   ;;  %v5121_v26 = vld [vmem:[%s6816_s5] ss:$8 sps:$4 sm:$0xff]   ;;  %v5126_v40 = vld [vmem:[%s6816_s5 + $0x10] ss:$8 sps:$4 sm:$0xff]  }
 0x53e   :  { %v3431_v24 = vmax.f32 %v3108_v29, 0.0  ;;  %v3433_v23 = vmax.f32 %v3301_v51, 0.0  ;;  %3624 = vperm.xlu0 %4972, %v5271_v39   ;;  %v5127_v27 = vld [vmem:[%s6816_s5 + $0x24] ss:$8 sps:$4 sm:$0xff]   ;;  %v5276_v50 = vld [vmem:[%s6811_s1 + $0xf8] sm:$0xff]  ;;  %v5277_v29 = vld [vmem:[%s6811_s1 + $0xf0] sm:$0xff] }
 0x53f   :  { %v3432_v56 = vmax.f32 %v3110_v32, 0.0  ;;  %v3434_v5 = vmax.f32 %v3303_v59, 0.0  ;;  %v5132_v51 = vld [vmem:[%s6816_s5 + $0x30] ss:$8 sps:$4 sm:$0xff]   ;;  %v5133_v52 = vld [vmem:[%s6816_s5 + $0x44] ss:$8 sps:$4 sm:$0xff]  }
 0x540   :  { %v3531_v30 = vpack.c.bf16 %v3431_v24, %v3427_v60  ;;  %v3533_v54 = vpack.c.bf16 %v3433_v23, %v3429_v37  ;;  %v5136_v15 = vld [vmem:[%s6816_s5 + $0x54] ss:$8 sps:$4 sm:$0xff]   ;;  %v5138_v32 = vld [vmem:[%s6816_s5 + $0x50] ss:$8 sps:$4 sm:$0xff]   ;;  %v5139_v59 = vld [vmem:[%s6816_s5 + $0x64] ss:$8 sps:$4 sm:$0xff]  }
 0x541   :  { %v3532_v46 = vpack.c.bf16 %v3432_v56, %v3428_v14  ;;  %v3534_v62 = vpack.c.bf16 %v3434_v5, %v3430_v61  ;;  %v3113_v2 = vpop.f32.mrb[188].mxu0  ;;  %v3306_v11 = vpop.f32.mrb[188].mxu1  ;;  %4434 = vperm.xlu1 %4969, %v5272_v22   ;;  %v5141_v60 = vld [vmem:[%s6816_s5 + $0x60] ss:$8 sps:$4 sm:$0xff]   ;;  %v5142_v37 = vld [vmem:[%s6816_s5 + $0x74] ss:$8 sps:$4 sm:$0xff]  }
 0x542   :  { %v3114_v57 = vadd.f32 %v3113_v2, %v2763_v43  ;;  %v3307_v58 = vadd.f32 %v3306_v11, %v2763_v43  ;;  %v3115_v53 = vpop.f32.mrb[189].mxu0  ;;  %v3308_v41 = vpop.f32.mrb[189].mxu1  ;;  %3632 = vperm.xlu0 %4972, %v5272_v22   ;;  %v5144_v24 = vld [vmem:[%s6816_s5 + $0x70] ss:$8 sps:$4 sm:$0xff]   ;;  %v5145_v23 = vld [vmem:[%s6816_s5 + $0x84] ss:$8 sps:$4 sm:$0xff]  }
 0x543   :  { %v3116_v7 = vadd.f32 %v3115_v53, %v2763_v43  ;;  %v3309_v1 = vadd.f32 %v3308_v41, %v2763_v43  ;;  %v3117_v16 = vpop.f32.mrb[190].mxu0  ;;  %v3310_v20 = vpop.f32.mrb[190].mxu1  ;;  %3855 = vmatprep.subr.bf16.mxu0 %v3532_v46  ;;  %4048 = vmatprep.subr.bf16.mxu1 %v3534_v62  ;;  %v5148_v14 = vld [vmem:[%s6816_s5 + $0x94] ss:$8 sps:$4 sm:$0xff]   ;;  %v5150_v61 = vld [vmem:[%s6816_s5 + $0x90] ss:$8 sps:$4 sm:$0xff]  }
 0x544   :  { %v3118_v19 = vadd.f32 %v3117_v16, %v2767_v12  ;;  %v3311_v10 = vadd.f32 %v3310_v20, %v2767_v12  ;;  %v3119_v36 = vpop.f32.mrb[191].mxu0  ;;  %v3312_v45 = vpop.f32.mrb[191].mxu1  ;;  %3856 = vmatpush1.bf16.msra.mxu0 %v3531_v30  ;;  %4049 = vmatpush1.bf16.msra.mxu1 %v3533_v54  ;;  %v3435_v9 = vmax.f32 %v3114_v57, 0.0  ;;  %v3437_v35 = vmax.f32 %v3307_v58, 0.0  ;;  %v5151_v56 = vld [vmem:[%s6816_s5 + $0xa4] ss:$8 sps:$4 sm:$0xff]  }
 0x545   :  { %v3120_v18 = vadd.f32 %v3119_v36, %v2767_v12  ;;  %v3313_v6 = vadd.f32 %v3312_v45, %v2767_v12  ;;  %v3436_v55 = vmax.f32 %v3116_v7, 0.0  ;;  %v3438_v3 = vmax.f32 %v3309_v1, 0.0  ;;  %4442 = vperm.xlu1 %4969, %v5273_v34   ;;  %v5153_v5 = vld [vmem:[%s6816_s5 + $0xa0] ss:$8 sps:$4 sm:$0xff]   ;;  %v5154_v43 = vld [vmem:[%s6816_s5 + $0xb4] ss:$8 sps:$4 sm:$0xff]  }
 0x546   :  { %v3439_v44 = vmax.f32 %v3118_v19, 0.0  ;;  %v3441_v21 = vmax.f32 %v3311_v10, 0.0  ;;  %3640 = vperm.xlu0 %4972, %v5273_v34   ;;  %v5156_v12 = vld [vmem:[%s6816_s5 + $0xb0] ss:$8 sps:$4 sm:$0xff]   ;;  %v5157_v30 = vld [vmem:[%s6816_s5 + $0xc4] ss:$8 sps:$4 sm:$0xff]  }
 0x547   :  { %v3440_v48 = vmax.f32 %v3120_v18, 0.0  ;;  %v3442_v25 = vmax.f32 %v3313_v6, 0.0  ;;  %v5159_v54 = vld [vmem:[%s6816_s5 + $0xc0] ss:$8 sps:$4 sm:$0xff]   ;;  %v5160_v46 = vld [vmem:[%s6816_s5 + $0xd4] ss:$8 sps:$4 sm:$0xff]  }
 0x548   :  { %v3535_v47 = vpack.c.bf16 %v3439_v44, %v3435_v9  ;;  %v3537_v8 = vpack.c.bf16 %v3441_v21, %v3437_v35  ;;  %v5162_v62 = vld [vmem:[%s6816_s5 + $0xd0] ss:$8 sps:$4 sm:$0xff]   ;;  %v5163_v2 = vld [vmem:[%s6816_s5 + $0xe4] ss:$8 sps:$4 sm:$0xff]   ;;  %v5285_v11 = vmov 7  }
 0x549   :  { %v3536_v42 = vpack.c.bf16 %v3440_v48, %v3436_v55  ;;  %v3538_v31 = vpack.c.bf16 %v3442_v25, %v3438_v3  ;;  %4446 = vperm.xlu1 %4969, %v6394_v4   ;;  %v5274_v4 = vld [vmem:[%s6811_s1 + $0xe0] sm:$0xff]  ;;  %v5166_v53 = vld [vmem:[%s6816_s5 + $0xf4] ss:$8 sps:$4 sm:$0xff]  }
 0x54a   :  { %3648 = vperm.xlu0 %4972, %v6407_v17   ;;  %v5129_v17 = vld [vmem:[%s6816_s5 + $0x20] ss:$8 sps:$4 sm:$0xff]  }
 0x54b   :  { %3857 = vmatprep.subr.bf16.mxu0 %v3536_v42  ;;  %4050 = vmatprep.subr.bf16.mxu1 %v3538_v31  ;;  %v5165_v57 = vld [vmem:[%s6816_s5 + $0xe0] ss:$8 sps:$4 sm:$0xff]  }
 0x54c   :  { %3858 = vmatpush1.bf16.msra.mxu0 %v3535_v47  ;;  %4051 = vmatpush1.bf16.msra.mxu1 %v3537_v8 }
 0x54d   :  { %4971 = vset.pattern.permute.xlu1 %v5283_v49  ;;  %v5130_v49 = vld [vmem:[%s6816_s5 + $0x34] ss:$8 sps:$4 sm:$0xff]  }
 0x54e   :  { %3652 = vperm.xlu0 %4972, %v5274_v4   ;;  %3656 = vperm.xlu1 %4971, %v5275_v13  }
 0x54f   :  { %3860 = vmatmul.mubr.bf16.vlgmr.msra.gmra.mrb[192].mxu0 %v5121_v26  ;;  %4053 = vmatmul.mubr.bf16.vlgmr.msra.gmra.mrb[192].mxu1 %v5121_v26 }
 0x550   :  { %3869 = vmatprep.mubr.bf16.mxu0 %v5124_v28  ;;  %4062 = vmatprep.mubr.bf16.mxu1 %v5124_v28 }
 0x552   :  { %3664 = vperm.xlu0 %4972, %v5276_v50   ;;  %3660 = vperm.xlu1 %4971, %v5277_v29  }
 0x554   :  { %v3545_v58 = vpop.permute.xlu1 %3544 }
 0x556   :  { %4973 = vset.pattern.permute.xlu1 %v5284_v33  ;;  %4974 = vset.pattern.permute.xlu0 %v5284_v33  ;;  %v5135_v33 = vld [vmem:[%s6816_s5 + $0x40] ss:$8 sps:$4 sm:$0xff]  }
 0x557   :  { %3870 = vmatmul.mubr.bf16.gmra.mrb[196].mxu0 %v5126_v40  ;;  %4063 = vmatmul.mubr.bf16.gmra.mrb[196].mxu1 %v5126_v40 }
 0x558   :  { %3879 = vmatprep.mubr.bf16.mxu0 %v5127_v27  ;;  %4072 = vmatprep.mubr.bf16.mxu1 %v5127_v27  ;;  %v6557_v41 = vpop.permute.xlu1 %3548 }
 0x559   :  { %4454 = vperm.xlu1 %4973, %v5274_v4   ;;  %4466 = vperm.xlu0 %4974, %v5276_v50  }
 0x55c   :  { %v6562_v63 = vpop.permute.xlu1 %3556 }
 0x55d   :  { %4458 = vperm.xlu1 %4973, %v5275_v13   ;;  %4976 = vset.pattern.permute.xlu0 %v5285_v11 }
 0x55f   :  { %3880 = vmatmul.mubr.bf16.gmra.mrb[200].mxu0 %v5129_v17  ;;  %4073 = vmatmul.mubr.bf16.gmra.mrb[200].mxu1 %v5129_v17  ;;  %v4347_v1 = vpop.permute.xlu0 %4346 }
 0x560   :  { %3889 = vmatprep.mubr.bf16.mxu0 %v5130_v49  ;;  %4082 = vmatprep.mubr.bf16.mxu1 %v5130_v49  ;;  %v6564_v7 = vpop.permute.xlu1 %3564 }
 0x561   :  { %4462 = vperm.xlu1 %4973, %v5277_v29  }
 0x564   :  { %v6566_v16 = vpop.permute.xlu1 %3572  ;;  %v6568_v20 = vpop.permute.xlu0 %4358 }
 0x565   :  { %4975 = vset.pattern.permute.xlu1 %v5285_v11 }
 0x566   :  { %4746 = vperm.xlu1 %4975, %v6401_v0   ;;  %v5168_v0 = vld [vmem:[%s6816_s5 + $0xf0] ss:$8 sps:$4 sm:$0xff]  }
 0x567   :  { %3890 = vmatmul.mubr.bf16.gmra.mrb[204].mxu0 %v5132_v51  ;;  %4083 = vmatmul.mubr.bf16.gmra.mrb[204].mxu1 %v5132_v51 }
 0x568   :  { %3899 = vmatprep.mubr.bf16.mxu0 %v5133_v52  ;;  %4092 = vmatprep.mubr.bf16.mxu1 %v5133_v52  ;;  %v6570_v19 = vpop.permute.xlu1 %3580  ;;  %v6572_v10 = vpop.permute.xlu0 %4366 }
 0x56c   :  { %v6574_v36 = vpop.permute.xlu1 %3588  ;;  %v6576_v45 = vpop.permute.xlu0 %4374 }
 0x56f   :  { %3900 = vmatmul.mubr.bf16.gmra.mrb[208].mxu0 %v5135_v33  ;;  %4093 = vmatmul.mubr.bf16.gmra.mrb[208].mxu1 %v5135_v33 }
 0x570   :  { %3909 = vmatprep.mubr.bf16.mxu0 %v5136_v15  ;;  %4102 = vmatprep.mubr.bf16.mxu1 %v5136_v15  ;;  %v6578_v18 = vpop.permute.xlu1 %3596  ;;  %v6580_v6 = vpop.permute.xlu0 %4382 }
 0x574   :  { %v6582_v9 = vpop.permute.xlu1 %3604  ;;  %v6584_v35 = vpop.permute.xlu0 %4390 }
 0x577   :  { %3910 = vmatmul.mubr.bf16.gmra.mrb[212].mxu0 %v5138_v32  ;;  %4103 = vmatmul.mubr.bf16.gmra.mrb[212].mxu1 %v5138_v32 }
 0x578   :  { %3919 = vmatprep.mubr.bf16.mxu0 %v5139_v59  ;;  %4112 = vmatprep.mubr.bf16.mxu1 %v5139_v59  ;;  %v6586_v44 = vpop.permute.xlu1 %3612  ;;  %v6588_v21 = vpop.permute.xlu0 %4398 }
 0x57c   :  { %v6590_v39 = vpop.permute.xlu1 %3620  ;;  %v6592_v55 = vpop.permute.xlu0 %4406 }
 0x57f   :  { %3920 = vmatmul.mubr.bf16.gmra.mrb[216].mxu0 %v5141_v60  ;;  %4113 = vmatmul.mubr.bf16.gmra.mrb[216].mxu1 %v5141_v60 }
 0x580   :  { %3929 = vmatprep.mubr.bf16.mxu0 %v5142_v37  ;;  %4122 = vmatprep.mubr.bf16.mxu1 %v5142_v37  ;;  %v6594_v3 = vpop.permute.xlu1 %3628  ;;  %v6596_v48 = vpop.permute.xlu0 %4414 }
 0x584   :  { %v6598_v25 = vpop.permute.xlu1 %3636  ;;  %v6600_v47 = vpop.permute.xlu0 %4422 }
 0x587   :  { %3930 = vmatmul.mubr.bf16.gmra.mrb[220].mxu0 %v5144_v24  ;;  %4123 = vmatmul.mubr.bf16.gmra.mrb[220].mxu1 %v5144_v24 }
 0x588   :  { %3939 = vmatprep.mubr.bf16.mxu0 %v5145_v23  ;;  %4132 = vmatprep.mubr.bf16.mxu1 %v5145_v23  ;;  %v6602_v8 = vpop.permute.xlu1 %3644  ;;  %v6604_v42 = vpop.permute.xlu0 %4430 }
 0x58c   :  { %v6606_v22 = vpop.permute.xlu0 %4438 }
 0x58d   :  { %v4343_v31 = vpop.permute.xlu1 %4342 }
 0x58f   :  { %3940 = vmatmul.mubr.bf16.gmra.mrb[224].mxu0 %v5147_v38  ;;  %4133 = vmatmul.mubr.bf16.gmra.mrb[224].mxu1 %v5147_v38 }
 0x590   :  { %3949 = vmatprep.mubr.bf16.mxu0 %v5148_v14  ;;  %4142 = vmatprep.mubr.bf16.mxu1 %v5148_v14  ;;  %v6610_v28 = vpop.permute.xlu0 %4450 }
 0x591   :  { %v6608_v26 = vpop.permute.xlu1 %4350 }
 0x595   :  { %v6612_v34 = vpop.permute.xlu1 %4354  ;;  %v3541_v40 = vpop.permute.xlu0 %3540 }
 0x597   :  { %3950 = vmatmul.mubr.bf16.gmra.mrb[228].mxu0 %v5150_v61  ;;  %4143 = vmatmul.mubr.bf16.gmra.mrb[228].mxu1 %v5150_v61 }
 0x598   :  { %3959 = vmatprep.mubr.bf16.mxu0 %v5151_v56  ;;  %4152 = vmatprep.mubr.bf16.mxu1 %v5151_v56 }
 0x599   :  { %v6614_v27 = vpop.permute.xlu1 %4362  ;;  %v3553_v11 = vpop.permute.xlu0 %3552 }
 0x59f   :  { %3960 = vmatmul.mubr.bf16.gmra.mrb[232].mxu0 %v5153_v5  ;;  %4153 = vmatmul.mubr.bf16.gmra.mrb[232].mxu1 %v5153_v5 }
 0x5a0   :  { %3969 = vmatprep.mubr.bf16.mxu0 %v5154_v43  ;;  %4162 = vmatprep.mubr.bf16.mxu1 %v5154_v43 }
 0x5a7   :  { %3970 = vmatmul.mubr.bf16.gmra.mrb[236].mxu0 %v5156_v12  ;;  %4163 = vmatmul.mubr.bf16.gmra.mrb[236].mxu1 %v5156_v12 }
 0x5a8   :  { %3979 = vmatprep.mubr.bf16.mxu0 %v5157_v30  ;;  %4172 = vmatprep.mubr.bf16.mxu1 %v5157_v30 }
 0x5af   :  { %3980 = vmatmul.mubr.bf16.gmra.mrb[240].mxu0 %v5159_v54  ;;  %4173 = vmatmul.mubr.bf16.gmra.mrb[240].mxu1 %v5159_v54 }
 0x5b0   :  { %3989 = vmatprep.mubr.bf16.mxu0 %v5160_v46  ;;  %4182 = vmatprep.mubr.bf16.mxu1 %v5160_v46 }
 0x5b7   :  { %3990 = vmatmul.mubr.bf16.gmra.mrb[244].mxu0 %v5162_v62  ;;  %4183 = vmatmul.mubr.bf16.gmra.mrb[244].mxu1 %v5162_v62 }
 0x5b8   :  { %3999 = vmatprep.mubr.bf16.mxu0 %v5163_v2  ;;  %4192 = vmatprep.mubr.bf16.mxu1 %v5163_v2 }
 0x5bf   :  { %4000 = vmatmul.mubr.bf16.gmra.mrb[248].mxu0 %v5165_v57  ;;  %4193 = vmatmul.mubr.bf16.gmra.mrb[248].mxu1 %v5165_v57  ;;  %v6616_v57 = vpop.permute.xlu1 %4370 }
 0x5c0   :  { %4009 = vmatprep.mubr.bf16.mxu0 %v5166_v53  ;;  %4202 = vmatprep.mubr.bf16.mxu1 %v5166_v53 }
 0x5c7   :  { %4010 = vmatmul.mubr.bf16.gmra.mrb[252].mxu0 %v5168_v0  ;;  %4203 = vmatmul.mubr.bf16.gmra.mrb[252].mxu1 %v5168_v0 }
 0x622   :  { %v3861_v4 = vpop.f32.mrb[192].mxu0  ;;  %v4054_v13 = vpop.f32.mrb[192].mxu1 }
 0x623   :  { %v3863_v17 = vpop.f32.mrb[193].mxu0  ;;  %v4056_v49 = vpop.f32.mrb[193].mxu1  ;;  %v3862_v50 = vadd.f32 %v3861_v4, %v3541_v40  ;;  %v4055_v29 = vadd.f32 %v4054_v13, %v3541_v40 }
 0x624   :  { %v3864_v51 = vadd.f32 %v3863_v17, %v3541_v40  ;;  %v4057_v52 = vadd.f32 %v4056_v49, %v3541_v40  ;;  %v3865_v33 = vpop.f32.mrb[194].mxu0  ;;  %v4058_v15 = vpop.f32.mrb[194].mxu1 }
 0x625   :  { %v4213_v32 = vmax.f32 %v3862_v50, 0.0  ;;  %v4215_v59 = vmax.f32 %v4055_v29, 0.0  ;;  %v3866_v60 = vadd.f32 %v3865_v33, %v3545_v58  ;;  %v4059_v37 = vadd.f32 %v4058_v15, %v3545_v58  ;;  %v3867_v24 = vpop.f32.mrb[195].mxu0  ;;  %v4060_v23 = vpop.f32.mrb[195].mxu1 }
 0x626   :  { %v4214_v38 = vmax.f32 %v3864_v51, 0.0  ;;  %v4216_v14 = vmax.f32 %v4057_v52, 0.0  ;;  %v3868_v61 = vadd.f32 %v3867_v24, %v3545_v58  ;;  %v4061_v56 = vadd.f32 %v4060_v23, %v3545_v58 }
 0x627   :  { %v4217_v5 = vmax.f32 %v3866_v60, 0.0  ;;  %v4219_v43 = vmax.f32 %v4059_v37, 0.0  ;;  %v4469_v54 = vmul.f32 %v4343_v31, %v4213_v32  ;;  %v4471_v62 = vmul.f32 %v4343_v31, %v4215_v59 }
 0x628   :  { %v4218_v12 = vmax.f32 %v3868_v61, 0.0  ;;  %v4220_v30 = vmax.f32 %v4061_v56, 0.0  ;;  %v4470_v53 = vmul.f32 %v4343_v31, %v4214_v38  ;;  %v4472_v40 = vmul.f32 %v4343_v31, %v4216_v14 }
 0x629   :  { %v4473_v46 = vmul.f32 %v4347_v1, %v4217_v5  ;;  %v4475_v2 = vmul.f32 %v4347_v1, %v4219_v43 }
 0x62a   :  { %v4474_v0 = vmul.f32 %v4347_v1, %v4218_v12  ;;  %v4476_v4 = vmul.f32 %v4347_v1, %v4220_v30  ;;  %v3871_v13 = vpop.f32.mrb[196].mxu0  ;;  %v4064_v17 = vpop.f32.mrb[196].mxu1 }
 0x62b   :  { %v4597_v49 = vadd.f32 %v4473_v46, %v4469_v54  ;;  %v4671_v50 = vadd.f32 %v4475_v2, %v4471_v62  ;;  %v3872_v58 = vadd.f32 %v3871_v13, %v6557_v41  ;;  %v4065_v29 = vadd.f32 %v4064_v17, %v6557_v41  ;;  %v3873_v51 = vpop.f32.mrb[197].mxu0  ;;  %v4066_v52 = vpop.f32.mrb[197].mxu1 }
 0x62c   :  { %v4634_v33 = vadd.f32 %v4474_v0, %v4470_v53  ;;  %v4708_v15 = vadd.f32 %v4476_v4, %v4472_v40  ;;  %v3874_v32 = vadd.f32 %v3873_v51, %v6557_v41  ;;  %v4067_v59 = vadd.f32 %v4066_v52, %v6557_v41  ;;  %v3875_v60 = vpop.f32.mrb[198].mxu0  ;;  %v4068_v37 = vpop.f32.mrb[198].mxu1 }
 0x62d   :  { %v4221_v31 = vmax.f32 %v3872_v58, 0.0  ;;  %v4223_v1 = vmax.f32 %v4065_v29, 0.0  ;;  %v3876_v24 = vadd.f32 %v3875_v60, %v3553_v11  ;;  %v4069_v23 = vadd.f32 %v4068_v37, %v3553_v11  ;;  %v3877_v38 = vpop.f32.mrb[199].mxu0  ;;  %v4070_v14 = vpop.f32.mrb[199].mxu1 }
 0x62e   :  { %v4222_v61 = vmax.f32 %v3874_v32, 0.0  ;;  %v4224_v56 = vmax.f32 %v4067_v59, 0.0  ;;  %v3878_v5 = vadd.f32 %v3877_v38, %v3553_v11  ;;  %v4071_v43 = vadd.f32 %v4070_v14, %v3553_v11  ;;  %v3561_v17 = vpop.permute.xlu0 %3560  ;;  %v6628_v11 = vpop.permute.xlu1 %4378 }
 0x62f   :  { %v4477_v12 = vmul.f32 %v6608_v26, %v4221_v31  ;;  %v4479_v30 = vmul.f32 %v6608_v26, %v4223_v1  ;;  %v4225_v54 = vmax.f32 %v3876_v24, 0.0  ;;  %v4227_v46 = vmax.f32 %v4069_v23, 0.0 }
 0x630   :  { %v4478_v41 = vmul.f32 %v6608_v26, %v4222_v61  ;;  %v4480_v62 = vmul.f32 %v6608_v26, %v4224_v56  ;;  %v4226_v2 = vmax.f32 %v3878_v5, 0.0  ;;  %v4228_v53 = vmax.f32 %v4071_v43, 0.0 }
 0x631   :  { %v4598_v0 = vadd.f32 %v4597_v49, %v4477_v12  ;;  %v4672_v40 = vadd.f32 %v4671_v50, %v4479_v30  ;;  %v4481_v4 = vmul.f32 %v6612_v34, %v4225_v54  ;;  %v4483_v13 = vmul.f32 %v6612_v34, %v4227_v46 }
 0x632   :  { %v4635_v58 = vadd.f32 %v4634_v33, %v4478_v41  ;;  %v4709_v29 = vadd.f32 %v4708_v15, %v4480_v62  ;;  %v4482_v51 = vmul.f32 %v6612_v34, %v4226_v2  ;;  %v4484_v52 = vmul.f32 %v6612_v34, %v4228_v53  ;;  %v3881_v32 = vpop.f32.mrb[200].mxu0  ;;  %v4074_v59 = vpop.f32.mrb[200].mxu1 }
 0x633   :  { %v4599_v26 = vadd.f32 %v4598_v0, %v4481_v4  ;;  %v4673_v60 = vadd.f32 %v4672_v40, %v4483_v13  ;;  %v3882_v49 = vadd.f32 %v3881_v32, %v6562_v63  ;;  %v4075_v50 = vadd.f32 %v4074_v59, %v6562_v63  ;;  %v3883_v37 = vpop.f32.mrb[201].mxu0  ;;  %v4076_v31 = vpop.f32.mrb[201].mxu1 }
 0x634   :  { %v4636_v1 = vadd.f32 %v4635_v58, %v4482_v51  ;;  %v4710_v24 = vadd.f32 %v4709_v29, %v4484_v52  ;;  %v3884_v23 = vadd.f32 %v3883_v37, %v6562_v63  ;;  %v4077_v33 = vadd.f32 %v4076_v31, %v6562_v63  ;;  %v3885_v15 = vpop.f32.mrb[202].mxu0  ;;  %v4078_v38 = vpop.f32.mrb[202].mxu1 }
 0x635   :  { %v4229_v14 = vmax.f32 %v3882_v49, 0.0  ;;  %v4231_v34 = vmax.f32 %v4075_v50, 0.0  ;;  %v3886_v61 = vadd.f32 %v3885_v15, %v3561_v17  ;;  %v4079_v56 = vadd.f32 %v4078_v38, %v3561_v17  ;;  %v3887_v5 = vpop.f32.mrb[203].mxu0  ;;  %v4080_v43 = vpop.f32.mrb[203].mxu1 }
 0x636   :  { %v4230_v12 = vmax.f32 %v3884_v23, 0.0  ;;  %v4232_v30 = vmax.f32 %v4077_v33, 0.0  ;;  %v3888_v54 = vadd.f32 %v3887_v5, %v3561_v17  ;;  %v4081_v46 = vadd.f32 %v4080_v43, %v3561_v17  ;;  %v3569_v29 = vpop.permute.xlu0 %3568  ;;  %v6642_v17 = vpop.permute.xlu1 %4386 }
 0x637   :  { %v4485_v41 = vmul.f32 %v6568_v20, %v4229_v14  ;;  %v4487_v62 = vmul.f32 %v6568_v20, %v4231_v34  ;;  %v4233_v2 = vmax.f32 %v3886_v61, 0.0  ;;  %v4235_v53 = vmax.f32 %v4079_v56, 0.0 }
 0x638   :  { %v4486_v63 = vmul.f32 %v6568_v20, %v4230_v12  ;;  %v4488_v0 = vmul.f32 %v6568_v20, %v4232_v30  ;;  %v4234_v40 = vmax.f32 %v3888_v54, 0.0  ;;  %v4236_v4 = vmax.f32 %v4081_v46, 0.0 }
 0x639   :  { %v4600_v13 = vadd.f32 %v4599_v26, %v4485_v41  ;;  %v4674_v58 = vadd.f32 %v4673_v60, %v4487_v62  ;;  %v4489_v51 = vmul.f32 %v6614_v27, %v4233_v2  ;;  %v4491_v52 = vmul.f32 %v6614_v27, %v4235_v53 }
 0x63a   :  { %v4637_v32 = vadd.f32 %v4636_v1, %v4486_v63  ;;  %v4711_v59 = vadd.f32 %v4710_v24, %v4488_v0  ;;  %v4490_v49 = vmul.f32 %v6614_v27, %v4234_v40  ;;  %v4492_v50 = vmul.f32 %v6614_v27, %v4236_v4  ;;  %v3891_v37 = vpop.f32.mrb[204].mxu0  ;;  %v4084_v31 = vpop.f32.mrb[204].mxu1 }
 0x63b   :  { %v4601_v20 = vadd.f32 %v4600_v13, %v4489_v51  ;;  %v4675_v23 = vadd.f32 %v4674_v58, %v4491_v52  ;;  %v3892_v26 = vadd.f32 %v3891_v37, %v6564_v7  ;;  %v4085_v60 = vadd.f32 %v4084_v31, %v6564_v7  ;;  %v3893_v33 = vpop.f32.mrb[205].mxu0  ;;  %v4086_v15 = vpop.f32.mrb[205].mxu1 }
 0x63c   :  { %v4638_v38 = vadd.f32 %v4637_v32, %v4490_v49  ;;  %v4712_v14 = vadd.f32 %v4711_v59, %v4492_v50  ;;  %v3894_v34 = vadd.f32 %v3893_v33, %v6564_v7  ;;  %v4087_v1 = vadd.f32 %v4086_v15, %v6564_v7  ;;  %v3895_v24 = vpop.f32.mrb[206].mxu0  ;;  %v4088_v61 = vpop.f32.mrb[206].mxu1 }
 0x63d   :  { %v4237_v56 = vmax.f32 %v3892_v26, 0.0  ;;  %v4239_v27 = vmax.f32 %v4085_v60, 0.0  ;;  %v3896_v5 = vadd.f32 %v3895_v24, %v3569_v29  ;;  %v4089_v43 = vadd.f32 %v4088_v61, %v3569_v29  ;;  %v3897_v12 = vpop.f32.mrb[207].mxu0  ;;  %v4090_v30 = vpop.f32.mrb[207].mxu1 }
 0x63e   :  { %v4238_v54 = vmax.f32 %v3894_v34, 0.0  ;;  %v4240_v46 = vmax.f32 %v4087_v1, 0.0  ;;  %v3898_v41 = vadd.f32 %v3897_v12, %v3569_v29  ;;  %v4091_v62 = vadd.f32 %v4090_v30, %v3569_v29  ;;  %v3577_v58 = vpop.permute.xlu0 %3576  ;;  %v6654_v51 = vpop.permute.xlu1 %4394 }
 0x63f   :  { %v4493_v2 = vmul.f32 %v6572_v10, %v4237_v56  ;;  %v4495_v53 = vmul.f32 %v6572_v10, %v4239_v27  ;;  %v4241_v63 = vmax.f32 %v3896_v5, 0.0  ;;  %v4243_v0 = vmax.f32 %v4089_v43, 0.0 }
 0x640   :  { %v4494_v7 = vmul.f32 %v6572_v10, %v4238_v54  ;;  %v4496_v40 = vmul.f32 %v6572_v10, %v4240_v46  ;;  %v4242_v4 = vmax.f32 %v3898_v41, 0.0  ;;  %v4244_v13 = vmax.f32 %v4091_v62, 0.0 }
 0x641   :  { %v4602_v52 = vadd.f32 %v4601_v20, %v4493_v2  ;;  %v4676_v32 = vadd.f32 %v4675_v23, %v4495_v53  ;;  %v4497_v59 = vmul.f32 %v6616_v57, %v4241_v63  ;;  %v4499_v29 = vmul.f32 %v6616_v57, %v4243_v0 }
 0x642   :  { %v4639_v49 = vadd.f32 %v4638_v38, %v4494_v7  ;;  %v4713_v50 = vadd.f32 %v4712_v14, %v4496_v40  ;;  %v4498_v37 = vmul.f32 %v6616_v57, %v4242_v4  ;;  %v4500_v31 = vmul.f32 %v6616_v57, %v4244_v13  ;;  %v3901_v26 = vpop.f32.mrb[208].mxu0  ;;  %v4094_v60 = vpop.f32.mrb[208].mxu1 }
 0x643   :  { %v4603_v10 = vadd.f32 %v4602_v52, %v4497_v59  ;;  %v4677_v33 = vadd.f32 %v4676_v32, %v4499_v29  ;;  %v3902_v15 = vadd.f32 %v3901_v26, %v6566_v16  ;;  %v4095_v34 = vadd.f32 %v4094_v60, %v6566_v16  ;;  %v3903_v20 = vpop.f32.mrb[209].mxu0  ;;  %v4096_v23 = vpop.f32.mrb[209].mxu1 }
 0x644   :  { %v4640_v1 = vadd.f32 %v4639_v49, %v4498_v37  ;;  %v4714_v24 = vadd.f32 %v4713_v50, %v4500_v31  ;;  %v3904_v61 = vadd.f32 %v3903_v20, %v6566_v16  ;;  %v4097_v38 = vadd.f32 %v4096_v23, %v6566_v16  ;;  %v3905_v14 = vpop.f32.mrb[210].mxu0  ;;  %v4098_v56 = vpop.f32.mrb[210].mxu1 }
 0x645   :  { %v4245_v27 = vmax.f32 %v3902_v15, 0.0  ;;  %v4247_v57 = vmax.f32 %v4095_v34, 0.0  ;;  %v3906_v5 = vadd.f32 %v3905_v14, %v3577_v58  ;;  %v4099_v43 = vadd.f32 %v4098_v56, %v3577_v58  ;;  %v3907_v12 = vpop.f32.mrb[211].mxu0  ;;  %v4100_v30 = vpop.f32.mrb[211].mxu1 }
 0x646   :  { %v4246_v54 = vmax.f32 %v3904_v61, 0.0  ;;  %v4248_v46 = vmax.f32 %v4097_v38, 0.0  ;;  %v3908_v41 = vadd.f32 %v3907_v12, %v3577_v58  ;;  %v4101_v62 = vadd.f32 %v4100_v30, %v3577_v58  ;;  %v3585_v13 = vpop.permute.xlu0 %3584  ;;  %v6668_v52 = vpop.permute.xlu1 %4402 }
 0x647   :  { %v4501_v2 = vmul.f32 %v6576_v45, %v4245_v27  ;;  %v4503_v53 = vmul.f32 %v6576_v45, %v4247_v57  ;;  %v4249_v63 = vmax.f32 %v3906_v5, 0.0  ;;  %v4251_v0 = vmax.f32 %v4099_v43, 0.0 }
 0x648   :  { %v4502_v16 = vmul.f32 %v6576_v45, %v4246_v54  ;;  %v4504_v7 = vmul.f32 %v6576_v45, %v4248_v46  ;;  %v4250_v40 = vmax.f32 %v3908_v41, 0.0  ;;  %v4252_v4 = vmax.f32 %v4101_v62, 0.0 }
 0x649   :  { %v4604_v32 = vadd.f32 %v4603_v10, %v4501_v2  ;;  %v4678_v59 = vadd.f32 %v4677_v33, %v4503_v53  ;;  %v4505_v29 = vmul.f32 %v6628_v11, %v4249_v63  ;;  %v4507_v58 = vmul.f32 %v6628_v11, %v4251_v0 }
 0x64a   :  { %v4641_v49 = vadd.f32 %v4640_v1, %v4502_v16  ;;  %v4715_v50 = vadd.f32 %v4714_v24, %v4504_v7  ;;  %v4506_v37 = vmul.f32 %v6628_v11, %v4250_v40  ;;  %v4508_v31 = vmul.f32 %v6628_v11, %v4252_v4  ;;  %v3911_v26 = vpop.f32.mrb[212].mxu0  ;;  %v4104_v60 = vpop.f32.mrb[212].mxu1 }
 0x64b   :  { %v4605_v45 = vadd.f32 %v4604_v32, %v4505_v29  ;;  %v4679_v15 = vadd.f32 %v4678_v59, %v4507_v58  ;;  %v3912_v34 = vadd.f32 %v3911_v26, %v6570_v19  ;;  %v4105_v20 = vadd.f32 %v4104_v60, %v6570_v19  ;;  %v3913_v10 = vpop.f32.mrb[213].mxu0  ;;  %v4106_v33 = vpop.f32.mrb[213].mxu1 }
 0x64c   :  { %v4642_v23 = vadd.f32 %v4641_v49, %v4506_v37  ;;  %v4716_v61 = vadd.f32 %v4715_v50, %v4508_v31  ;;  %v3914_v38 = vadd.f32 %v3913_v10, %v6570_v19  ;;  %v4107_v1 = vadd.f32 %v4106_v33, %v6570_v19  ;;  %v3915_v24 = vpop.f32.mrb[214].mxu0  ;;  %v4108_v14 = vpop.f32.mrb[214].mxu1 }
 0x64d   :  { %v4253_v56 = vmax.f32 %v3912_v34, 0.0  ;;  %v4255_v11 = vmax.f32 %v4105_v20, 0.0  ;;  %v3916_v27 = vadd.f32 %v3915_v24, %v3585_v13  ;;  %v4109_v57 = vadd.f32 %v4108_v14, %v3585_v13  ;;  %v3917_v5 = vpop.f32.mrb[215].mxu0  ;;  %v4110_v43 = vpop.f32.mrb[215].mxu1 }
 0x64e   :  { %v4254_v12 = vmax.f32 %v3914_v38, 0.0  ;;  %v4256_v30 = vmax.f32 %v4107_v1, 0.0  ;;  %v3918_v54 = vadd.f32 %v3917_v5, %v3585_v13  ;;  %v4111_v46 = vadd.f32 %v4110_v43, %v3585_v13  ;;  %v3593_v7 = vpop.permute.xlu0 %3592  ;;  %v6682_v40 = vpop.permute.xlu1 %4410 }
 0x64f   :  { %v4509_v41 = vmul.f32 %v6580_v6, %v4253_v56  ;;  %v4511_v62 = vmul.f32 %v6580_v6, %v4255_v11  ;;  %v4257_v2 = vmax.f32 %v3916_v27, 0.0  ;;  %v4259_v53 = vmax.f32 %v4109_v57, 0.0 }
 0x650   :  { %v4510_v19 = vmul.f32 %v6580_v6, %v4254_v12  ;;  %v4512_v63 = vmul.f32 %v6580_v6, %v4256_v30  ;;  %v4258_v0 = vmax.f32 %v3918_v54, 0.0  ;;  %v4260_v16 = vmax.f32 %v4111_v46, 0.0 }
 0x651   :  { %v4606_v4 = vadd.f32 %v4605_v45, %v4509_v41  ;;  %v4680_v32 = vadd.f32 %v4679_v15, %v4511_v62  ;;  %v4513_v59 = vmul.f32 %v6642_v17, %v4257_v2  ;;  %v4515_v13 = vmul.f32 %v6642_v17, %v4259_v53 }
 0x652   :  { %v4643_v29 = vadd.f32 %v4642_v23, %v4510_v19  ;;  %v4717_v58 = vadd.f32 %v4716_v61, %v4512_v63  ;;  %v4514_v49 = vmul.f32 %v6642_v17, %v4258_v0  ;;  %v4516_v50 = vmul.f32 %v6642_v17, %v4260_v16  ;;  %v3921_v37 = vpop.f32.mrb[216].mxu0  ;;  %v4114_v31 = vpop.f32.mrb[216].mxu1 }
 0x653   :  { %v4607_v6 = vadd.f32 %v4606_v4, %v4513_v59  ;;  %v4681_v26 = vadd.f32 %v4680_v32, %v4515_v13  ;;  %v3922_v60 = vadd.f32 %v3921_v37, %v6574_v36  ;;  %v4115_v34 = vadd.f32 %v4114_v31, %v6574_v36  ;;  %v3923_v45 = vpop.f32.mrb[217].mxu0  ;;  %v4116_v15 = vpop.f32.mrb[217].mxu1 }
 0x654   :  { %v4644_v20 = vadd.f32 %v4643_v29, %v4514_v49  ;;  %v4718_v10 = vadd.f32 %v4717_v58, %v4516_v50  ;;  %v3924_v33 = vadd.f32 %v3923_v45, %v6574_v36  ;;  %v4117_v23 = vadd.f32 %v4116_v15, %v6574_v36  ;;  %v3925_v61 = vpop.f32.mrb[218].mxu0  ;;  %v4118_v38 = vpop.f32.mrb[218].mxu1 }
 0x655   :  { %v4261_v1 = vmax.f32 %v3922_v60, 0.0  ;;  %v4263_v17 = vmax.f32 %v4115_v34, 0.0  ;;  %v3926_v24 = vadd.f32 %v3925_v61, %v3593_v7  ;;  %v4119_v14 = vadd.f32 %v4118_v38, %v3593_v7  ;;  %v3927_v56 = vpop.f32.mrb[219].mxu0  ;;  %v4120_v11 = vpop.f32.mrb[219].mxu1 }
 0x656   :  { %v4262_v27 = vmax.f32 %v3924_v33, 0.0  ;;  %v4264_v57 = vmax.f32 %v4117_v23, 0.0  ;;  %v3928_v5 = vadd.f32 %v3927_v56, %v3593_v7  ;;  %v4121_v43 = vadd.f32 %v4120_v11, %v3593_v7  ;;  %v3601_v53 = vpop.permute.xlu0 %3600  ;;  %v6696_v19 = vpop.permute.xlu1 %4418 }
 0x657   :  { %v4517_v12 = vmul.f32 %v6584_v35, %v4261_v1  ;;  %v4519_v30 = vmul.f32 %v6584_v35, %v4263_v17  ;;  %v4265_v54 = vmax.f32 %v3926_v24, 0.0  ;;  %v4267_v46 = vmax.f32 %v4119_v14, 0.0 }
 0x658   :  { %v4518_v36 = vmul.f32 %v6584_v35, %v4262_v27  ;;  %v4520_v41 = vmul.f32 %v6584_v35, %v4264_v57  ;;  %v4266_v62 = vmax.f32 %v3928_v5, 0.0  ;;  %v4268_v2 = vmax.f32 %v4121_v43, 0.0 }
 0x659   :  { %v4608_v63 = vadd.f32 %v4607_v6, %v4517_v12  ;;  %v4682_v0 = vadd.f32 %v4681_v26, %v4519_v30  ;;  %v4521_v16 = vmul.f32 %v6654_v51, %v4265_v54  ;;  %v4523_v7 = vmul.f32 %v6654_v51, %v4267_v46 }
 0x65a   :  { %v4645_v4 = vadd.f32 %v4644_v20, %v4518_v36  ;;  %v4719_v32 = vadd.f32 %v4718_v10, %v4520_v41  ;;  %v4522_v59 = vmul.f32 %v6654_v51, %v4266_v62  ;;  %v4524_v13 = vmul.f32 %v6654_v51, %v4268_v2  ;;  %v3931_v29 = vpop.f32.mrb[220].mxu0  ;;  %v4124_v58 = vpop.f32.mrb[220].mxu1 }
 0x65b   :  { %v4609_v35 = vadd.f32 %v4608_v63, %v4521_v16  ;;  %v4683_v49 = vadd.f32 %v4682_v0, %v4523_v7  ;;  %v3932_v50 = vadd.f32 %v3931_v29, %v6578_v18  ;;  %v4125_v37 = vadd.f32 %v4124_v58, %v6578_v18  ;;  %v3933_v31 = vpop.f32.mrb[221].mxu0  ;;  %v4126_v6 = vpop.f32.mrb[221].mxu1 }
 0x65c   :  { %v4646_v26 = vadd.f32 %v4645_v4, %v4522_v59  ;;  %v4720_v60 = vadd.f32 %v4719_v32, %v4524_v13  ;;  %v3934_v34 = vadd.f32 %v3933_v31, %v6578_v18  ;;  %v4127_v45 = vadd.f32 %v4126_v6, %v6578_v18  ;;  %v3935_v15 = vpop.f32.mrb[222].mxu0  ;;  %v4128_v20 = vpop.f32.mrb[222].mxu1 }
 0x65d   :  { %v4269_v10 = vmax.f32 %v3932_v50, 0.0  ;;  %v4271_v51 = vmax.f32 %v4125_v37, 0.0  ;;  %v3936_v33 = vadd.f32 %v3935_v15, %v3601_v53  ;;  %v4129_v23 = vadd.f32 %v4128_v20, %v3601_v53  ;;  %v3937_v61 = vpop.f32.mrb[223].mxu0  ;;  %v4130_v38 = vpop.f32.mrb[223].mxu1 }
 0x65e   :  { %v4270_v1 = vmax.f32 %v3934_v34, 0.0  ;;  %v4272_v17 = vmax.f32 %v4127_v45, 0.0  ;;  %v3938_v24 = vadd.f32 %v3937_v61, %v3601_v53  ;;  %v4131_v14 = vadd.f32 %v4130_v38, %v3601_v53  ;;  %v3609_v30 = vpop.permute.xlu0 %3608  ;;  %v6710_v54 = vpop.permute.xlu1 %4426 }
 0x65f   :  { %v4525_v56 = vmul.f32 %v6588_v21, %v4269_v10  ;;  %v4527_v11 = vmul.f32 %v6588_v21, %v4271_v51  ;;  %v4273_v27 = vmax.f32 %v3936_v33, 0.0  ;;  %v4275_v57 = vmax.f32 %v4129_v23, 0.0 }
 0x660   :  { %v4526_v18 = vmul.f32 %v6588_v21, %v4270_v1  ;;  %v4528_v5 = vmul.f32 %v6588_v21, %v4272_v17  ;;  %v4274_v43 = vmax.f32 %v3938_v24, 0.0  ;;  %v4276_v12 = vmax.f32 %v4131_v14, 0.0 }
 0x661   :  { %v4610_v46 = vadd.f32 %v4609_v35, %v4525_v56  ;;  %v4684_v36 = vadd.f32 %v4683_v49, %v4527_v11  ;;  %v4529_v41 = vmul.f32 %v6668_v52, %v4273_v27  ;;  %v4531_v62 = vmul.f32 %v6668_v52, %v4275_v57 }
 0x662   :  { %v4647_v2 = vadd.f32 %v4646_v26, %v4526_v18  ;;  %v4721_v53 = vadd.f32 %v4720_v60, %v4528_v5  ;;  %v4530_v63 = vmul.f32 %v6668_v52, %v4274_v43  ;;  %v4532_v0 = vmul.f32 %v6668_v52, %v4276_v12  ;;  %v3941_v16 = vpop.f32.mrb[224].mxu0  ;;  %v4134_v7 = vpop.f32.mrb[224].mxu1 }
 0x663   :  { %v4611_v21 = vadd.f32 %v4610_v46, %v4529_v41  ;;  %v4685_v4 = vadd.f32 %v4684_v36, %v4531_v62  ;;  %v3942_v32 = vadd.f32 %v3941_v16, %v6582_v9  ;;  %v4135_v59 = vadd.f32 %v4134_v7, %v6582_v9  ;;  %v3943_v13 = vpop.f32.mrb[225].mxu0  ;;  %v4136_v29 = vpop.f32.mrb[225].mxu1 }
 0x664   :  { %v4648_v58 = vadd.f32 %v4647_v2, %v4530_v63  ;;  %v4722_v35 = vadd.f32 %v4721_v53, %v4532_v0  ;;  %v3944_v49 = vadd.f32 %v3943_v13, %v6582_v9  ;;  %v4137_v50 = vadd.f32 %v4136_v29, %v6582_v9  ;;  %v3945_v37 = vpop.f32.mrb[226].mxu0  ;;  %v4138_v31 = vpop.f32.mrb[226].mxu1 }
 0x665   :  { %v4277_v6 = vmax.f32 %v3942_v32, 0.0  ;;  %v4279_v52 = vmax.f32 %v4135_v59, 0.0  ;;  %v3946_v26 = vadd.f32 %v3945_v37, %v3609_v30  ;;  %v4139_v60 = vadd.f32 %v4138_v31, %v3609_v30  ;;  %v3947_v34 = vpop.f32.mrb[227].mxu0  ;;  %v4140_v45 = vpop.f32.mrb[227].mxu1 }
 0x666   :  { %v4278_v15 = vmax.f32 %v3944_v49, 0.0  ;;  %v4280_v20 = vmax.f32 %v4137_v50, 0.0  ;;  %v3948_v10 = vadd.f32 %v3947_v34, %v3609_v30  ;;  %v4141_v51 = vadd.f32 %v4140_v45, %v3609_v30  ;;  %v3617_v14 = vpop.permute.xlu0 %3616  ;;  %v6724_v56 = vpop.permute.xlu1 %4434 }
 0x667   :  { %v4533_v33 = vmul.f32 %v6592_v55, %v4277_v6  ;;  %v4535_v23 = vmul.f32 %v6592_v55, %v4279_v52  ;;  %v4281_v61 = vmax.f32 %v3946_v26, 0.0  ;;  %v4283_v38 = vmax.f32 %v4139_v60, 0.0 }
 0x668   :  { %v4534_v9 = vmul.f32 %v6592_v55, %v4278_v15  ;;  %v4536_v1 = vmul.f32 %v6592_v55, %v4280_v20  ;;  %v4282_v17 = vmax.f32 %v3948_v10, 0.0  ;;  %v4284_v24 = vmax.f32 %v4141_v51, 0.0 }
 0x669   :  { %v4612_v11 = vadd.f32 %v4611_v21, %v4533_v33  ;;  %v4686_v27 = vadd.f32 %v4685_v4, %v4535_v23  ;;  %v4537_v57 = vmul.f32 %v6682_v40, %v4281_v61  ;;  %v4539_v18 = vmul.f32 %v6682_v40, %v4283_v38 }
 0x66a   :  { %v4649_v5 = vadd.f32 %v4648_v58, %v4534_v9  ;;  %v4723_v43 = vadd.f32 %v4722_v35, %v4536_v1  ;;  %v4538_v12 = vmul.f32 %v6682_v40, %v4282_v17  ;;  %v4540_v30 = vmul.f32 %v6682_v40, %v4284_v24  ;;  %v3951_v46 = vpop.f32.mrb[228].mxu0  ;;  %v4144_v36 = vpop.f32.mrb[228].mxu1 }
 0x66b   :  { %v4613_v55 = vadd.f32 %v4612_v11, %v4537_v57  ;;  %v4687_v41 = vadd.f32 %v4686_v27, %v4539_v18  ;;  %v3952_v62 = vadd.f32 %v3951_v46, %v6586_v44  ;;  %v4145_v2 = vadd.f32 %v4144_v36, %v6586_v44  ;;  %v3953_v53 = vpop.f32.mrb[229].mxu0  ;;  %v4146_v63 = vpop.f32.mrb[229].mxu1 }
 0x66c   :  { %v4650_v0 = vadd.f32 %v4649_v5, %v4538_v12  ;;  %v4724_v16 = vadd.f32 %v4723_v43, %v4540_v30  ;;  %v3954_v7 = vadd.f32 %v3953_v53, %v6586_v44  ;;  %v4147_v21 = vadd.f32 %v4146_v63, %v6586_v44  ;;  %v3955_v4 = vpop.f32.mrb[230].mxu0  ;;  %v4148_v32 = vpop.f32.mrb[230].mxu1 }
 0x66d   :  { %v4285_v59 = vmax.f32 %v3952_v62, 0.0  ;;  %v4287_v40 = vmax.f32 %v4145_v2, 0.0  ;;  %v3956_v13 = vadd.f32 %v3955_v4, %v3617_v14  ;;  %v4149_v29 = vadd.f32 %v4148_v32, %v3617_v14  ;;  %v3957_v58 = vpop.f32.mrb[231].mxu0  ;;  %v4150_v35 = vpop.f32.mrb[231].mxu1 }
 0x66e   :  { %v4286_v49 = vmax.f32 %v3954_v7, 0.0  ;;  %v4288_v50 = vmax.f32 %v4147_v21, 0.0  ;;  %v3958_v37 = vadd.f32 %v3957_v58, %v3617_v14  ;;  %v4151_v31 = vadd.f32 %v4150_v35, %v3617_v14  ;;  %v3625_v20 = vpop.permute.xlu0 %3624  ;;  %v6738_v10 = vpop.permute.xlu1 %4442 }
 0x66f   :  { %v4541_v6 = vmul.f32 %v6596_v48, %v4285_v59  ;;  %v4543_v52 = vmul.f32 %v6596_v48, %v4287_v40  ;;  %v4289_v26 = vmax.f32 %v3956_v13, 0.0  ;;  %v4291_v60 = vmax.f32 %v4149_v29, 0.0 }
 0x670   :  { %v4542_v44 = vmul.f32 %v6596_v48, %v4286_v49  ;;  %v4544_v34 = vmul.f32 %v6596_v48, %v4288_v50  ;;  %v4290_v45 = vmax.f32 %v3958_v37, 0.0  ;;  %v4292_v15 = vmax.f32 %v4151_v31, 0.0 }
 0x671   :  { %v4614_v51 = vadd.f32 %v4613_v55, %v4541_v6  ;;  %v4688_v33 = vadd.f32 %v4687_v41, %v4543_v52  ;;  %v4545_v23 = vmul.f32 %v6696_v19, %v4289_v26  ;;  %v4547_v61 = vmul.f32 %v6696_v19, %v4291_v60 }
 0x672   :  { %v4651_v38 = vadd.f32 %v4650_v0, %v4542_v44  ;;  %v4725_v9 = vadd.f32 %v4724_v16, %v4544_v34  ;;  %v4546_v1 = vmul.f32 %v6696_v19, %v4290_v45  ;;  %v4548_v17 = vmul.f32 %v6696_v19, %v4292_v15  ;;  %v3961_v24 = vpop.f32.mrb[232].mxu0  ;;  %v4154_v14 = vpop.f32.mrb[232].mxu1 }
 0x673   :  { %v4615_v48 = vadd.f32 %v4614_v51, %v4545_v23  ;;  %v4689_v11 = vadd.f32 %v4688_v33, %v4547_v61  ;;  %v3962_v27 = vadd.f32 %v3961_v24, %v6590_v39  ;;  %v4155_v57 = vadd.f32 %v4154_v14, %v6590_v39  ;;  %v3963_v18 = vpop.f32.mrb[233].mxu0  ;;  %v4156_v5 = vpop.f32.mrb[233].mxu1 }
 0x674   :  { %v4652_v43 = vadd.f32 %v4651_v38, %v4546_v1  ;;  %v4726_v12 = vadd.f32 %v4725_v9, %v4548_v17  ;;  %v3964_v30 = vadd.f32 %v3963_v18, %v6590_v39  ;;  %v4157_v46 = vadd.f32 %v4156_v5, %v6590_v39  ;;  %v3965_v36 = vpop.f32.mrb[234].mxu0  ;;  %v4158_v55 = vpop.f32.mrb[234].mxu1 }
 0x675   :  { %v4293_v41 = vmax.f32 %v3962_v27, 0.0  ;;  %v4295_v19 = vmax.f32 %v4155_v57, 0.0  ;;  %v3966_v62 = vadd.f32 %v3965_v36, %v3625_v20  ;;  %v4159_v2 = vadd.f32 %v4158_v55, %v3625_v20  ;;  %v3967_v53 = vpop.f32.mrb[235].mxu0  ;;  %v4160_v63 = vpop.f32.mrb[235].mxu1 }
 0x676   :  { %v4294_v0 = vmax.f32 %v3964_v30, 0.0  ;;  %v4296_v16 = vmax.f32 %v4157_v46, 0.0  ;;  %v3968_v7 = vadd.f32 %v3967_v53, %v3625_v20  ;;  %v4161_v21 = vadd.f32 %v4160_v63, %v3625_v20  ;;  %v3633_v35 = vpop.permute.xlu0 %3632  ;;  %v6752_v49 = vpop.permute.xlu1 %4446 }
 0x677   :  { %v4549_v4 = vmul.f32 %v6600_v47, %v4293_v41  ;;  %v4551_v32 = vmul.f32 %v6600_v47, %v4295_v19  ;;  %v4297_v59 = vmax.f32 %v3966_v62, 0.0  ;;  %v4299_v40 = vmax.f32 %v4159_v2, 0.0 }
 0x678   :  { %v4550_v39 = vmul.f32 %v6600_v47, %v4294_v0  ;;  %v4552_v13 = vmul.f32 %v6600_v47, %v4296_v16  ;;  %v4298_v29 = vmax.f32 %v3968_v7, 0.0  ;;  %v4300_v58 = vmax.f32 %v4161_v21, 0.0 }
 0x679   :  { %v4616_v50 = vadd.f32 %v4615_v48, %v4549_v4  ;;  %v4690_v37 = vadd.f32 %v4689_v11, %v4551_v32  ;;  %v4553_v31 = vmul.f32 %v6710_v54, %v4297_v59  ;;  %v4555_v6 = vmul.f32 %v6710_v54, %v4299_v40 }
 0x67a   :  { %v4653_v52 = vadd.f32 %v4652_v43, %v4550_v39  ;;  %v4727_v26 = vadd.f32 %v4726_v12, %v4552_v13  ;;  %v4554_v60 = vmul.f32 %v6710_v54, %v4298_v29  ;;  %v4556_v44 = vmul.f32 %v6710_v54, %v4300_v58  ;;  %v3971_v34 = vpop.f32.mrb[236].mxu0  ;;  %v4164_v45 = vpop.f32.mrb[236].mxu1 }
 0x67b   :  { %v4617_v47 = vadd.f32 %v4616_v50, %v4553_v31  ;;  %v4691_v15 = vadd.f32 %v4690_v37, %v4555_v6  ;;  %v3972_v20 = vadd.f32 %v3971_v34, %v6594_v3  ;;  %v4165_v51 = vadd.f32 %v4164_v45, %v6594_v3  ;;  %v3973_v33 = vpop.f32.mrb[237].mxu0  ;;  %v4166_v23 = vpop.f32.mrb[237].mxu1 }
 0x67c   :  { %v4654_v61 = vadd.f32 %v4653_v52, %v4554_v60  ;;  %v4728_v38 = vadd.f32 %v4727_v26, %v4556_v44  ;;  %v3974_v9 = vadd.f32 %v3973_v33, %v6594_v3  ;;  %v4167_v1 = vadd.f32 %v4166_v23, %v6594_v3  ;;  %v3975_v17 = vpop.f32.mrb[238].mxu0  ;;  %v4168_v24 = vpop.f32.mrb[238].mxu1 }
 0x67d   :  { %v4301_v14 = vmax.f32 %v3972_v20, 0.0  ;;  %v4303_v54 = vmax.f32 %v4165_v51, 0.0  ;;  %v3976_v48 = vadd.f32 %v3975_v17, %v3633_v35  ;;  %v4169_v11 = vadd.f32 %v4168_v24, %v3633_v35  ;;  %v3977_v27 = vpop.f32.mrb[239].mxu0  ;;  %v4170_v57 = vpop.f32.mrb[239].mxu1 }
 0x67e   :  { %v4302_v18 = vmax.f32 %v3974_v9, 0.0  ;;  %v4304_v5 = vmax.f32 %v4167_v1, 0.0  ;;  %v3978_v43 = vadd.f32 %v3977_v27, %v3633_v35  ;;  %v4171_v12 = vadd.f32 %v4170_v57, %v3633_v35  ;;  %v3641_v2 = vpop.permute.xlu0 %3640  ;;  %v6768_v7 = vpop.permute.xlu1 %3656 }
 0x67f   :  { %v4557_v30 = vmul.f32 %v6604_v42, %v4301_v14  ;;  %v4559_v46 = vmul.f32 %v6604_v42, %v4303_v54  ;;  %v4305_v36 = vmax.f32 %v3976_v48, 0.0  ;;  %v4307_v55 = vmax.f32 %v4169_v11, 0.0 }
 0x680   :  { %v4558_v3 = vmul.f32 %v6604_v42, %v4302_v18  ;;  %v4560_v41 = vmul.f32 %v6604_v42, %v4304_v5  ;;  %v4306_v19 = vmax.f32 %v3978_v43, 0.0  ;;  %v4308_v62 = vmax.f32 %v4171_v12, 0.0 }
 0x681   :  { %v4618_v53 = vadd.f32 %v4617_v47, %v4557_v30  ;;  %v4692_v63 = vadd.f32 %v4691_v15, %v4559_v46  ;;  %v4561_v0 = vmul.f32 %v6724_v56, %v4305_v36  ;;  %v4563_v16 = vmul.f32 %v6724_v56, %v4307_v55 }
 0x682   :  { %v4655_v21 = vadd.f32 %v4654_v61, %v4558_v3  ;;  %v4729_v4 = vadd.f32 %v4728_v38, %v4560_v41  ;;  %v4562_v32 = vmul.f32 %v6724_v56, %v4306_v19  ;;  %v4564_v59 = vmul.f32 %v6724_v56, %v4308_v62  ;;  %v3981_v40 = vpop.f32.mrb[240].mxu0  ;;  %v4174_v39 = vpop.f32.mrb[240].mxu1 }
 0x683   :  { %v4619_v42 = vadd.f32 %v4618_v53, %v4561_v0  ;;  %v4693_v13 = vadd.f32 %v4692_v63, %v4563_v16  ;;  %v3982_v29 = vadd.f32 %v3981_v40, %v6598_v25  ;;  %v4175_v58 = vadd.f32 %v4174_v39, %v6598_v25  ;;  %v3983_v35 = vpop.f32.mrb[241].mxu0  ;;  %v4176_v50 = vpop.f32.mrb[241].mxu1 }
 0x684   :  { %v4656_v37 = vadd.f32 %v4655_v21, %v4562_v32  ;;  %v4730_v31 = vadd.f32 %v4729_v4, %v4564_v59  ;;  %v3984_v6 = vadd.f32 %v3983_v35, %v6598_v25  ;;  %v4177_v52 = vadd.f32 %v4176_v50, %v6598_v25  ;;  %v3985_v26 = vpop.f32.mrb[242].mxu0  ;;  %v4178_v60 = vpop.f32.mrb[242].mxu1 }
 0x685   :  { %v4309_v44 = vmax.f32 %v3982_v29, 0.0  ;;  %v4311_v56 = vmax.f32 %v4175_v58, 0.0  ;;  %v3986_v34 = vadd.f32 %v3985_v26, %v3641_v2  ;;  %v4179_v45 = vadd.f32 %v4178_v60, %v3641_v2  ;;  %v3987_v47 = vpop.f32.mrb[243].mxu0  ;;  %v4180_v15 = vpop.f32.mrb[243].mxu1 }
 0x686   :  { %v4310_v20 = vmax.f32 %v3984_v6, 0.0  ;;  %v4312_v51 = vmax.f32 %v4177_v52, 0.0  ;;  %v3988_v33 = vadd.f32 %v3987_v47, %v3641_v2  ;;  %v4181_v23 = vadd.f32 %v4180_v15, %v3641_v2  ;;  %v3649_v54 = vpop.permute.xlu0 %3648  ;;  %v6782_v18 = vpop.permute.xlu1 %3660 }
 0x687   :  { %v4565_v61 = vmul.f32 %v6606_v22, %v4309_v44  ;;  %v4567_v38 = vmul.f32 %v6606_v22, %v4311_v56  ;;  %v4313_v9 = vmax.f32 %v3986_v34, 0.0  ;;  %v4315_v1 = vmax.f32 %v4179_v45, 0.0 }
 0x688   :  { %v4566_v25 = vmul.f32 %v6606_v22, %v4310_v20  ;;  %v4568_v17 = vmul.f32 %v6606_v22, %v4312_v51  ;;  %v4314_v24 = vmax.f32 %v3988_v33, 0.0  ;;  %v4316_v14 = vmax.f32 %v4181_v23, 0.0 }
 0x689   :  { %v4620_v48 = vadd.f32 %v4619_v42, %v4565_v61  ;;  %v4694_v11 = vadd.f32 %v4693_v13, %v4567_v38  ;;  %v4569_v27 = vmul.f32 %v6738_v10, %v4313_v9  ;;  %v4571_v57 = vmul.f32 %v6738_v10, %v4315_v1 }
 0x68a   :  { %v4657_v5 = vadd.f32 %v4656_v37, %v4566_v25  ;;  %v4731_v43 = vadd.f32 %v4730_v31, %v4568_v17  ;;  %v4570_v12 = vmul.f32 %v6738_v10, %v4314_v24  ;;  %v4572_v30 = vmul.f32 %v6738_v10, %v4316_v14  ;;  %v3991_v46 = vpop.f32.mrb[244].mxu0  ;;  %v4184_v36 = vpop.f32.mrb[244].mxu1 }
 0x68b   :  { %v4621_v22 = vadd.f32 %v4620_v48, %v4569_v27  ;;  %v4695_v55 = vadd.f32 %v4694_v11, %v4571_v57  ;;  %v3992_v3 = vadd.f32 %v3991_v46, %v6602_v8  ;;  %v4185_v41 = vadd.f32 %v4184_v36, %v6602_v8  ;;  %v3993_v19 = vpop.f32.mrb[245].mxu0  ;;  %v4186_v62 = vpop.f32.mrb[245].mxu1 }
 0x68c   :  { %v4658_v2 = vadd.f32 %v4657_v5, %v4570_v12  ;;  %v4732_v53 = vadd.f32 %v4731_v43, %v4572_v30  ;;  %v3994_v63 = vadd.f32 %v3993_v19, %v6602_v8  ;;  %v4187_v0 = vadd.f32 %v4186_v62, %v6602_v8  ;;  %v3995_v16 = vpop.f32.mrb[246].mxu0  ;;  %v4188_v21 = vpop.f32.mrb[246].mxu1 }
 0x68d   :  { %v4317_v4 = vmax.f32 %v3992_v3, 0.0  ;;  %v4319_v10 = vmax.f32 %v4185_v41, 0.0  ;;  %v3996_v32 = vadd.f32 %v3995_v16, %v3649_v54  ;;  %v4189_v59 = vadd.f32 %v4188_v21, %v3649_v54  ;;  %v3997_v40 = vpop.f32.mrb[247].mxu0  ;;  %v4190_v39 = vpop.f32.mrb[247].mxu1 }
 0x68e   :  { %v4318_v42 = vmax.f32 %v3994_v63, 0.0  ;;  %v4320_v13 = vmax.f32 %v4187_v0, 0.0  ;;  %v3998_v29 = vadd.f32 %v3997_v40, %v3649_v54  ;;  %v4191_v58 = vadd.f32 %v4190_v39, %v3649_v54  ;;  %v3653_v60 = vpop.permute.xlu0 %3652  ;;  %v4455_v47 = vpop.permute.xlu1 %4454 }
 0x68f   :  { %v4573_v35 = vmul.f32 %v6752_v49, %v4317_v4  ;;  %v4575_v50 = vmul.f32 %v6752_v49, %v4319_v10  ;;  %v4321_v37 = vmax.f32 %v3996_v32, 0.0  ;;  %v4323_v31 = vmax.f32 %v4189_v59, 0.0 }
 0x690   :  { %v4574_v8 = vmul.f32 %v6752_v49, %v4318_v42  ;;  %v4576_v6 = vmul.f32 %v6752_v49, %v4320_v13  ;;  %v4322_v52 = vmax.f32 %v3998_v29, 0.0  ;;  %v4324_v26 = vmax.f32 %v4191_v58, 0.0 }
 0x691   :  { %v4622_v44 = vadd.f32 %v4621_v22, %v4573_v35  ;;  %v4696_v56 = vadd.f32 %v4695_v55, %v4575_v50  ;;  %v4577_v34 = vmul.f32 %v6610_v28, %v4321_v37  ;;  %v4579_v45 = vmul.f32 %v6610_v28, %v4323_v31 }
 0x692   :  { %v4659_v15 = vadd.f32 %v4658_v2, %v4574_v8  ;;  %v4733_v20 = vadd.f32 %v4732_v53, %v4576_v6  ;;  %v4578_v51 = vmul.f32 %v6610_v28, %v4322_v52  ;;  %v4580_v33 = vmul.f32 %v6610_v28, %v4324_v26  ;;  %v4001_v23 = vpop.f32.mrb[248].mxu0  ;;  %v4194_v61 = vpop.f32.mrb[248].mxu1 }
 0x693   :  { %v4623_v38 = vadd.f32 %v4622_v44, %v4577_v34  ;;  %v4697_v49 = vadd.f32 %v4696_v56, %v4579_v45  ;;  %v4002_v9 = vadd.f32 %v4001_v23, %v3653_v60  ;;  %v4195_v1 = vadd.f32 %v4194_v61, %v3653_v60  ;;  %v4003_v25 = vpop.f32.mrb[249].mxu0  ;;  %v4196_v17 = vpop.f32.mrb[249].mxu1 }
 0x694   :  { %v4660_v24 = vadd.f32 %v4659_v15, %v4578_v51  ;;  %v4734_v14 = vadd.f32 %v4733_v20, %v4580_v33  ;;  %v4004_v54 = vadd.f32 %v4003_v25, %v3653_v60  ;;  %v4197_v48 = vadd.f32 %v4196_v17, %v3653_v60  ;;  %v4005_v11 = vpop.f32.mrb[250].mxu0  ;;  %v4198_v27 = vpop.f32.mrb[250].mxu1 }
 0x695   :  { %v4325_v57 = vmax.f32 %v4002_v9, 0.0  ;;  %v4327_v5 = vmax.f32 %v4195_v1, 0.0  ;;  %v4006_v43 = vadd.f32 %v4005_v11, %v6768_v7  ;;  %v4199_v28 = vadd.f32 %v4198_v27, %v6768_v7  ;;  %v4007_v12 = vpop.f32.mrb[251].mxu0  ;;  %v4200_v30 = vpop.f32.mrb[251].mxu1 }
 0x696   :  { %v4326_v46 = vmax.f32 %v4004_v54, 0.0  ;;  %v4328_v36 = vmax.f32 %v4197_v48, 0.0  ;;  %v4008_v22 = vadd.f32 %v4007_v12, %v6768_v7  ;;  %v4201_v55 = vadd.f32 %v4200_v30, %v6768_v7  ;;  %v4459_v16 = vpop.permute.xlu1 %4458  ;;  %v3665_v21 = vpop.permute.xlu0 %3664 }
 0x697   :  { %v4581_v3 = vmul.f32 %v4455_v47, %v4325_v57  ;;  %v4583_v41 = vmul.f32 %v4455_v47, %v4327_v5  ;;  %v4329_v19 = vmax.f32 %v4006_v43, 0.0  ;;  %v4331_v62 = vmax.f32 %v4199_v28, 0.0 }
 0x698   :  { %v4582_v2 = vmul.f32 %v4455_v47, %v4326_v46  ;;  %v4584_v53 = vmul.f32 %v4455_v47, %v4328_v36  ;;  %v4330_v63 = vmax.f32 %v4008_v22, 0.0  ;;  %v4332_v0 = vmax.f32 %v4201_v55, 0.0 }
 0x699   :  { %v4624_v4 = vadd.f32 %v4623_v38, %v4581_v3  ;;  %v4698_v10 = vadd.f32 %v4697_v49, %v4583_v41  ;;  %v4585_v32 = vmul.f32 %v4459_v16, %v4329_v19  ;;  %v4587_v59 = vmul.f32 %v4459_v16, %v4331_v62 }
 0x69a   :  { %v4661_v40 = vadd.f32 %v4660_v24, %v4582_v2  ;;  %v4735_v39 = vadd.f32 %v4734_v14, %v4584_v53  ;;  %v4586_v42 = vmul.f32 %v4459_v16, %v4330_v63  ;;  %v4588_v13 = vmul.f32 %v4459_v16, %v4332_v0  ;;  %v4011_v29 = vpop.f32.mrb[252].mxu0  ;;  %v4204_v7 = vpop.f32.mrb[252].mxu1 }
 0x69b   :  { %v4625_v58 = vadd.f32 %v4624_v4, %v4585_v32  ;;  %v4699_v35 = vadd.f32 %v4698_v10, %v4587_v59  ;;  %v4012_v50 = vadd.f32 %v4011_v29, %v6782_v18  ;;  %v4205_v37 = vadd.f32 %v4204_v7, %v6782_v18  ;;  %v4013_v31 = vpop.f32.mrb[253].mxu0  ;;  %v4206_v8 = vpop.f32.mrb[253].mxu1 }
 0x69c   :  { %v4662_v6 = vadd.f32 %v4661_v40, %v4586_v42  ;;  %v4736_v52 = vadd.f32 %v4735_v39, %v4588_v13  ;;  %v4014_v26 = vadd.f32 %v4013_v31, %v6782_v18  ;;  %v4207_v60 = vadd.f32 %v4206_v8, %v6782_v18  ;;  %v4015_v44 = vpop.f32.mrb[254].mxu0  ;;  %v4208_v56 = vpop.f32.mrb[254].mxu1 }
 0x69d   :  { %v4333_v34 = vmax.f32 %v4012_v50, 0.0  ;;  %v4335_v45 = vmax.f32 %v4205_v37, 0.0  ;;  %v4016_v47 = vadd.f32 %v4015_v44, %v3665_v21  ;;  %v4209_v15 = vadd.f32 %v4208_v56, %v3665_v21  ;;  %v4017_v20 = vpop.f32.mrb[255].mxu0  ;;  %v4210_v51 = vpop.f32.mrb[255].mxu1  ;;  %v6846_v44 = vld [vmem:[#allocation4_spill] sm:$0xff] }
 0x69e   :  { %v4334_v33 = vmax.f32 %v4014_v26, 0.0  ;;  %v4336_v23 = vmax.f32 %v4207_v60, 0.0  ;;  %v4463_v61 = vpop.permute.xlu1 %4462  ;;  %v4018_v38 = vadd.f32 %v4017_v20, %v3665_v21  ;;  %v4211_v49 = vadd.f32 %v4210_v51, %v3665_v21  ;;  %v4467_v9 = vpop.permute.xlu0 %4466 }
 0x69f   :  { %v4589_v1 = vmul.f32 %v4463_v61, %v4333_v34  ;;  %v4591_v25 = vmul.f32 %v4463_v61, %v4335_v45  ;;  %v4337_v17 = vmax.f32 %v4016_v47, 0.0  ;;  %v4339_v24 = vmax.f32 %v4209_v15, 0.0 }
 0x6a0   :  { %v4590_v14 = vmul.f32 %v4463_v61, %v4334_v33  ;;  %v4592_v18 = vmul.f32 %v4463_v61, %v4336_v23  ;;  %v4338_v54 = vmax.f32 %v4018_v38, 0.0  ;;  %v4340_v48 = vmax.f32 %v4211_v49, 0.0 }
 0x6a1   :  { %v4593_v11 = vmul.f32 %v4467_v9, %v4337_v17  ;;  %v4595_v27 = vmul.f32 %v4467_v9, %v4339_v24  ;;  %v4626_v57 = vadd.f32 %v4625_v58, %v4589_v1  ;;  %v4700_v5 = vadd.f32 %v4699_v35, %v4591_v25 }
 0x6a2   :  { %v4594_v43 = vmul.f32 %v4467_v9, %v4338_v54  ;;  %v4596_v28 = vmul.f32 %v4467_v9, %v4340_v48  ;;  %v4663_v12 = vadd.f32 %v4662_v6, %v4590_v14  ;;  %v4737_v30 = vadd.f32 %v4736_v52, %v4592_v18  ;;  %v4747_v35 = vpop.permute.xlu1 %4746 }
 0x6a3   :  { %v4627_v46 = vadd.f32 %v4626_v57, %v4593_v11  ;;  %v4701_v36 = vadd.f32 %v4700_v5, %v4595_v27  ;;  %v5286_v4 = vmov 1966171168   ;;  %v6847_v23 = vlaneseq }
 0x6a4   :  { %v4664_v22 = vadd.f32 %v4663_v12, %v4594_v43  ;;  %v4738_v55 = vadd.f32 %v4737_v30, %v4596_v28  ;;  %v4760_v10 = vunpack.c.l.s4 %v5286_v4 }
 0x6a5   :  { %v4628_v3 = vrot.slane %v4627_v46, 4  ;;  %v4702_v41 = vrot.slane %v4701_v36, 4  ;;  %vm4784_vm0 = vcmp.lt.s32.totalorder %v6847_v23, 512 }
 0x6a6   :  { %v4665_v19 = vrot.slane %v4664_v22, 4  ;;  %v4739_v62 = vrot.slane %v4738_v55, 4  ;;  %v4761_v58 = vunpack.c.0.s8 %v4760_v10 }
 0x6a7   :  { %v4629_v2 = vadd.f32 %v4628_v3, %v4627_v46  ;;  %v4703_v53 = vadd.f32 %v4702_v41, %v4701_v36 }
 0x6a8   :  { %v4666_v63 = vadd.f32 %v4665_v19, %v4664_v22  ;;  %v4740_v0 = vadd.f32 %v4739_v62, %v4738_v55  ;;  %v4764_v56 = vsub.s32 %v4761_v58, %v6846_v44 }
 0x6a9   :  { %v4630_v16 = vrot.slane %v4629_v2, 2  ;;  %v4704_v21 = vrot.slane %v4703_v53, 2 }
 0x6aa   :  { %v4667_v32 = vrot.slane %v4666_v63, 2  ;;  %v4741_v59 = vrot.slane %v4740_v0, 2 }
 0x6ab   :  { %v4631_v40 = vadd.f32 %v4630_v16, %v4629_v2  ;;  %v4705_v39 = vadd.f32 %v4704_v21, %v4703_v53 }
 0x6ac   :  { %v4668_v42 = vadd.f32 %v4667_v32, %v4666_v63  ;;  %v4742_v13 = vadd.f32 %v4741_v59, %v4740_v0 }
 0x6ad   :  { %v4632_v29 = vrot.slane %v4631_v40, 1  ;;  %v4706_v7 = vrot.slane %v4705_v39, 1 }
 0x6ae   :  { %v4669_v50 = vrot.slane %v4668_v42, 1  ;;  %v4743_v37 = vrot.slane %v4742_v13, 1 }
 0x6af   :  { %v4633_v31 = vadd.f32 %v4632_v29, %v4631_v40  ;;  %v4707_v8 = vadd.f32 %v4706_v7, %v4705_v39 }
 0x6b0   :  { %v4670_v6 = vadd.f32 %v4669_v50, %v4668_v42  ;;  %v4744_v52 = vadd.f32 %v4743_v37, %v4742_v13 }
 0x6b1   :  { %v4749_v26 = vadd.f32 %v4747_v35, %v4633_v31  ;;  %v4751_v60 = vadd.f32 %v4747_v35, %v4707_v8 }
 0x6b2   :  { %v4750_v34 = vadd.f32 %v4747_v35, %v4670_v6  ;;  %v4752_v45 = vadd.f32 %v4747_v35, %v4744_v52 }
 0x6b4   :  { %v4757_v47 = vcombine.low %v4749_v26, %v4750_v34  ;;  %v4758_v15 = vcombine.low %v4751_v60, %v4752_v45 }
 0x6b6   :  { %v4765_v20 = vrot.slane %v4757_v47, %v4764_v56  ;;  %v4772_v51 = vrot.slane %v4758_v15, %v4764_v56 }
 0x6b8   :  { %v4773_v33 = vcombine.low %v4765_v20, %v4772_v51 }
 0x6ba   :  { %v4780_v61 = vrot.slane %v4773_v33, %v4764_v56 }
 0x6bc   :  { %4786 = vst.msk [vmem:[%s6817_s6] sm:$0xf] %vm4784_vm0, %v4780_v61 }

</bundles_post_ra>
